<compile_context>
chip_gen: v7x
topology: tpu7x:2x2x1
jax: 0.10.0
libtpu: 0.0.40
codegen_flags: <defaults>
</compile_context>

<pallas_src>
import jax
import jax.numpy as jnp
from jax.experimental import pallas as pl
from jax.experimental.pallas import tpu as pltpu


def actor_kernel(x_ref, w1_ref, b1_ref, w2_ref, b2_ref, w3_ref, b3_ref, o_ref):
    # x_ref: (tb, S) batch tile in natural layout.
    # Weights are transposed (in, out); biases are (1, out) rows.
    x = x_ref[...]
    # Layer 1: Linear + ReLU -> (tb, H1)
    h1 = jnp.dot(x, w1_ref[...], preferred_element_type=jnp.float32) + b1_ref[...]
    h1 = jnp.maximum(h1, 0.0)
    # Layer 2: Linear + ReLU -> (tb, H2)
    h2 = jnp.dot(h1, w2_ref[...], preferred_element_type=jnp.float32) + b2_ref[...]
    h2 = jnp.maximum(h2, 0.0)
    # Layer 3: Linear + tan  -> (tb, A_pad).  tan = sin * (1/cos): sin/cos on
    # the EUP, exact reciprocal (approx=False) to match torch.tan within tol.
    z = jnp.dot(h2, w3_ref[...], preferred_element_type=jnp.float32) + b3_ref[...]
    o_ref[...] = jnp.sin(z) * pl.reciprocal(jnp.cos(z), approx=False)


def actor_forward(x, params, num_actions, *, tb=1024):
    """x: (B, NUM_STATES) f32 -> (B, num_actions) f32.

    params: (w1t, b1, w2t, b2, w3t, b3) with
      w1t: (NUM_STATES, H1), w2t: (H1, H2), w3t: (H2, A_pad)  (transposed,
      A_pad zero-padded output columns), biases: (1, out).
    tb: batch tile; use 1024-2048 for large PPO rollout batches.  It is
    automatically capped so the grid has >= 2 steps (v7x megacore) and
    rounded to a multiple of 8 sublanes.
    """
    w1t, b1, w2t, b2, w3t, b3 = params
    B, S = x.shape
    A_pad = w3t.shape[1]

    # Keep >= 2 grid steps when possible so the "parallel" batch axis can be
    # sharded across both TensorCores on v7x; round the tile to 8 sublanes.
    half_b = -(-((B + 1) // 2) // 8) * 8
    tb = max(8, min(int(tb), half_b))
    tb = -(-tb // 8) * 8
    n_tiles = pl.cdiv(B, tb)
    Bp = n_tiles * tb

    xp = x.astype(jnp.float32)
    if Bp != B:
        # Only wrapper-side data movement: pad the batch tail to the tile grid.
        xp = jnp.pad(xp, ((0, Bp - B), (0, 0)))

    def resident(a):  # weights/biases: DMA'd once, stay VMEM-resident
        return pl.BlockSpec(a.shape, lambda i: (0, 0))

    out = pl.pallas_call(
        actor_kernel,
        out_shape=jax.ShapeDtypeStruct((Bp, A_pad), jnp.float32),
        grid=(n_tiles,),
        in_specs=[
            pl.BlockSpec((tb, S), lambda i: (i, 0)),   # x: tiled on batch
            resident(w1t), resident(b1),
            resident(w2t), resident(b2),
            resident(w3t), resident(b3),
        ],
        out_specs=pl.BlockSpec((tb, A_pad), lambda i: (i, 0)),  # contiguous writeback
        compiler_params=pltpu.CompilerParams(
            dimension_semantics=("parallel",),   # shard batch across TCs on v7x
        ),
    )(xp, w1t, b1, w2t, b2, w3t, b3)

    # Pure slicing -- no transpose -- back to the PyTorch convention.
    return out[:B, :num_actions]


def init_linear(key, fan_in, fan_out, pad_out=None):
    """nn.Linear-style init: U(-1/sqrt(fan_in), +1/sqrt(fan_in)).

    Returns ((wt, b_row), (w, b)):
      wt    : (fan_in, pad_out) transposed weight, zero-padded output columns,
      b_row : (1, pad_out) bias row, zero-padded,
      (w, b): PyTorch-layout (fan_out, fan_in) weight and (fan_out,) bias for
              the pure-JAX reference.
    """
    pad_out = fan_out if pad_out is None else pad_out
    kw, kb = jax.random.split(key)
    bound = 1.0 / jnp.sqrt(fan_in)
    w = jax.random.uniform(kw, (fan_out, fan_in), jnp.float32, -bound, bound)
    b = jax.random.uniform(kb, (fan_out,), jnp.float32, -bound, bound)
    wt = jnp.zeros((fan_in, pad_out), jnp.float32).at[:, :fan_out].set(w.T)
    b_row = jnp.zeros((1, pad_out), jnp.float32).at[0, :fan_out].set(b)
    return (wt, b_row), (w, b)


if __name__ == "__main__":
    # HopperBulletEnv-v0: observation dim 15, action dim 3.
    NUM_STATES = 15
    NUM_ACTIONS = 3
    A_PAD = 8                 # output columns padded to a full sublane group
    H1 = 32
    H2 = 32
    BATCH = 500               # small demo batch: exercises 2 tiles + tail padding
    # Production tb default is 1024-2048; with BATCH=500 the >=2-step cap
    # automatically brings the effective tile down to 256.

    key = jax.random.PRNGKey(0)
    k_x, k1, k2, k3 = jax.random.split(key, 4)

    (w1t, b1r), (w1, b1) = init_linear(k1, NUM_STATES, H1)
    (w2t, b2r), (w2, b2) = init_linear(k2, H1, H2)
    (w3t, b3r), (w3, b3) = init_linear(k3, H2, NUM_ACTIONS, pad_out=A_PAD)
    params = (w1t, b1r, w2t, b2r, w3t, b3r)

    x = jax.random.normal(k_x, (BATCH, NUM_STATES), jnp.float32)

    out = actor_forward(x, params, NUM_ACTIONS)   # default tb=1024, auto-capped
    out = jax.block_until_ready(out)

    # Pure-JAX reference of the same math in the PyTorch convention.
    ref_h1 = jnp.maximum(x @ w1.T + b1, 0.0)
    ref_h2 = jnp.maximum(ref_h1 @ w2.T + b2, 0.0)
    ref = jnp.tan(ref_h2 @ w3.T + b3)

    assert out.shape == (BATCH, NUM_ACTIONS)
    assert jnp.allclose(out, ref, atol=1e-4, rtol=1e-3), float(jnp.max(jnp.abs(out - ref)))

    # NOTE: ACTION_SELECTION_VARIANCE / MultivariateNormal sampling is not part
    # of forward(); forward() only returns the tan-squashed action mean.
    print("KERNEL_OK")
</pallas_src>

<mosaic_0001>
module attributes {stable_mosaic.version = 11 : i64} {
  func.func @actor_kernel(%arg0: i32, %arg1: memref<256x15xf32, #tpu.memory_space<vmem>>, %arg2: memref<15x32xf32, #tpu.memory_space<vmem>>, %arg3: memref<1x32xf32, #tpu.memory_space<vmem>>, %arg4: memref<32x32xf32, #tpu.memory_space<vmem>>, %arg5: memref<1x32xf32, #tpu.memory_space<vmem>>, %arg6: memref<32x8xf32, #tpu.memory_space<vmem>>, %arg7: memref<1x8xf32, #tpu.memory_space<vmem>>, %arg8: memref<256x8xf32, #tpu.memory_space<vmem>>) attributes {dimension_semantics = [#tpu.dimension_semantics<parallel>], iteration_bounds = array<i64: 2>, scalar_prefetch = 0 : i64, scratch_operands = 0 : i64, tpu.core_type = #tpu.core_type<tc>, window_params = [{transform_indices = @transform_0, window_bounds = array<i64: 256, 15>}, {pipeline_mode = #tpu.pipeline_mode<synchronous>, transform_indices = @transform_1, window_bounds = array<i64: 15, 32>}, {pipeline_mode = #tpu.pipeline_mode<synchronous>, transform_indices = @transform_2, window_bounds = array<i64: 1, 32>}, {pipeline_mode = #tpu.pipeline_mode<synchronous>, transform_indices = @transform_3, window_bounds = array<i64: 32, 32>}, {pipeline_mode = #tpu.pipeline_mode<synchronous>, transform_indices = @transform_4, window_bounds = array<i64: 1, 32>}, {pipeline_mode = #tpu.pipeline_mode<synchronous>, transform_indices = @transform_5, window_bounds = array<i64: 32, 8>}, {pipeline_mode = #tpu.pipeline_mode<synchronous>, transform_indices = @transform_6, window_bounds = array<i64: 1, 8>}, {transform_indices = @transform_7, window_bounds = array<i64: 256, 8>}]} {
    %c0 = arith.constant 0 : index
    %c0_0 = arith.constant 0 : index
    %0 = vector.load %arg1[%c0, %c0_0] : memref<256x15xf32, #tpu.memory_space<vmem>>, vector<256x15xf32>
    %c0_1 = arith.constant 0 : index
    %c0_2 = arith.constant 0 : index
    %1 = vector.load %arg2[%c0_1, %c0_2] : memref<15x32xf32, #tpu.memory_space<vmem>>, vector<15x32xf32>
    %cst = arith.constant dense<0.000000e+00> : vector<256x32xf32>
    %2 = tpu.matmul %0, %1, %cst {dimension_numbers = #tpu.dot_dimension_numbers<[1], [0], [0], [1], [0, 0, 1, 1], [], []>} : vector<256x15xf32>, vector<15x32xf32>, vector<256x32xf32> -> vector<256x32xf32>
    %c0_3 = arith.constant 0 : index
    %c0_4 = arith.constant 0 : index
    %3 = vector.load %arg3[%c0_3, %c0_4] : memref<1x32xf32, #tpu.memory_space<vmem>>, vector<1x32xf32>
    %4 = vector.broadcast %3 : vector<1x32xf32> to vector<256x32xf32>
    %5 = arith.addf %2, %4 : vector<256x32xf32>
    %cst_5 = arith.constant 0.000000e+00 : f32
    %6 = vector.broadcast %cst_5 : f32 to vector<256x32xf32>
    %7 = arith.maximumf %5, %6 : vector<256x32xf32>
    %c0_6 = arith.constant 0 : index
    %c0_7 = arith.constant 0 : index
    %8 = vector.load %arg4[%c0_6, %c0_7] : memref<32x32xf32, #tpu.memory_space<vmem>>, vector<32x32xf32>
    %cst_8 = arith.constant dense<0.000000e+00> : vector<256x32xf32>
    %9 = tpu.matmul %7, %8, %cst_8 {dimension_numbers = #tpu.dot_dimension_numbers<[1], [0], [0], [1], [0, 0, 1, 1], [], []>} : vector<256x32xf32>, vector<32x32xf32>, vector<256x32xf32> -> vector<256x32xf32>
    %c0_9 = arith.constant 0 : index
    %c0_10 = arith.constant 0 : index
    %10 = vector.load %arg5[%c0_9, %c0_10] : memref<1x32xf32, #tpu.memory_space<vmem>>, vector<1x32xf32>
    %11 = vector.broadcast %10 : vector<1x32xf32> to vector<256x32xf32>
    %12 = arith.addf %9, %11 : vector<256x32xf32>
    %cst_11 = arith.constant 0.000000e+00 : f32
    %13 = vector.broadcast %cst_11 : f32 to vector<256x32xf32>
    %14 = arith.maximumf %12, %13 : vector<256x32xf32>
    %c0_12 = arith.constant 0 : index
    %c0_13 = arith.constant 0 : index
    %15 = vector.load %arg6[%c0_12, %c0_13] : memref<32x8xf32, #tpu.memory_space<vmem>>, vector<32x8xf32>
    %cst_14 = arith.constant dense<0.000000e+00> : vector<256x8xf32>
    %16 = tpu.matmul %14, %15, %cst_14 {dimension_numbers = #tpu.dot_dimension_numbers<[1], [0], [0], [1], [0, 0, 1, 1], [], []>} : vector<256x32xf32>, vector<32x8xf32>, vector<256x8xf32> -> vector<256x8xf32>
    %c0_15 = arith.constant 0 : index
    %c0_16 = arith.constant 0 : index
    %17 = vector.load %arg7[%c0_15, %c0_16] : memref<1x8xf32, #tpu.memory_space<vmem>>, vector<1x8xf32>
    %18 = vector.broadcast %17 : vector<1x8xf32> to vector<256x8xf32>
    %19 = arith.addf %16, %18 : vector<256x8xf32>
    %20 = math.sin %19 : vector<256x8xf32>
    %21 = math.cos %19 : vector<256x8xf32>
    %22 = tpu.reciprocal %21 : vector<256x8xf32> -> vector<256x8xf32>
    %23 = arith.mulf %20, %22 : vector<256x8xf32>
    %c0_17 = arith.constant 0 : index
    %c0_18 = arith.constant 0 : index
    %24 = vector.load %arg8[%c0_17, %c0_18] : memref<256x8xf32, #tpu.memory_space<vmem>>, vector<256x8xf32>
    tpu.vector_store %arg8[%c0_17, %c0_18], %23 {strides = array<i32>} : memref<256x8xf32, #tpu.memory_space<vmem>>, vector<256x8xf32>,
    return
  }
  func.func @transform_0(%arg0: i32) -> (i32, i32) {
    %c0_i32 = arith.constant 0 : i32
    %c0_i32_0 = arith.constant 0 : i32
    return %arg0, %c0_i32 : i32, i32
  }
  func.func @transform_1(%arg0: i32) -> (i32, i32) {
    %c0_i32 = arith.constant 0 : i32
    %c0_i32_0 = arith.constant 0 : i32
    %c0_i32_1 = arith.constant 0 : i32
    return %c0_i32, %c0_i32_0 : i32, i32
  }
  func.func @transform_2(%arg0: i32) -> (i32, i32) {
    %c0_i32 = arith.constant 0 : i32
    %c0_i32_0 = arith.constant 0 : i32
    %c0_i32_1 = arith.constant 0 : i32
    return %c0_i32, %c0_i32_0 : i32, i32
  }
  func.func @transform_3(%arg0: i32) -> (i32, i32) {
    %c0_i32 = arith.constant 0 : i32
    %c0_i32_0 = arith.constant 0 : i32
    %c0_i32_1 = arith.constant 0 : i32
    return %c0_i32, %c0_i32_0 : i32, i32
  }
  func.func @transform_4(%arg0: i32) -> (i32, i32) {
    %c0_i32 = arith.constant 0 : i32
    %c0_i32_0 = arith.constant 0 : i32
    %c0_i32_1 = arith.constant 0 : i32
    return %c0_i32, %c0_i32_0 : i32, i32
  }
  func.func @transform_5(%arg0: i32) -> (i32, i32) {
    %c0_i32 = arith.constant 0 : i32
    %c0_i32_0 = arith.constant 0 : i32
    %c0_i32_1 = arith.constant 0 : i32
    return %c0_i32, %c0_i32_0 : i32, i32
  }
  func.func @transform_6(%arg0: i32) -> (i32, i32) {
    %c0_i32 = arith.constant 0 : i32
    %c0_i32_0 = arith.constant 0 : i32
    %c0_i32_1 = arith.constant 0 : i32
    return %c0_i32, %c0_i32_0 : i32, i32
  }
  func.func @transform_7(%arg0: i32) -> (i32, i32) {
    %c0_i32 = arith.constant 0 : i32
    %c0_i32_0 = arith.constant 0 : i32
    return %arg0, %c0_i32 : i32, i32
  }
}

</mosaic_0001>

<bundles_post_ra>
// kernel: tpu_custom_call.1
= control target key start
LH: loop header
LB: loop body
LE: loop exit
PB: predicated region body
PF: predicated region fallthrough
CT: control target
= control target key end

     0   :  { %s9211_s24 = smov 0   ;;  %s12808_s0 = inlined_call_operand.vmem [shape: f32[512,15], index: 0, kind: input, shape index: {}]   ;;  %s12809_s1 = inlined_call_operand.vmem [shape: f32[15,32], index: 1, kind: input, shape index: {}]   ;;  %s12810_s2 = inlined_call_operand.vmem [shape: f32[1,32], index: 2, kind: input, shape index: {}]   ;;  %s12811_s3 = inlined_call_operand.vmem [shape: f32[32,32], index: 3, kind: input, shape index: {}]   ;;  %s12812_s4 = inlined_call_operand.vmem [shape: f32[1,32], index: 4, kind: input, shape index: {}]   ;;  %s12813_s5 = inlined_call_operand.vmem [shape: f32[32,8], index: 5, kind: input, shape index: {}]   ;;  %s12814_s6 = inlined_call_operand.vmem [shape: f32[1,8], index: 6, kind: input, shape index: {}]   ;;  %s12815_s7 = inlined_call_operand.vmem [shape: f32[512,8], index: 7, kind: output, shape index: {}]  }
   0x1 LB: > { %s8155_s25 = sadd.s32 4294967295, %s9162_s24   ;;  %p8159_p0 = scmp.ge.s32.totalorder %s9162_s24, 1  ;;  %s9162_s24 = sphi %s9211_s24, %s17_s24  }
   0x2   : > { %p238_p1 = scmp.lt.s32.totalorder %s9162_s24, 3 }
   0x4   : > { %p239_p2 = pnand %p8159_p0, %p238_p1 }
   0x5   : > { %v314_v0 = vld [vmem:[%s12809_s1] sm:$0xff] (!%p239_p2)  ;;  %v315_v1 = vld [vmem:[%s12809_s1 + $0x8] sm:$0x7f] (!%p239_p2)  ;;  %vm420_vm0 = vcmask (!%p239_p2), 1046528   ;;  %s8160_s30 = sshll.u32 (!%p239_p2), %s8155_s25, 5  ;;  %vm9164_vm1 = vmmov (!%p239_p2), 1  }
   0x6   : > { %242 = sbr.rel (%p239_p2) target bundleno = 1585 (0x631), region = 48  ;;  %v8792_v2 = vpack.c.bf16 (!%p239_p2), %v315_v1, %v314_v0  ;;  %vm8793_vm2 = vmpackc.low (!%p239_p2), %vm420_vm0, %vm9164_vm1  ;;  %p271_p3 = scmp.lt.s32.totalorder (!%p239_p2), %s8160_s30, 63  ;;  %v681_v3 = vld [vmem:[%s12811_s3] sm:$0xff] (!%p239_p2)  ;;  %v682_v4 = vld [vmem:[%s12811_s3 + $0x8] sm:$0xff] (!%p239_p2)  ;;  %vm323_vm3 = vcmask (!%p239_p2), 121856   ;;  %vm692_vm4 = vcmask (!%p239_p2), 261120  }
   0x7   : > { %v8798_v5 = vpack.c.bf16 (!%p239_p2), %v682_v4, %v681_v3  ;;  %v683_v9 = vld [vmem:[%s12811_s3 + $0x10] sm:$0xff] (!%p239_p2)  ;;  %v684_v10 = vld [vmem:[%s12811_s3 + $0x18] sm:$0xff] (!%p239_p2)  ;;  %v1046_v41 = vld [vmem:[%s12813_s5] sm:$0xff] (!%p239_p2) }
   0x8   : > { %8794 = vmatprep.subr.msk.bf16.mxu0 (!%p239_p2), %vm8793_vm2, %v8792_v2  ;;  %8814 = vmatprep.subr.msk.bf16.mxu1 (!%p239_p2), %vm8793_vm2, %v8792_v2  ;;  %v8802_v15 = vpack.c.bf16 (!%p239_p2), %v684_v10, %v683_v9  ;;  %v1047_v42 = vld [vmem:[%s12813_s5 + $0x8] sm:$0xff] (!%p239_p2)  ;;  %v1048_v43 = vld [vmem:[%s12813_s5 + $0x10] sm:$0xff] (!%p239_p2)  ;;  %v1049_v45 = vld [vmem:[%s12813_s5 + $0x18] sm:$0xff] (!%p239_p2) }
   0x9   : > { %8797 = vmatpush3.bf16.msk.msra.mxu0 (!%p239_p2), %vm8793_vm2, %v8792_v2  ;;  %8815 = vmatpush3.bf16.msk.msra.mxu1 (!%p239_p2), %vm8793_vm2, %v8792_v2  ;;  %v8806_v44 = vpack.c.bf16 (!%p239_p2), %v1047_v42, %v1046_v41  ;;  %v8810_v46 = vpack.c.bf16 (!%p239_p2), %v1049_v45, %v1048_v43  ;;  %v9326_v47 = vld [vmem:[%s12810_s2] ss:$0 sm:$0xff] (!%p239_p2) }
   0xa   : > { %8799 = vmatprep.subr.bf16.mxu1 (!%p239_p2), %v8798_v5 }
   0xb   : > { %8807 = vmatprep.subr.bf16.mxu0 (!%p239_p2), %v8806_v44 }
   0xd   : > { %s12877_s30 = smov (!%p271_p3, %s8160_s30), 63 }
   0xe   : > { %s8161_s12 = sshll.u32 %s12877_s30, 3 }
   0xf   : > { %s9239_s15 = scalar_lea.vmem %s12808_s0, %s8161_s12  ;;  %s9829_s16 = scalar_lea.vmem %s12815_s7, %s8161_s12 }
  0x10   : > { %v282_v6 = vld [vmem:[%s9239_s15] sm:$0xff]  ;;  %v283_v7 = vld [vmem:[%s9239_s15 + $0x8] sm:$0xff]  ;;  %v284_v8 = vld [vmem:[%s9239_s15 + $0x10] sm:$0xff] }
  0x11   : > { %8632 = vmatprep.mubr.msk.f32.mxu0 %vm323_vm3, %v282_v6  ;;  %v285_v11 = vld [vmem:[%s9239_s15 + $0x18] sm:$0xff]  ;;  %v286_v12 = vld [vmem:[%s9239_s15 + $0x20] sm:$0xff]  ;;  %v299_v14 = vld [vmem:[%s9239_s15 + $0x88] sm:$0xff] }
  0x12   : > { %8633 = vmatmul.mubr.msk.f32.vlgmr.msra.gmra.mrb[0].mxu0 %vm323_vm3, %v283_v7  ;;  %v298_v13 = vld [vmem:[%s9239_s15 + $0x80] sm:$0xff]  ;;  %v300_v16 = vld [vmem:[%s9239_s15 + $0x90] sm:$0xff]  ;;  %v287_v17 = vld [vmem:[%s9239_s15 + $0x28] sm:$0xff] }
  0x13   : > { %8635 = vmatprep.mubr.msk.f32.mxu0 %vm323_vm3, %v284_v8  ;;  %8656 = vmatprep.mubr.msk.f32.mxu1 %vm323_vm3, %v298_v13  ;;  %v288_v18 = vld [vmem:[%s9239_s15 + $0x30] sm:$0xff]  ;;  %v301_v19 = vld [vmem:[%s9239_s15 + $0x98] sm:$0xff]  ;;  %v302_v20 = vld [vmem:[%s9239_s15 + $0xa0] sm:$0xff] }
  0x14   : > { %8657 = vmatmul.mubr.msk.f32.vlgmr.msra.gmra.mrb[0].mxu1 %vm323_vm3, %v299_v14  ;;  %v289_v21 = vld [vmem:[%s9239_s15 + $0x38] sm:$0xff]  ;;  %v290_v22 = vld [vmem:[%s9239_s15 + $0x40] sm:$0xff]  ;;  %v303_v23 = vld [vmem:[%s9239_s15 + $0xa8] sm:$0xff]  ;;  %8809 = vmatpush3.bf16.msra.mxu0 %v8806_v44 }
  0x15   : > { %8659 = vmatprep.mubr.msk.f32.mxu1 %vm323_vm3, %v300_v16  ;;  %8801 = vmatpush3.bf16.msra.mxu1 %v8798_v5  ;;  %v304_v24 = vld [vmem:[%s9239_s15 + $0xb0] sm:$0xff]  ;;  %v291_v25 = vld [vmem:[%s9239_s15 + $0x48] sm:$0xff]  ;;  %v305_v27 = vld [vmem:[%s9239_s15 + $0xb8] sm:$0xff] }
  0x16   : > { %8636 = vmatmul.mubr.msk.f32.gmra.mrb[2].mxu0 %vm323_vm3, %v285_v11  ;;  %8803 = vmatprep.subr.bf16.mxu1 %v8802_v15  ;;  %v292_v26 = vld [vmem:[%s9239_s15 + $0x50] sm:$0xff]  ;;  %v306_v28 = vld [vmem:[%s9239_s15 + $0xc0] sm:$0xff]  ;;  %v293_v29 = vld [vmem:[%s9239_s15 + $0x58] sm:$0xff] }
  0x17   : > { %8638 = vmatprep.mubr.msk.f32.mxu0 %vm323_vm3, %v286_v12  ;;  %v294_v30 = vld [vmem:[%s9239_s15 + $0x60] sm:$0xff]  ;;  %v307_v31 = vld [vmem:[%s9239_s15 + $0xc8] sm:$0xff]  ;;  %v308_v32 = vld [vmem:[%s9239_s15 + $0xd0] sm:$0xff]  ;;  %8811 = vmatprep.subr.bf16.mxu0 %v8810_v46 }
  0x18   : > { %8660 = vmatmul.mubr.msk.f32.gmra.mrb[2].mxu1 %vm323_vm3, %v301_v19  ;;  %v295_v33 = vld [vmem:[%s9239_s15 + $0x68] sm:$0xff]  ;;  %v296_v34 = vld [vmem:[%s9239_s15 + $0x70] sm:$0xff]  ;;  %v309_v35 = vld [vmem:[%s9239_s15 + $0xd8] sm:$0xff]  ;;  %8813 = vmatpush3.bf16.msra.mxu0 %v8810_v46 }
  0x19   : > { %8662 = vmatprep.mubr.msk.f32.mxu1 %vm323_vm3, %v302_v20  ;;  %8805 = vmatpush3.bf16.msra.mxu1 %v8802_v15  ;;  %v310_v36 = vld [vmem:[%s9239_s15 + $0xe0] sm:$0xff]  ;;  %v297_v37 = vld [vmem:[%s9239_s15 + $0x78] sm:$0xff]  ;;  %v311_v38 = vld [vmem:[%s9239_s15 + $0xe8] sm:$0xff] }
  0x1a   : > { %8639 = vmatmul.mubr.msk.f32.gmra.mrb[4].mxu0 %vm323_vm3, %v287_v17  ;;  %v312_v39 = vld [vmem:[%s9239_s15 + $0xf0] sm:$0xff]  ;;  %v313_v40 = vld [vmem:[%s9239_s15 + $0xf8] sm:$0xff] }
  0x1b   : > { %8641 = vmatprep.mubr.msk.f32.mxu0 %vm323_vm3, %v288_v18 }
  0x1c   : > { %8663 = vmatmul.mubr.msk.f32.gmra.mrb[4].mxu1 %vm323_vm3, %v303_v23 }
  0x1d   : > { %8665 = vmatprep.mubr.msk.f32.mxu1 %vm323_vm3, %v304_v24 }
  0x1e   : > { %8642 = vmatmul.mubr.msk.f32.gmra.mrb[6].mxu0 %vm323_vm3, %v289_v21 }
  0x1f   : > { %8644 = vmatprep.mubr.msk.f32.mxu0 %vm323_vm3, %v290_v22 }
  0x20   : > { %8666 = vmatmul.mubr.msk.f32.gmra.mrb[6].mxu1 %vm323_vm3, %v305_v27 }
  0x21   : > { %8668 = vmatprep.mubr.msk.f32.mxu1 %vm323_vm3, %v306_v28 }
  0x22   : > { %8645 = vmatmul.mubr.msk.f32.gmra.mrb[8].mxu0 %vm323_vm3, %v291_v25 }
  0x23   : > { %8647 = vmatprep.mubr.msk.f32.mxu0 %vm323_vm3, %v292_v26 }
  0x24   : > { %8669 = vmatmul.mubr.msk.f32.gmra.mrb[8].mxu1 %vm323_vm3, %v307_v31 }
  0x25   : > { %8671 = vmatprep.mubr.msk.f32.mxu1 %vm323_vm3, %v308_v32 }
  0x26   : > { %8648 = vmatmul.mubr.msk.f32.gmra.mrb[10].mxu0 %vm323_vm3, %v293_v29 }
  0x27   : > { %8650 = vmatprep.mubr.msk.f32.mxu0 %vm323_vm3, %v294_v30 }
  0x28   : > { %8672 = vmatmul.mubr.msk.f32.gmra.mrb[10].mxu1 %vm323_vm3, %v309_v35 }
  0x29   : > { %8674 = vmatprep.mubr.msk.f32.mxu1 %vm323_vm3, %v310_v36 }
  0x2a   : > { %8651 = vmatmul.mubr.msk.f32.gmra.mrb[12].mxu0 %vm323_vm3, %v295_v33 }
  0x2b   : > { %8653 = vmatprep.mubr.msk.f32.mxu0 %vm323_vm3, %v296_v34 }
  0x2c   : > { %8675 = vmatmul.mubr.msk.f32.gmra.mrb[12].mxu1 %vm323_vm3, %v311_v38 }
  0x2d   : > { %8677 = vmatprep.mubr.msk.f32.mxu1 %vm323_vm3, %v312_v39 }
  0x2e   : > { %8654 = vmatmul.mubr.msk.f32.gmra.mrb[14].mxu0 %vm323_vm3, %v297_v37 }
  0x30   : > { %8678 = vmatmul.mubr.msk.f32.gmra.mrb[14].mxu1 %vm323_vm3, %v313_v40 }
  0xe5   : > { %v8634_v48 = vpop.f32.mrb[0].mxu0 }
  0xe6   : > { %v496_v49 = vadd.f32 %v8634_v48, %v9326_v47  ;;  %v490_v50 = vpop.f32.mrb[1].mxu0 }
  0xe7   : > { %v491_v51 = vadd.f32 %v9326_v47, %v490_v50  ;;  %v9331_v57 = vpop.f32.mrb[0].mxu1 }
  0xe8   : > { %v650_v54 = vmax.f32 %v496_v49, 0.0  ;;  %v570_v59 = vpop.f32.mrb[1].mxu1  ;;  %v576_v50 = vadd.f32 %v9331_v57, %v9326_v47 }
  0xe9   : > { %v649_v52 = vmax.f32 %v491_v51, 0.0  ;;  %v8637_v53 = vpop.f32.mrb[2].mxu0  ;;  %v571_v38 = vadd.f32 %v9326_v47, %v570_v59 }
  0xea   : > { %v506_v55 = vadd.f32 %v8637_v53, %v9326_v47  ;;  %v500_v56 = vpop.f32.mrb[3].mxu0 }
  0xeb   : > { %v501_v58 = vadd.f32 %v9326_v47, %v500_v56  ;;  %8688 = vmatprep.mubr.msk.f32.mxu1 %vm692_vm4, %v649_v52  ;;  %v9337_v1 = vpop.f32.mrb[2].mxu1  ;;  %v665_v46 = vmax.f32 %v571_v38, 0.0 }
  0xec   : > { %8689 = vmatmul.mubr.msk.f32.vlgmr.msra.gmra.mrb[16].mxu1 %vm692_vm4, %v650_v54  ;;  %v652_v62 = vmax.f32 %v506_v55, 0.0  ;;  %v580_v3 = vpop.f32.mrb[3].mxu1  ;;  %v666_v55 = vmax.f32 %v576_v50, 0.0  ;;  %v586_v56 = vadd.f32 %v9337_v1, %v9326_v47 }
  0xed   : > { %v651_v60 = vmax.f32 %v501_v58, 0.0  ;;  %v8640_v61 = vpop.f32.mrb[4].mxu0  ;;  %v581_v48 = vadd.f32 %v9326_v47, %v580_v3 }
  0xee   : > { %v516_v63 = vadd.f32 %v8640_v61, %v9326_v47  ;;  %v510_v0 = vpop.f32.mrb[5].mxu0  ;;  %v668_v59 = vmax.f32 %v586_v56, 0.0 }
  0xef   : > { %v511_v2 = vadd.f32 %v9326_v47, %v510_v0  ;;  %8691 = vmatprep.mubr.msk.f32.mxu1 %vm692_vm4, %v651_v60  ;;  %v9343_v9 = vpop.f32.mrb[4].mxu1  ;;  %v667_v53 = vmax.f32 %v581_v48, 0.0 }
  0xf0   : > { %8692 = vmatmul.mubr.msk.f32.gmra.mrb[18].mxu1 %vm692_vm4, %v652_v62  ;;  %v654_v6 = vmax.f32 %v516_v63, 0.0  ;;  %v590_v11 = vpop.f32.mrb[5].mxu1  ;;  %v596_v60 = vadd.f32 %v9343_v9, %v9326_v47 }
  0xf1   : > { %v653_v4 = vmax.f32 %v511_v2, 0.0  ;;  %v8643_v5 = vpop.f32.mrb[6].mxu0  ;;  %v591_v54 = vadd.f32 %v9326_v47, %v590_v11 }
  0xf2   : > { %v526_v7 = vadd.f32 %v8643_v5, %v9326_v47  ;;  %v520_v8 = vpop.f32.mrb[7].mxu0  ;;  %v670_v63 = vmax.f32 %v596_v60, 0.0 }
  0xf3   : > { %v521_v10 = vadd.f32 %v9326_v47, %v520_v8  ;;  %8694 = vmatprep.mubr.msk.f32.mxu1 %vm692_vm4, %v653_v4  ;;  %v8667_v17 = vpop.f32.mrb[6].mxu1  ;;  %v669_v58 = vmax.f32 %v591_v54, 0.0 }
  0xf4   : > { %8695 = vmatmul.mubr.msk.f32.gmra.mrb[20].mxu1 %vm692_vm4, %v654_v6  ;;  %v656_v14 = vmax.f32 %v526_v7, 0.0  ;;  %v600_v19 = vpop.f32.mrb[7].mxu1  ;;  %v606_v0 = vadd.f32 %v8667_v17, %v9326_v47  ;;  %v9404_v17 = vld [vmem:[%s12812_s4] ss:$0 sm:$0xff] }
  0xf5   : > { %v655_v12 = vmax.f32 %v521_v10, 0.0  ;;  %v8646_v13 = vpop.f32.mrb[8].mxu0  ;;  %v601_v57 = vadd.f32 %v9326_v47, %v600_v19 }
  0xf6   : > { %v536_v15 = vadd.f32 %v8646_v13, %v9326_v47  ;;  %v530_v16 = vpop.f32.mrb[9].mxu0  ;;  %v672_v3 = vmax.f32 %v606_v0, 0.0 }
  0xf7   : > { %v531_v18 = vadd.f32 %v9326_v47, %v530_v16  ;;  %8697 = vmatprep.mubr.msk.f32.mxu1 %vm692_vm4, %v655_v12  ;;  %v8670_v25 = vpop.f32.mrb[8].mxu1  ;;  %v671_v61 = vmax.f32 %v601_v57, 0.0 }
  0xf8   : > { %8698 = vmatmul.mubr.msk.f32.gmra.mrb[22].mxu1 %vm692_vm4, %v656_v14  ;;  %v658_v22 = vmax.f32 %v536_v15, 0.0  ;;  %v610_v27 = vpop.f32.mrb[9].mxu1  ;;  %v616_v4 = vadd.f32 %v8670_v25, %v9326_v47 }
  0xf9   : > { %v657_v20 = vmax.f32 %v531_v18, 0.0  ;;  %v8649_v21 = vpop.f32.mrb[10].mxu0  ;;  %v611_v62 = vadd.f32 %v9326_v47, %v610_v27 }
  0xfa   : > { %v546_v23 = vadd.f32 %v8649_v21, %v9326_v47  ;;  %v540_v24 = vpop.f32.mrb[11].mxu0  ;;  %v674_v7 = vmax.f32 %v616_v4, 0.0 }
  0xfb   : > { %v541_v26 = vadd.f32 %v9326_v47, %v540_v24  ;;  %8700 = vmatprep.mubr.msk.f32.mxu1 %vm692_vm4, %v657_v20  ;;  %v8673_v33 = vpop.f32.mrb[10].mxu1  ;;  %v673_v1 = vmax.f32 %v611_v62, 0.0 }
  0xfc   : > { %8701 = vmatmul.mubr.msk.f32.gmra.mrb[24].mxu1 %vm692_vm4, %v658_v22  ;;  %v660_v30 = vmax.f32 %v546_v23, 0.0  ;;  %v620_v35 = vpop.f32.mrb[11].mxu1  ;;  %v626_v8 = vadd.f32 %v8673_v33, %v9326_v47 }
  0xfd   : > { %v659_v28 = vmax.f32 %v541_v26, 0.0  ;;  %v8652_v29 = vpop.f32.mrb[12].mxu0  ;;  %v621_v2 = vadd.f32 %v9326_v47, %v620_v35 }
  0xfe   : > { %v556_v31 = vadd.f32 %v8652_v29, %v9326_v47  ;;  %v550_v32 = vpop.f32.mrb[13].mxu0  ;;  %v676_v11 = vmax.f32 %v626_v8, 0.0 }
  0xff   : > { %v551_v34 = vadd.f32 %v9326_v47, %v550_v32  ;;  %8703 = vmatprep.mubr.msk.f32.mxu1 %vm692_vm4, %v659_v28  ;;  %v8676_v42 = vpop.f32.mrb[12].mxu1  ;;  %v675_v5 = vmax.f32 %v621_v2, 0.0 }
 0x100   : > { %8704 = vmatmul.mubr.msk.f32.gmra.mrb[26].mxu1 %vm692_vm4, %v660_v30  ;;  %v662_v39 = vmax.f32 %v556_v31, 0.0  ;;  %v630_v44 = vpop.f32.mrb[13].mxu1  ;;  %v636_v12 = vadd.f32 %v8676_v42, %v9326_v47 }
 0x101   : > { %v661_v36 = vmax.f32 %v551_v34, 0.0  ;;  %v8655_v37 = vpop.f32.mrb[14].mxu0  ;;  %v631_v6 = vadd.f32 %v9326_v47, %v630_v44 }
 0x102   : > { %v566_v40 = vadd.f32 %v8655_v37, %v9326_v47  ;;  %v560_v41 = vpop.f32.mrb[15].mxu0  ;;  %v678_v14 = vmax.f32 %v636_v12, 0.0 }
 0x103   : > { %v561_v43 = vadd.f32 %v9326_v47, %v560_v41  ;;  %8706 = vmatprep.mubr.msk.f32.mxu1 %vm692_vm4, %v661_v36  ;;  %v8679_v51 = vpop.f32.mrb[14].mxu1  ;;  %v677_v9 = vmax.f32 %v631_v6, 0.0 }
 0x104   : > { %8707 = vmatmul.mubr.msk.f32.gmra.mrb[28].mxu1 %vm692_vm4, %v662_v39  ;;  %v664_v49 = vmax.f32 %v566_v40, 0.0  ;;  %v640_v52 = vpop.f32.mrb[15].mxu1  ;;  %v646_v15 = vadd.f32 %v8679_v51, %v9326_v47 }
 0x105   : > { %v663_v45 = vmax.f32 %v561_v43, 0.0  ;;  %v641_v10 = vadd.f32 %v9326_v47, %v640_v52 }
 0x106   : > { %v680_v16 = vmax.f32 %v646_v15, 0.0 }
 0x107   : > { %8709 = vmatprep.mubr.msk.f32.mxu1 %vm692_vm4, %v663_v45  ;;  %v679_v13 = vmax.f32 %v641_v10, 0.0 }
 0x108   : > { %8710 = vmatmul.mubr.msk.f32.gmra.mrb[30].mxu1 %vm692_vm4, %v664_v49 }
 0x109   : > { %8712 = vmatprep.mubr.msk.f32.mxu1 %vm692_vm4, %v665_v46 }
 0x10c   : > { %8713 = vmatmul.mubr.msk.f32.gmra.mrb[32].mxu1 %vm692_vm4, %v666_v55 }
 0x10d   : > { %8715 = vmatprep.mubr.msk.f32.mxu1 %vm692_vm4, %v667_v53 }
 0x110   : > { %8716 = vmatmul.mubr.msk.f32.gmra.mrb[34].mxu1 %vm692_vm4, %v668_v59 }
 0x111   : > { %8718 = vmatprep.mubr.msk.f32.mxu1 %vm692_vm4, %v669_v58 }
 0x114   : > { %8719 = vmatmul.mubr.msk.f32.gmra.mrb[36].mxu1 %vm692_vm4, %v670_v63 }
 0x115   : > { %8721 = vmatprep.mubr.msk.f32.mxu1 %vm692_vm4, %v671_v61 }
 0x118   : > { %8722 = vmatmul.mubr.msk.f32.gmra.mrb[38].mxu1 %vm692_vm4, %v672_v3 }
 0x119   : > { %8724 = vmatprep.mubr.msk.f32.mxu1 %vm692_vm4, %v673_v1 }
 0x11c   : > { %8725 = vmatmul.mubr.msk.f32.gmra.mrb[40].mxu1 %vm692_vm4, %v674_v7 }
 0x11d   : > { %8727 = vmatprep.mubr.msk.f32.mxu1 %vm692_vm4, %v675_v5 }
 0x120   : > { %8728 = vmatmul.mubr.msk.f32.gmra.mrb[42].mxu1 %vm692_vm4, %v676_v11 }
 0x121   : > { %8730 = vmatprep.mubr.msk.f32.mxu1 %vm692_vm4, %v677_v9 }
 0x124   : > { %8731 = vmatmul.mubr.msk.f32.gmra.mrb[44].mxu1 %vm692_vm4, %v678_v14 }
 0x125   : > { %8733 = vmatprep.mubr.msk.f32.mxu1 %vm692_vm4, %v679_v13 }
 0x128   : > { %8734 = vmatmul.mubr.msk.f32.gmra.mrb[46].mxu1 %vm692_vm4, %v680_v16 }
 0x1bf   : > { %v8690_v18 = vpop.f32.mrb[16].mxu1 }
 0x1c0   : > { %v861_v19 = vadd.f32 %v8690_v18, %v9404_v17  ;;  %v855_v20 = vpop.f32.mrb[17].mxu1 }
 0x1c1   : > { %v856_v21 = vadd.f32 %v9404_v17, %v855_v20 }
 0x1c2   : > { %v1015_v23 = vmax.f32 %v861_v19, 0.0 }
 0x1c3   : > { %v1014_v22 = vmax.f32 %v856_v21, 0.0  ;;  %v8693_v47 = vpop.f32.mrb[18].mxu1 }
 0x1c4   : > { %v871_v24 = vadd.f32 %v8693_v47, %v9404_v17  ;;  %v865_v25 = vpop.f32.mrb[19].mxu1 }
 0x1c5   : > { %v866_v26 = vadd.f32 %v9404_v17, %v865_v25  ;;  %8744 = vmatprep.mubr.msk.f32.mxu0 %vm692_vm4, %v1014_v22 }
 0x1c6   : > { %8745 = vmatmul.mubr.msk.f32.vlgmr.msra.gmra.mrb[16].mxu0 %vm692_vm4, %v1015_v23  ;;  %v1017_v29 = vmax.f32 %v871_v24, 0.0 }
 0x1c7   : > { %v1016_v27 = vmax.f32 %v866_v26, 0.0  ;;  %v8696_v28 = vpop.f32.mrb[20].mxu1 }
 0x1c8   : > { %v881_v30 = vadd.f32 %v8696_v28, %v9404_v17  ;;  %v875_v31 = vpop.f32.mrb[21].mxu1 }
 0x1c9   : > { %v876_v32 = vadd.f32 %v9404_v17, %v875_v31  ;;  %8747 = vmatprep.mubr.msk.f32.mxu0 %vm692_vm4, %v1016_v27 }
 0x1ca   : > { %8748 = vmatmul.mubr.msk.f32.gmra.mrb[18].mxu0 %vm692_vm4, %v1017_v29  ;;  %v1019_v35 = vmax.f32 %v881_v30, 0.0 }
 0x1cb   : > { %v1018_v33 = vmax.f32 %v876_v32, 0.0  ;;  %v8699_v34 = vpop.f32.mrb[22].mxu1 }
 0x1cc   : > { %v891_v36 = vadd.f32 %v8699_v34, %v9404_v17  ;;  %v885_v37 = vpop.f32.mrb[23].mxu1 }
 0x1cd   : > { %v886_v38 = vadd.f32 %v9404_v17, %v885_v37  ;;  %8750 = vmatprep.mubr.msk.f32.mxu0 %vm692_vm4, %v1018_v33 }
 0x1ce   : > { %8751 = vmatmul.mubr.msk.f32.gmra.mrb[20].mxu0 %vm692_vm4, %v1019_v35  ;;  %v1021_v41 = vmax.f32 %v891_v36, 0.0 }
 0x1cf   : > { %v1020_v39 = vmax.f32 %v886_v38, 0.0  ;;  %v8702_v40 = vpop.f32.mrb[24].mxu1 }
 0x1d0   : > { %v901_v42 = vadd.f32 %v8702_v40, %v9404_v17  ;;  %v895_v43 = vpop.f32.mrb[25].mxu1 }
 0x1d1   : > { %v896_v44 = vadd.f32 %v9404_v17, %v895_v43  ;;  %8753 = vmatprep.mubr.msk.f32.mxu0 %vm692_vm4, %v1020_v39 }
 0x1d2   : > { %8754 = vmatmul.mubr.msk.f32.gmra.mrb[22].mxu0 %vm692_vm4, %v1021_v41  ;;  %v1023_v48 = vmax.f32 %v901_v42, 0.0 }
 0x1d3   : > { %v1022_v45 = vmax.f32 %v896_v44, 0.0  ;;  %v8705_v46 = vpop.f32.mrb[26].mxu1 }
 0x1d4   : > { %v911_v49 = vadd.f32 %v8705_v46, %v9404_v17  ;;  %v905_v50 = vpop.f32.mrb[27].mxu1 }
 0x1d5   : > { %v906_v51 = vadd.f32 %v9404_v17, %v905_v50  ;;  %8756 = vmatprep.mubr.msk.f32.mxu0 %vm692_vm4, %v1022_v45 }
 0x1d6   : > { %8757 = vmatmul.mubr.msk.f32.gmra.mrb[24].mxu0 %vm692_vm4, %v1023_v48  ;;  %v1025_v54 = vmax.f32 %v911_v49, 0.0 }
 0x1d7   : > { %v1024_v52 = vmax.f32 %v906_v51, 0.0  ;;  %v8708_v53 = vpop.f32.mrb[28].mxu1  ;;  %v9473_v51 = vld [vmem:[%s12814_s6] ss:$0 sm:$0xff] }
 0x1d8   : > { %v921_v55 = vadd.f32 %v8708_v53, %v9404_v17  ;;  %v915_v56 = vpop.f32.mrb[29].mxu1 }
 0x1d9   : > { %v916_v58 = vadd.f32 %v9404_v17, %v915_v56  ;;  %8759 = vmatprep.mubr.msk.f32.mxu0 %vm692_vm4, %v1024_v52 }
 0x1da   : > { %8760 = vmatmul.mubr.msk.f32.gmra.mrb[26].mxu0 %vm692_vm4, %v1025_v54  ;;  %v1027_v60 = vmax.f32 %v921_v55, 0.0 }
 0x1db   : > { %v1026_v57 = vmax.f32 %v916_v58, 0.0  ;;  %v8711_v59 = vpop.f32.mrb[30].mxu1 }
 0x1dc   : > { %v931_v61 = vadd.f32 %v8711_v59, %v9404_v17  ;;  %v925_v62 = vpop.f32.mrb[31].mxu1 }
 0x1dd   : > { %v926_v63 = vadd.f32 %v9404_v17, %v925_v62  ;;  %8762 = vmatprep.mubr.msk.f32.mxu0 %vm692_vm4, %v1026_v57 }
 0x1de   : > { %8763 = vmatmul.mubr.msk.f32.gmra.mrb[28].mxu0 %vm692_vm4, %v1027_v60  ;;  %v1029_v2 = vmax.f32 %v931_v61, 0.0 }
 0x1df   : > { %v1028_v0 = vmax.f32 %v926_v63, 0.0  ;;  %v8714_v1 = vpop.f32.mrb[32].mxu1 }
 0x1e0   : > { %v941_v3 = vadd.f32 %v8714_v1, %v9404_v17  ;;  %v935_v4 = vpop.f32.mrb[33].mxu1 }
 0x1e1   : > { %v936_v5 = vadd.f32 %v9404_v17, %v935_v4  ;;  %8765 = vmatprep.mubr.msk.f32.mxu0 %vm692_vm4, %v1028_v0 }
 0x1e2   : > { %8766 = vmatmul.mubr.msk.f32.gmra.mrb[30].mxu0 %vm692_vm4, %v1029_v2  ;;  %v1031_v8 = vmax.f32 %v941_v3, 0.0 }
 0x1e3   : > { %v1030_v6 = vmax.f32 %v936_v5, 0.0  ;;  %v8717_v7 = vpop.f32.mrb[34].mxu1 }
 0x1e4   : > { %v951_v9 = vadd.f32 %v8717_v7, %v9404_v17  ;;  %v945_v10 = vpop.f32.mrb[35].mxu1 }
 0x1e5   : > { %v946_v11 = vadd.f32 %v9404_v17, %v945_v10  ;;  %8768 = vmatprep.mubr.msk.f32.mxu0 %vm692_vm4, %v1030_v6 }
 0x1e6   : > { %8769 = vmatmul.mubr.msk.f32.gmra.mrb[32].mxu0 %vm692_vm4, %v1031_v8  ;;  %v1033_v14 = vmax.f32 %v951_v9, 0.0 }
 0x1e7   : > { %v1032_v12 = vmax.f32 %v946_v11, 0.0  ;;  %v8720_v13 = vpop.f32.mrb[36].mxu1 }
 0x1e8   : > { %v961_v15 = vadd.f32 %v8720_v13, %v9404_v17  ;;  %v955_v16 = vpop.f32.mrb[37].mxu1 }
 0x1e9   : > { %v956_v18 = vadd.f32 %v9404_v17, %v955_v16  ;;  %8771 = vmatprep.mubr.msk.f32.mxu0 %vm692_vm4, %v1032_v12 }
 0x1ea   : > { %8772 = vmatmul.mubr.msk.f32.gmra.mrb[34].mxu0 %vm692_vm4, %v1033_v14  ;;  %v1035_v21 = vmax.f32 %v961_v15, 0.0 }
 0x1eb   : > { %v1034_v19 = vmax.f32 %v956_v18, 0.0  ;;  %v8723_v20 = vpop.f32.mrb[38].mxu1 }
 0x1ec   : > { %v971_v22 = vadd.f32 %v8723_v20, %v9404_v17  ;;  %v965_v47 = vpop.f32.mrb[39].mxu1 }
 0x1ed   : > { %v966_v23 = vadd.f32 %v9404_v17, %v965_v47  ;;  %8774 = vmatprep.mubr.msk.f32.mxu0 %vm692_vm4, %v1034_v19 }
 0x1ee   : > { %8775 = vmatmul.mubr.msk.f32.gmra.mrb[36].mxu0 %vm692_vm4, %v1035_v21  ;;  %v1037_v26 = vmax.f32 %v971_v22, 0.0 }
 0x1ef   : > { %v1036_v24 = vmax.f32 %v966_v23, 0.0  ;;  %v8726_v25 = vpop.f32.mrb[40].mxu1  ;;  %v9165_v23 = vmov 683565275  }
 0x1f0   : > { %v981_v27 = vadd.f32 %v8726_v25, %v9404_v17  ;;  %v975_v28 = vpop.f32.mrb[41].mxu1 }
 0x1f1   : > { %v976_v29 = vadd.f32 %v9404_v17, %v975_v28  ;;  %8777 = vmatprep.mubr.msk.f32.mxu0 %vm692_vm4, %v1036_v24 }
 0x1f2   : > { %8778 = vmatmul.mubr.msk.f32.gmra.mrb[38].mxu0 %vm692_vm4, %v1037_v26  ;;  %v1039_v32 = vmax.f32 %v981_v27, 0.0  ;;  %v9166_v27 = vmov 2475754826  }
 0x1f3   : > { %v1038_v30 = vmax.f32 %v976_v29, 0.0  ;;  %v8729_v31 = vpop.f32.mrb[42].mxu1  ;;  %v9167_v29 = vmov 2131351028  }
 0x1f4   : > { %v991_v33 = vadd.f32 %v8729_v31, %v9404_v17  ;;  %v985_v34 = vpop.f32.mrb[43].mxu1  ;;  %v9168_v31 = vmov 2102212464  }
 0x1f5   : > { %v986_v35 = vadd.f32 %v9404_v17, %v985_v34  ;;  %8780 = vmatprep.mubr.msk.f32.mxu0 %vm692_vm4, %v1038_v30 }
 0x1f6   : > { %8781 = vmatmul.mubr.msk.f32.gmra.mrb[40].mxu0 %vm692_vm4, %v1039_v32  ;;  %v1041_v38 = vmax.f32 %v991_v33, 0.0  ;;  %v9169_v33 = vmov 920167782  }
 0x1f7   : > { %v1040_v36 = vmax.f32 %v986_v35, 0.0  ;;  %v8732_v37 = vpop.f32.mrb[44].mxu1 }
 0x1f8   : > { %v1001_v39 = vadd.f32 %v8732_v37, %v9404_v17  ;;  %v995_v40 = vpop.f32.mrb[45].mxu1 }
 0x1f9   : > { %v996_v41 = vadd.f32 %v9404_v17, %v995_v40  ;;  %8783 = vmatprep.mubr.msk.f32.mxu0 %vm692_vm4, %v1040_v36  ;;  %v9170_v40 = vmov 1326507024  }
 0x1fa   : > { %8784 = vmatmul.mubr.msk.f32.gmra.mrb[42].mxu0 %vm692_vm4, %v1041_v38  ;;  %v1043_v44 = vmax.f32 %v1001_v39, 0.0 }
 0x1fb   : > { %v1042_v42 = vmax.f32 %v996_v41, 0.0  ;;  %v8735_v43 = vpop.f32.mrb[46].mxu1 }
 0x1fc   : > { %v1011_v45 = vadd.f32 %v8735_v43, %v9404_v17  ;;  %v1005_v46 = vpop.f32.mrb[47].mxu1 }
 0x1fd   : > { %v1006_v48 = vadd.f32 %v9404_v17, %v1005_v46  ;;  %8786 = vmatprep.mubr.msk.f32.mxu0 %vm692_vm4, %v1042_v42 }
 0x1fe   : > { %8787 = vmatmul.mubr.msk.f32.gmra.mrb[44].mxu0 %vm692_vm4, %v1043_v44  ;;  %v1045_v50 = vmax.f32 %v1011_v45, 0.0 }
 0x1ff   : > { %v1044_v49 = vmax.f32 %v1006_v48, 0.0 }
 0x201   : > { %8789 = vmatprep.mubr.msk.f32.mxu0 %vm692_vm4, %v1044_v49 }
 0x202   : > { %8790 = vmatmul.mubr.msk.f32.gmra.mrb[46].mxu0 %vm692_vm4, %v1045_v50 }
 0x299   : > { %v8746_v52 = vpop.f32.mrb[16].mxu0 }
 0x29a   : > { %v9476_v53 = vadd.f32 %v8746_v52, %v9473_v51  ;;  %v1219_v17 = vpop.f32.mrb[17].mxu0 }
 0x29b   : > { %v9479_v54 = vadd.f32 %v9473_v51, %v1219_v17 }
 0x29c   : > { %v1482_v55 = vand.u32 2147483647, %v9476_v53  ;;  %v1485_v56 = vand.u32 2139095040, %v9476_v53  ;;  %vm1484_vm2 = vcmp.lt.s32.totalorder %v9476_v53, 0 }
 0x29d   : > { %v1378_v58 = vand.u32 2147483647, %v9479_v54  ;;  %v1381_v57 = vand.u32 2139095040, %v9479_v54  ;;  %v8749_v59 = vpop.f32.mrb[18].mxu0 }
 0x29e   : > { %v1486_v60 = vshrl.u32 %v1485_v56, 23  ;;  %v9486_v61 = vadd.f32 %v8749_v59, %v9473_v51  ;;  %v9488_v62 = vpop.f32.mrb[19].mxu0  ;;  %v1489_v63 = vand.u32 8388607, %v1482_v55  ;;  %vm9590_vm3 = vcmp.le.f32.partialorder %v1482_v55, 0.7853982 }
 0x29f   : > { %v1382_v0 = vshrl.u32 %v1381_v57, 23  ;;  %v1385_v1 = vand.u32 8388607, %v1378_v58 }
 0x2a0   : > { %v8268_v2 = vadd.s32 4294967169, %v1486_v60  ;;  %v1693_v4 = vand.u32 2139095040, %v9486_v61  ;;  %v1490_v7 = vor.u32 8388608, %v1489_v63  ;;  %v1690_v22 = vand.u32 2147483647, %v9486_v61 }
 0x2a1   : > { %v8264_v3 = vadd.s32 4294967169, %v1382_v0  ;;  %v9495_v5 = vpop.f32.mrb[20].mxu0  ;;  %v1386_v8 = vor.u32 8388608, %v1385_v1 }
 0x2a2   : > { %v1492_v6 = vadd.s32 1, %v8268_v2  ;;  %v1694_v10 = vshrl.u32 %v1693_v4, 23  ;;  %v9497_v11 = vpop.f32.mrb[21].mxu0  ;;  %v9501_v19 = vshll.u32 %v1490_v7, 8 }
 0x2a3   : > { %v1388_v9 = vadd.s32 1, %v8264_v3  ;;  %v9505_v21 = vshll.u32 %v1386_v8, 8 }
 0x2a4   : > { %vm1493_vm5 = vcmp.gt.s32.totalorder %v1492_v6, 0  ;;  %v8276_v13 = vadd.s32 4294967169, %v1694_v10 }
 0x2a5   : > { %v1494_v12 = vsel %vm1493_vm5, %v1492_v6, 0  ;;  %vm1389_vm6 = vcmp.gt.s32.totalorder %v1388_v9, 0  ;;  %v9499_v14 = vpop.f32.mrb[22].mxu0 }
 0x2a6   : > { %v1495_v15 = vshrl.u32 %v1494_v12, 5  ;;  %v1496_v16 = vand.u32 31, %v1494_v12  ;;  %v1390_v18 = vsel %vm1389_vm6, %v1388_v9, 0  ;;  %v9509_v26 = vadd.s32 1, %v8276_v13 }
 0x2a7   : > { %v9503_v20 = vshrl.u32 %v1390_v18, 5  ;;  %v1392_v25 = vand.u32 31, %v1390_v18 }
 0x2a8   : > { %v1497_v47 = vsub.s32 32, %v1496_v16  ;;  %v1499_v24 = vshll.u32 %v9165_v23, %v1496_v16  ;;  %v1502_v28 = vshll.u32 %v9166_v27, %v1496_v16  ;;  %v1505_v30 = vshll.u32 %v9167_v29, %v1496_v16 }
 0x2a9   : > { %v1508_v32 = vshll.u32 %v9168_v31, %v1496_v16  ;;  %v1511_v34 = vshll.u32 %v9169_v33, %v1496_v16  ;;  %vm1514_vm7 = vcmp.lt.s32.totalorder %v1495_v15, 1  ;;  %vm1515_vm8 = vcmp.lt.s32.totalorder %v1495_v15, 2 }
 0x2aa   : > { %v1500_v35 = vshrl.u32 %v9166_v27, %v1497_v47  ;;  %v1503_v36 = vshrl.u32 %v9167_v29, %v1497_v47  ;;  %v1506_v37 = vshrl.u32 %v9168_v31, %v1497_v47  ;;  %v1498_v38 = vshrl.u32 %v9165_v23, %v1497_v47 }
 0x2ab   : > { %v1509_v39 = vshrl.u32 %v9169_v33, %v1497_v47  ;;  %v1512_v41 = vshrl.u32 %v9170_v40, %v1497_v47  ;;  %v1393_v45 = vsub.s32 32, %v1392_v25  ;;  %vm1516_vm9 = vcmp.lt.s32.totalorder %v1495_v15, 3 }
 0x2ac   : > { %v1501_v42 = vor.u32 %v1500_v35, %v1499_v24  ;;  %v1504_v43 = vor.u32 %v1503_v36, %v1502_v28  ;;  %v1507_v44 = vor.u32 %v1506_v37, %v1505_v30  ;;  %vm1517_vm10 = vcmp.lt.s32.totalorder %v1495_v15, 4 }
 0x2ad   : > { %v1510_v46 = vor.u32 %v1509_v39, %v1508_v32  ;;  %v1513_v48 = vor.u32 %v1512_v41, %v1511_v34  ;;  %v1395_v60 = vshll.u32 %v9165_v23, %v1392_v25  ;;  %v1396_v1 = vshrl.u32 %v9166_v27, %v1393_v45  ;;  %v9546_v32 = vpop.f32.mrb[23].mxu0 }
 0x2ae   : > { %v1518_v49 = vsel %vm1514_vm7, %v1498_v38, %v1501_v42  ;;  %v1519_v50 = vsel %vm1517_vm10, %v1507_v44, 2102212464  ;;  %v1522_v52 = vsel %vm1514_vm7, %v1501_v42, %v1504_v43  ;;  %v1526_v17 = vsel %vm1514_vm7, %v1504_v43, %v1507_v44 }
 0x2af   : > { %v1520_v56 = vsel %vm1516_vm9, %v1504_v43, %v1519_v50  ;;  %v1523_v57 = vsel %vm1517_vm10, %v1510_v46, 920167782  ;;  %v1527_v59 = vsel %vm1517_vm10, %v1513_v48, 1326507024  ;;  %v1398_v2 = vshll.u32 %v9166_v27, %v1392_v25 }
 0x2b0   : > { %v1524_v63 = vsel %vm1516_vm9, %v1507_v44, %v1523_v57  ;;  %v1528_v0 = vsel %vm1516_vm9, %v1510_v46, %v1527_v59  ;;  %v1521_v3 = vsel %vm1515_vm8, %v1518_v49, %v1520_v56  ;;  %v1399_v7 = vshrl.u32 %v9167_v29, %v1393_v45 }
 0x2b1   : > { %v1525_v4 = vsel %vm1515_vm8, %v1522_v52, %v1524_v63  ;;  %v1529_v6 = vsel %vm1515_vm8, %v1526_v17, %v1528_v0  ;;  %v1397_v13 = vor.u32 %v1396_v1, %v1395_v60  ;;  %v1401_v18 = vshll.u32 %v9167_v29, %v1392_v25 }
 0x2b2   : > { %v9532_v8 = vmul.u32.u64.low %v9501_v19, %v1529_v6  ;;  %v9533_v9 = vmul.u32.u64.high %v9501_v19, %v1529_v6, %v9532_v8  ;;  %v9536_v10 = vmul.u32.u64.low %v9501_v19, %v1525_v4  ;;  %v9537_v12 = vmul.u32.u64.high %v9501_v19, %v1525_v4, %v9536_v10 }
 0x2b3   : > { %v1400_v16 = vor.u32 %v1399_v7, %v1398_v2  ;;  %v1402_v47 = vshrl.u32 %v9168_v31, %v1393_v45  ;;  %v1394_v15 = vshrl.u32 %v9165_v23, %v1393_v45  ;;  %v1404_v24 = vshll.u32 %v9168_v31, %v1392_v25 }
 0x2b4   : > { %v1405_v28 = vshrl.u32 %v9169_v33, %v1393_v45  ;;  %v1408_v30 = vshrl.u32 %v9170_v40, %v1393_v45  ;;  %v1537_v34 = vmul.u32 %v9501_v19, %v1521_v3  ;;  %v1407_v36 = vshll.u32 %v9169_v33, %v1392_v25 }
 0x2b5   : > { %v1403_v35 = vor.u32 %v1402_v47, %v1401_v18  ;;  %vm1410_vm11 = vcmp.lt.s32.totalorder %v9503_v20, 1  ;;  %vm1539_vm12 = vc.u32 %v9533_v9, %v9536_v10  ;;  %v1540_v37 = vadd.s32 1, %v9537_v12 }
 0x2b6   : > { %v1406_v38 = vor.u32 %v1405_v28, %v1404_v24  ;;  %vm1411_vm13 = vcmp.lt.s32.totalorder %v9503_v20, 2  ;;  %v1409_v39 = vor.u32 %v1408_v30, %v1407_v36  ;;  %vm1412_vm14 = vcmp.lt.s32.totalorder %v9503_v20, 3 }
 0x2b7   : > { %vm1413_vm15 = vcmp.lt.s32.totalorder %v9503_v20, 4  ;;  %v1418_v41 = vsel %vm1410_vm11, %v1397_v13, %v1400_v16  ;;  %v1541_v19 = vsel %vm1539_vm12, %v1540_v37, %v9537_v12  ;;  %v1422_v43 = vsel %vm1410_vm11, %v1400_v16, %v1403_v35 }
 0x2b8   : > { %v1415_v42 = vsel %vm1413_vm15, %v1403_v35, 2102212464  ;;  %v1419_v25 = vsel %vm1413_vm15, %v1406_v38, 920167782  ;;  %v1542_v44 = vadd.s32 %v1541_v19, %v1537_v34  ;;  %v1414_v45 = vsel %vm1410_vm11, %v1394_v15, %v1397_v13 }
 0x2b9   : > { %v1420_v46 = vsel %vm1412_vm14, %v1403_v35, %v1419_v25  ;;  %v1423_v48 = vsel %vm1413_vm15, %v1409_v39, 1326507024  ;;  %v1416_v49 = vsel %vm1412_vm14, %v1400_v16, %v1415_v42  ;;  %vm1701_vm0 = vcmp.gt.s32.totalorder %v9509_v26, 0 }
 0x2ba   : > { %v1421_v50 = vsel %vm1411_vm13, %v1418_v41, %v1420_v46  ;;  %v1424_v52 = vsel %vm1412_vm14, %v1406_v38, %v1423_v48  ;;  %v1543_v17 = vadd.s32 536870912, %v1542_v44  ;;  %v9573_v0 = vadd.f32 %v9473_v51, %v9488_v62 }
 0x2bb   : > { %v1425_v56 = vsel %vm1411_vm13, %v1422_v43, %v1424_v52  ;;  %v9564_v57 = vmul.u32.u64.low %v9505_v21, %v1421_v50  ;;  %v9565_v59 = vmul.u32.u64.high %v9505_v21, %v1421_v50, %v9564_v57  ;;  %v1417_v2 = vsel %vm1411_vm13, %v1414_v45, %v1416_v49 }
 0x2bc   : > { %v9568_v60 = vmul.u32.u64.low %v9505_v21, %v1425_v56  ;;  %v9569_v63 = vmul.u32.u64.high %v9505_v21, %v1425_v56, %v9568_v60  ;;  %v1544_v1 = vshrl.u32 %v1543_v17, 30  ;;  %v1702_v3 = vsel %vm1701_vm0, %v9509_v26, 0 }
 0x2bd   : > { %v1436_v6 = vadd.s32 1, %v9565_v59  ;;  %v1697_v7 = vand.u32 8388607, %v1690_v22  ;;  %v1433_v8 = vmul.u32 %v9505_v21, %v1417_v2  ;;  %v1589_v12 = vand.u32 2139095040, %v9573_v0 }
 0x2be   : > { %v1545_v4 = vshll.u32 %v1544_v1, 30  ;;  %vm1435_vm1 = vc.u32 %v9569_v63, %v9564_v57  ;;  %v1704_v16 = vand.u32 31, %v1702_v3  ;;  %v1538_v34 = vadd.s32 %v9536_v10, %v9533_v9 }
 0x2bf   : > { %v1437_v13 = vsel %vm1435_vm1, %v1436_v6, %v9565_v59  ;;  %v1698_v47 = vor.u32 8388608, %v1697_v7  ;;  %v1590_v15 = vshrl.u32 %v1589_v12, 23  ;;  %v1568_v36 = vsub.s32 4, %v1544_v1 }
 0x2c0   : > { %v1546_v62 = vsub.s32 %v1542_v44, %v1545_v4  ;;  %v1438_v20 = vadd.s32 %v1437_v13, %v1433_v8  ;;  %v1705_v28 = vsub.s32 32, %v1704_v16  ;;  %v9599_v38 = vadd.s32 %v9564_v57, %v9569_v63  ;;  %v9619_v57 = vpop.f32.mrb[24].mxu0 }
 0x2c1   : > { %v9596_v37 = vshll.u32 %v1698_v47, 8  ;;  %v9602_v41 = vshrl.u32 %v1702_v3, 5  ;;  %v8272_v19 = vadd.s32 4294967169, %v1590_v15  ;;  %v1707_v55 = vshll.u32 %v9165_v23, %v1704_v16 }
 0x2c2   : > { %v1548_v18 = vsub.s32 0, %v1546_v62  ;;  %v1439_v26 = vadd.s32 536870912, %v1438_v20  ;;  %v1708_v25 = vshrl.u32 %v9166_v27, %v1705_v28  ;;  %v1710_v43 = vshll.u32 %v9166_v27, %v1704_v16 }
 0x2c3   : > { %v1711_v10 = vshrl.u32 %v9167_v29, %v1705_v28  ;;  %v1714_v44 = vshrl.u32 %v9168_v31, %v1705_v28  ;;  %v1717_v45 = vshrl.u32 %v9169_v33, %v1705_v28  ;;  %v1569_v46 = vsel %vm1484_vm2, %v1568_v36, %v1544_v1 }
 0x2c4   : > { %v8269_v24 = vmin.u32 %v1548_v18, %v1546_v62  ;;  %v9586_v30 = vshrl.u32 %v1439_v26, 30  ;;  %v1706_v48 = vshrl.u32 %v9165_v23, %v1705_v28  ;;  %v1720_v49 = vshrl.u32 %v9170_v40, %v1705_v28 }
 0x2c5   : > { %v1713_v17 = vshll.u32 %v9167_v29, %v1704_v16  ;;  %v1716_v56 = vshll.u32 %v9168_v31, %v1704_v16  ;;  %v1709_v63 = vor.u32 %v1708_v25, %v1707_v55  ;;  %v1719_v2 = vshll.u32 %v9169_v33, %v1704_v16 }
 0x2c6   : > { %v1550_v35 = vclz %v8269_v24  ;;  %v1441_v39 = vshll.u32 %v9586_v30, 30  ;;  %v1712_v3 = vor.u32 %v1711_v10, %v1710_v43  ;;  %vm1722_vm5 = vcmp.lt.s32.totalorder %v9602_v41, 1 }
 0x2c7   : > { %v1715_v4 = vor.u32 %v1714_v44, %v1713_v17  ;;  %v1718_v6 = vor.u32 %v1717_v45, %v1716_v56  ;;  %v1721_v13 = vor.u32 %v1720_v49, %v1719_v2  ;;  %vm1723_vm6 = vcmp.lt.s32.totalorder %v9602_v41, 2 }
 0x2c8   : > { %v8270_v42 = vadd.s32 4294967294, %v1550_v35  ;;  %v9607_v9 = vsub.s32 %v1438_v20, %v1441_v39  ;;  %v1571_v20 = vsel %vm9590_vm3, 0, %v1569_v46  ;;  %vm1724_vm7 = vcmp.lt.s32.totalorder %v9602_v41, 3 }
 0x2c9   : > { %vm1725_vm8 = vcmp.lt.s32.totalorder %v9602_v41, 4  ;;  %v1734_v24 = vsel %vm1722_vm5, %v1712_v3, %v1715_v4  ;;  %vm1380_vm10 = vcmp.lt.s32.totalorder %v9479_v54, 0  ;;  %vm9659_vm12 = vcmp.le.f32.partialorder %v1378_v58, 0.7853982 }
 0x2ca   : > { %vm8271_vm4 = vcmp.lt.s32.totalorder %v8270_v42, 0  ;;  %v1444_v52 = vsub.s32 0, %v9607_v9  ;;  %v1731_v15 = vsel %vm1725_vm8, %v1718_v6, 920167782  ;;  %v1735_v36 = vsel %vm1725_vm8, %v1721_v13, 1326507024 }
 0x2cb   : > { %v1553_v50 = vsel %vm8271_vm4, 0, %v8270_v42  ;;  %v1732_v35 = vsel %vm1724_vm7, %v1715_v4, %v1731_v15  ;;  %v1726_v42 = vsel %vm1722_vm5, %v1706_v48, %v1709_v63  ;;  %v1736_v55 = vsel %vm1724_vm7, %v1718_v6, %v1735_v36 }
 0x2cc   : > { %v1554_v59 = vsub.s32 32, %v1553_v50  ;;  %v1558_v60 = vsub.s32 4294967266, %v1553_v50  ;;  %v8265_v1 = vmin.u32 %v1444_v52, %v9607_v9  ;;  %v1555_v7 = vshll.u32 %v1546_v62, %v1553_v50 }
 0x2cd   : > { %v1730_v62 = vsel %vm1722_vm5, %v1709_v63, %v1712_v3  ;;  %v1737_v44 = vsel %vm1723_vm6, %v1734_v24, %v1736_v55  ;;  %v1596_v50 = vadd.s32 1, %v8272_v19  ;;  %vm1574_vm4 = vweird.f32 %v9476_v53 }
 0x2ce   : > { %v1556_v8 = vshrl.u32 %v1538_v34, %v1554_v59  ;;  %v1559_v12 = vadd.s32 127, %v1558_v60  ;;  %v1446_v18 = vclz %v8265_v1  ;;  %v1727_v34 = vsel %vm1725_vm8, %v1715_v4, 2102212464 }
 0x2cf   : > { %v1733_v10 = vsel %vm1723_vm6, %v1730_v62, %v1732_v35  ;;  %v1728_v49 = vsel %vm1724_vm7, %v1712_v3, %v1727_v34  ;;  %v9647_v17 = vmul.u32.u64.low %v9596_v37, %v1737_v44  ;;  %v9648_v56 = vmul.u32.u64.high %v9596_v37, %v1737_v44, %v9647_v17 }
 0x2d0   : > { %v1557_v47 = vor.u32 %v1556_v8, %v1555_v7  ;;  %v1560_v26 = vshll.u32 %v1559_v12, 23  ;;  %v8266_v16 = vadd.s32 4294967294, %v1446_v18  ;;  %v1575_v4 = vadd.s32 3, %v1571_v20 }
 0x2d1   : > { %v9652_v63 = vmul.u32.u64.low %v9596_v37, %v1733_v10  ;;  %v9653_v2 = vmul.u32.u64.high %v9596_v37, %v1733_v10, %v9652_v63  ;;  %vm1597_vm11 = vcmp.gt.s32.totalorder %v1596_v50, 0  ;;  %v9667_v8 = vand.u32 3, %v1571_v20 }
 0x2d2   : > { %v1561_v28 = vor.u32 4788187, %v1560_v26  ;;  %v1564_v39 = vcvt.s32.f32 %v1557_v47  ;;  %vm8267_vm9 = vcmp.lt.s32.totalorder %v8266_v16, 0  ;;  %v1598_v6 = vsel %vm1597_vm11, %v1596_v50, 0 }
 0x2d3   : > { %v1449_v43 = vsel %vm8267_vm9, 0, %v8266_v16  ;;  %vm1747_vm13 = vc.u32 %v9648_v56, %v9652_v63  ;;  %v1586_v12 = vand.u32 2147483647, %v9573_v0  ;;  %v1464_v18 = vsub.s32 4, %v9586_v30 }
 0x2d4   : > { %v1562_v25 = vand.u32 2147483647, %v1561_v28  ;;  %v1450_v45 = vsub.s32 32, %v1449_v43  ;;  %v1454_v46 = vsub.s32 4294967266, %v1449_v43  ;;  %v1451_v48 = vshll.u32 %v9607_v9, %v1449_v43  ;;  %v9701_v43 = vpop.f32.mrb[25].mxu0 }
 0x2d5   : > { %v1748_v41 = vadd.s32 1, %v9653_v2  ;;  %v9677_v47 = vand.u32 3, %v1575_v4  ;;  %v1600_v26 = vand.u32 31, %v1598_v6  ;;  %v1593_v21 = vand.u32 8388607, %v1586_v12 }
 0x2d6   : > { %v1565_v52 = vmul.f32 %v1564_v39, %v1562_v25  ;;  %v1452_v59 = vshrl.u32 %v9599_v38, %v1450_v45  ;;  %v1455_v60 = vadd.s32 127, %v1454_v46  ;;  %v1729_v38 = vsel %vm1723_vm6, %v1726_v42, %v1728_v49 }
 0x2d7   : > { %v1745_v20 = vmul.u32 %v9596_v37, %v1729_v38  ;;  %v1749_v15 = vsel %vm1747_vm13, %v1748_v41, %v9653_v2  ;;  %v9683_v28 = vsub.s32 32, %v1600_v26  ;;  %v9687_v34 = vadd.f32 %v9495_v5, %v9473_v51 }
 0x2d8   : > { %v1566_v1 = vxor.u32 2147483648, %v1565_v52  ;;  %v1453_v9 = vor.u32 %v1452_v59, %v1451_v48  ;;  %v1456_v3 = vshll.u32 %v1455_v60, 23  ;;  %v1465_v37 = vsel %vm1380_vm10, %v1464_v18, %v9586_v30 }
 0x2d9   : > { %v1750_v24 = vadd.s32 %v1749_v15, %v1745_v20  ;;  %v9692_v36 = vshrl.u32 %v1598_v6, 5  ;;  %v1603_v39 = vshll.u32 %v9165_v23, %v1600_v26  ;;  %vm4907_vm14 = vcmp.eq.s32.totalorder %v9667_v8, 2 }
 0x2da   : > { %v1567_v7 = vsel %vm1484_vm2, %v1566_v1, %v1565_v52  ;;  %v1457_v13 = vor.u32 4788187, %v1456_v3  ;;  %v1460_v62 = vcvt.s32.f32 %v1453_v9  ;;  %v1604_v55 = vshrl.u32 %v9166_v27, %v9683_v28 }
 0x2db   : > { %v1570_v58 = vsel %vm9590_vm3, %v9476_v53, %v1567_v7  ;;  %v1751_v42 = vadd.s32 536870912, %v1750_v24  ;;  %v1606_v25 = vshll.u32 %v9166_v27, %v1600_v26  ;;  %v1607_v5 = vshrl.u32 %v9167_v29, %v9683_v28 }
 0x2dc   : > { %8959 = vcosq.f32 %v1570_v58  ;;  %v1458_v16 = vand.u32 2147483647, %v1457_v13  ;;  %vm1578_vm15 = vcmp.eq.s32.totalorder %v9677_v47, 0  ;;  %vm4904_vm0 = vcmp.eq.s32.totalorder %v9667_v8, 0 }
 0x2dd   : > { %8961 = vsinq.f32 %v1570_v58  ;;  %v1610_v10 = vshrl.u32 %v9168_v31, %v9683_v28  ;;  %v1612_v44 = vshll.u32 %v9168_v31, %v1600_v26  ;;  %v1613_v45 = vshrl.u32 %v9169_v33, %v9683_v28 }
 0x2de   : > { %v1461_v35 = vmul.f32 %v1460_v62, %v1458_v16  ;;  %vm1577_vm1 = vcmp.lt.s32.totalorder %v9677_v47, 2  ;;  %vm1581_vm2 = vcmp.eq.s32.totalorder %v9677_v47, 2  ;;  %vm4903_vm3 = vcmp.lt.s32.totalorder %v9667_v8, 2 }
 0x2df   : > { %v1467_v46 = vsel %vm9659_vm12, 0, %v1465_v37  ;;  %v9715_v49 = vshrl.u32 %v1751_v42, 30  ;;  %v1609_v50 = vshll.u32 %v9167_v29, %v1600_v26  ;;  %v1605_v48 = vor.u32 %v1604_v55, %v1603_v39 }
 0x2e0   : > { %v1462_v30 = vxor.u32 2147483648, %v1461_v35  ;;  %v1608_v17 = vor.u32 %v1607_v5, %v1606_v25  ;;  %v1614_v59 = vor.u32 %v1613_v45, %v1612_v44  ;;  %vm1621_vm5 = vcmp.lt.s32.totalorder %v9692_v36, 4 }
 0x2e1   : > { %v1753_v2 = vshll.u32 %v9715_v49, 30  ;;  %v1611_v1 = vor.u32 %v1610_v10, %v1609_v50  ;;  %v9726_v4 = vadd.s32 3, %v1467_v46  ;;  %v1594_v9 = vor.u32 8388608, %v1593_v21 }
 0x2e2   : > { %v1463_v52 = vsel %vm1380_vm10, %v1462_v30, %v1461_v35  ;;  %v1627_v3 = vsel %vm1621_vm5, %v1614_v59, 920167782  ;;  %v9730_v6 = vand.u32 3, %v1467_v46  ;;  %v1616_v19 = vshrl.u32 %v9170_v40, %v9683_v28 }
 0x2e3   : > { %v1466_v60 = vsel %vm9659_vm12, %v9479_v54, %v1463_v52  ;;  %v9732_v7 = vsub.s32 %v1750_v24, %v1753_v2  ;;  %v1615_v18 = vshll.u32 %v9169_v33, %v1600_v26  ;;  %vm1618_vm6 = vcmp.lt.s32.totalorder %v9692_v36, 1 }
 0x2e4   : > { %8963 = vcosq.f32 %v1466_v60  ;;  %vm1620_vm7 = vcmp.lt.s32.totalorder %v9692_v36, 3  ;;  %v1626_v16 = vsel %vm1618_vm6, %v1605_v48, %v1608_v17  ;;  %vm1619_vm8 = vcmp.lt.s32.totalorder %v9692_v36, 2 }
 0x2e5   : > { %8965 = vsinq.f32 %v1466_v60  ;;  %v1756_v20 = vsub.s32 0, %v9732_v7  ;;  %v1628_v62 = vsel %vm1620_vm7, %v1611_v1, %v1627_v3  ;;  %v9749_v26 = vshll.u32 %v1594_v9, 8 }
 0x2e6   : > { %v8960_v38 = vpop.eup %8959  ;;  %v1617_v39 = vor.u32 %v1616_v19, %v1615_v18  ;;  %vm4800_vm9 = vcmp.lt.s32.totalorder %v9730_v6, 2  ;;  %v1629_v25 = vsel %vm1619_vm8, %v1626_v16, %v1628_v62  ;;  %v1901_v5 = vand.u32 2139095040, %v9687_v34 }
 0x2e7   : > { %v8962_v58 = vpop.eup %8961  ;;  %v1582_v13 = vxor.u32 2147483648, %v8960_v38  ;;  %v8277_v37 = vmin.u32 %v1756_v20, %v9732_v7  ;;  %vm1470_vm10 = vweird.f32 %v9479_v54  ;;  %v1623_v8 = vsel %vm1621_vm5, %v1611_v1, 2102212464 }
 0x2e8   : > { %v1579_v41 = vxor.u32 2147483648, %v8962_v58  ;;  %vm4801_vm11 = vcmp.eq.s32.totalorder %v9730_v6, 0  ;;  %vm1692_vm12 = vcmp.lt.s32.totalorder %v9486_v61, 0  ;;  %v1602_v44 = vshrl.u32 %v9165_v23, %v9683_v28 }
 0x2e9   : > { %v1583_v15 = vsel %vm1581_vm2, %v1582_v13, %v8962_v58  ;;  %v4909_v24 = vsel %vm4907_vm14, %v1582_v13, %v8962_v58  ;;  %v1758_v47 = vclz %v8277_v37  ;;  %v1630_v45 = vsel %vm1618_vm6, %v1608_v17, %v1611_v1 }
 0x2ea   : > { %v1580_v21 = vsel %vm1578_vm15, %v8960_v38, %v1579_v41  ;;  %v4906_v35 = vsel %vm4904_vm0, %v8960_v38, %v1579_v41  ;;  %v1631_v53 = vsel %vm1621_vm5, %v1617_v39, 1326507024  ;;  %vm8066_vm13 = vcmask 64512  }
 0x2eb   : > { %v1584_v42 = vsel %vm1577_vm1, %v1580_v21, %v1583_v15  ;;  %v4910_v55 = vsel %vm4903_vm3, %v4906_v35, %v4909_v24  ;;  %v8278_v46 = vadd.s32 4294967294, %v1758_v47  ;;  %vm4804_vm14 = vcmp.eq.s32.totalorder %v9730_v6, 2 }
 0x2ec   : > { %v1585_v30 = vsel %vm1574_vm4, nan, %v1584_v42  ;;  %v4911_v10 = vsel %vm1574_vm4, nan, %v4910_v55  ;;  %v9780_v50 = vmul.u32.u64.low %v9749_v26, %v1629_v25  ;;  %v9781_v52 = vmul.u32.u64.high %v9749_v26, %v1629_v25, %v9780_v50 }
 0x2ed   : > { %8967 = vrcp.f32 %v4911_v10  ;;  %v1622_v2 = vsel %vm1618_vm6, %v1602_v44, %v1605_v48  ;;  %v1624_v28 = vsel %vm1620_vm7, %v1608_v17, %v1623_v8  ;;  %v1632_v1 = vsel %vm1620_vm7, %v1614_v59, %v1631_v53 }
 0x2ee   : > { %v8964_v60 = vpop.eup %8963  ;;  %vm8279_vm15 = vcmp.lt.s32.totalorder %v8278_v46, 0  ;;  %v1633_v38 = vsel %vm1619_vm8, %v1630_v45, %v1632_v1  ;;  %v1902_v19 = vshrl.u32 %v1901_v5, 23  ;;  %vm9795_vm0 = vcmp.le.f32.partialorder %v1690_v22, 0.7853982 }
 0x2ef   : > { %v8966_v9 = vpop.eup %8965  ;;  %v1478_v3 = vxor.u32 2147483648, %v8964_v60  ;;  %v1761_v48 = vsel %vm8279_vm15, 0, %v8278_v46  ;;  %v9800_v17 = vmul.u32.u64.low %v9749_v26, %v1633_v38  ;;  %v9801_v18 = vmul.u32.u64.high %v9749_v26, %v1633_v38, %v9800_v17 }
 0x2f0   : > { %v1475_v58 = vxor.u32 2147483648, %v8966_v9  ;;  %v1746_v41 = vadd.s32 %v9652_v63, %v9648_v56  ;;  %v1762_v20 = vsub.s32 32, %v1761_v48  ;;  %v1776_v16 = vsub.s32 4, %v9715_v49 }
 0x2f1   : > { %v4806_v59 = vsel %vm4804_vm14, %v1478_v3, %v8966_v9  ;;  %v1766_v15 = vsub.s32 4294967266, %v1761_v48  ;;  %v1625_v22 = vsel %vm1619_vm8, %v1622_v2, %v1624_v28  ;;  %v1644_v24 = vadd.s32 1, %v9781_v52 }
 0x2f2   : > { %v4803_v62 = vsel %vm4801_vm11, %v8964_v60, %v1475_v58  ;;  %v1472_v21 = vand.u32 3, %v9726_v4  ;;  %v1764_v37 = vshrl.u32 %v1746_v41, %v1762_v20  ;;  %v8284_v56 = vadd.s32 4294967169, %v1902_v19 }
 0x2f3   : > { %v4807_v35 = vsel %vm4800_vm9, %v4803_v62, %v4806_v59  ;;  %v1763_v39 = vshll.u32 %v9732_v7, %v1761_v48  ;;  %v1767_v42 = vadd.s32 127, %v1766_v15  ;;  %v1898_v55 = vand.u32 2147483647, %v9687_v34 }
 0x2f4   : > { %v4808_v63 = vsel %vm1470_vm10, nan, %v4807_v35  ;;  %v1777_v36 = vsel %vm1692_vm12, %v1776_v16, %v9715_v49  ;;  %v1641_v4 = vmul.u32 %v9749_v26, %v1625_v22  ;;  %vm1643_vm1 = vc.u32 %v9801_v18, %v9780_v50 }
 0x2f5   : > { %8969 = vrcp.f32 %v4808_v63  ;;  %v1765_v7 = vor.u32 %v1764_v37, %v1763_v39  ;;  %v1768_v25 = vshll.u32 %v1767_v42, 23  ;;  %v1645_v5 = vsel %vm1643_vm1, %v1644_v24, %v9781_v52 }
 0x2f6   : > { %v1908_v10 = vadd.s32 1, %v8284_v56  ;;  %vm1474_vm2 = vcmp.eq.s32.totalorder %v1472_v21, 0  ;;  %vm1477_vm3 = vcmp.eq.s32.totalorder %v1472_v21, 2  ;;  %v1646_v49 = vadd.s32 %v1645_v5, %v1641_v4  ;;  %v9868_v4 = vpop.f32.mrb[26].mxu0 }
 0x2f7   : > { %v8968_v6 = vpop.eup %8967  ;;  %v1476_v26 = vsel %vm1474_vm2, %v8964_v60, %v1475_v58  ;;  %v1479_v8 = vsel %vm1477_vm3, %v1478_v3, %v8966_v9  ;;  %v1769_v44 = vor.u32 4788187, %v1768_v25  ;;  %vm1473_vm5 = vcmp.lt.s32.totalorder %v1472_v21, 2 }
 0x2f8   : > { %v8035_v47 = vmul.f32 %v8968_v6, %v1585_v30  ;;  %vm1909_vm4 = vcmp.gt.s32.totalorder %v1908_v10, 0  ;;  %v1779_v45 = vsel %vm9795_vm0, 0, %v1777_v36  ;;  %v1647_v46 = vadd.s32 536870912, %v1646_v49 }
 0x2f9   : > { %v1910_v53 = vsel %vm1909_vm4, %v1908_v10, 0  ;;  %v1770_v2 = vand.u32 2147483647, %v1769_v44  ;;  %v1772_v28 = vcvt.s32.f32 %v1765_v7  ;;  %v1905_v30 = vand.u32 8388607, %v1898_v55 }
 0x2fa   : > { %8068 = vst.msk [vmem:[%s9829_s16 + $0x8] sm:$0xff] %vm8066_vm13, %v8035_v47  ;;  %v1912_v52 = vand.u32 31, %v1910_v53  ;;  %v1480_v1 = vsel %vm1473_vm5, %v1476_v26, %v1479_v8  ;;  %v9838_v38 = vshrl.u32 %v1647_v46, 30  ;;  %v9842_v60 = vadd.f32 %v9473_v51, %v9497_v11 }
 0x2fb   : > { %v1773_v9 = vmul.f32 %v1772_v28, %v1770_v2  ;;  %v1783_v19 = vadd.s32 3, %v1779_v45  ;;  %v1481_v48 = vsel %vm1470_vm10, nan, %v1480_v1  ;;  %v9847_v59 = vand.u32 3, %v1779_v45 }
 0x2fc   : > { %v1913_v3 = vsub.s32 32, %v1912_v52  ;;  %v1649_v58 = vshll.u32 %v9838_v38, 30  ;;  %v1906_v41 = vor.u32 8388608, %v1905_v30  ;;  %v1797_v15 = vand.u32 2139095040, %v9842_v60 }
 0x2fd   : > { %v1774_v17 = vxor.u32 2147483648, %v1773_v9  ;;  %v1915_v56 = vshll.u32 %v9165_v23, %v1912_v52  ;;  %v1918_v63 = vshll.u32 %v9166_v27, %v1912_v52  ;;  %v1911_v39 = vshrl.u32 %v1910_v53, 5 }
 0x2fe   : > { %v9849_v16 = vsub.s32 %v1646_v49, %v1649_v58  ;;  %v1916_v62 = vshrl.u32 %v9166_v27, %v1913_v3  ;;  %v1919_v11 = vshrl.u32 %v9167_v29, %v1913_v3  ;;  %v1922_v54 = vshrl.u32 %v9168_v31, %v1913_v3 }
 0x2ff   : > { %v8970_v20 = vpop.eup %8969  ;;  %v1775_v24 = vsel %vm1692_vm12, %v1774_v17, %v1773_v9  ;;  %v1925_v21 = vshrl.u32 %v9169_v33, %v1913_v3  ;;  %v1921_v42 = vshll.u32 %v9167_v29, %v1912_v52  ;;  %v1924_v36 = vshll.u32 %v9168_v31, %v1912_v52 }
 0x300   : > { %v8034_v22 = vmul.f32 %v8970_v20, %v1481_v48  ;;  %v1778_v35 = vsel %vm9795_vm0, %v9486_v61, %v1775_v24  ;;  %v1652_v37 = vsub.s32 0, %v9849_v16  ;;  %v1917_v6 = vor.u32 %v1916_v62, %v1915_v56 }
 0x301   : > { %8971 = vcosq.f32 %v1778_v35  ;;  %v1920_v7 = vor.u32 %v1919_v11, %v1918_v63  ;;  %v1923_v25 = vor.u32 %v1922_v54, %v1921_v42  ;;  %v1926_v5 = vor.u32 %v1925_v21, %v1924_v36 }
 0x302   : > { %8067 = vst.msk [vmem:[%s9829_s16] sm:$0xff] %vm8066_vm13, %v8034_v22  ;;  %8973 = vsinq.f32 %v1778_v35  ;;  %v8273_v13 = vmin.u32 %v1652_v37, %v9849_v16  ;;  %v1927_v10 = vshll.u32 %v9169_v33, %v1912_v52  ;;  %v1928_v47 = vshrl.u32 %v9170_v40, %v1913_v3 }
 0x303   : > { %v9873_v49 = vand.u32 3, %v1783_v19  ;;  %v1642_v26 = vadd.s32 %v9780_v50, %v9801_v18  ;;  %v9877_v44 = vshll.u32 %v1906_v41, 8  ;;  %v1914_v45 = vshrl.u32 %v9165_v23, %v1913_v3 }
 0x304   : > { %v1654_v8 = vclz %v8273_v13  ;;  %v1929_v46 = vor.u32 %v1928_v47, %v1927_v10  ;;  %vm1930_vm6 = vcmp.lt.s32.totalorder %v1911_v39, 1  ;;  %v1798_v53 = vshrl.u32 %v1797_v15, 23 }
 0x305   : > { %vm5110_vm7 = vcmp.eq.s32.totalorder %v9847_v59, 0  ;;  %vm1588_vm8 = vcmp.lt.s32.totalorder %v9573_v0, 0  ;;  %vm1932_vm9 = vcmp.lt.s32.totalorder %v1911_v39, 3  ;;  %vm1933_vm10 = vcmp.lt.s32.totalorder %v1911_v39, 4 }
 0x306   : > { %v8274_v2 = vadd.s32 4294967294, %v1654_v8  ;;  %v1938_v28 = vsel %vm1930_vm6, %v1917_v6, %v1920_v7  ;;  %vm5109_vm11 = vcmp.lt.s32.totalorder %v9847_v59, 2  ;;  %v1935_v50 = vsel %vm1933_vm10, %v1923_v25, 2102212464 }
 0x307   : > { %v1939_v18 = vsel %vm1933_vm10, %v1926_v5, 920167782  ;;  %v1942_v30 = vsel %vm1930_vm6, %v1920_v7, %v1923_v25  ;;  %v1943_v52 = vsel %vm1933_vm10, %v1929_v46, 1326507024  ;;  %vm1782_vm12 = vweird.f32 %v9486_v61 }
 0x308   : > { %vm8275_vm14 = vcmp.lt.s32.totalorder %v8274_v2, 0  ;;  %vm1931_vm15 = vcmp.lt.s32.totalorder %v1911_v39, 2  ;;  %v1940_v1 = vsel %vm1932_vm9, %v1923_v25, %v1939_v18  ;;  %v1944_v9 = vsel %vm1932_vm9, %v1926_v5, %v1943_v52 }
 0x309   : > { %v1657_v3 = vsel %vm8275_vm14, 0, %v8274_v2  ;;  %v1672_v19 = vsub.s32 4, %v9838_v38  ;;  %v1941_v58 = vsel %vm1931_vm15, %v1938_v28, %v1940_v1  ;;  %v1945_v48 = vsel %vm1931_vm15, %v1942_v30, %v1944_v9 }
 0x30a   : > { %v1658_v17 = vsub.s32 32, %v1657_v3  ;;  %v1662_v41 = vsub.s32 4294967266, %v1657_v3  ;;  %v1934_v20 = vsel %vm1930_vm6, %v1914_v45, %v1917_v6  ;;  %v1936_v62 = vsel %vm1932_vm9, %v1920_v7, %v1935_v50 }
 0x30b   : > { %v8972_v11 = vpop.eup %8971  ;;  %vm9895_vm0 = vcmp.le.f32.partialorder %v1586_v12, 0.7853982  ;;  %v9900_v22 = vmul.u32.u64.low %v9877_v44, %v1945_v48  ;;  %v9901_v24 = vmul.u32.u64.high %v9877_v44, %v1945_v48, %v9900_v22  ;;  %v1659_v56 = vshll.u32 %v9849_v16, %v1657_v3 }
 0x30c   : > { %v9904_v54 = vmul.u32.u64.low %v9877_v44, %v1941_v58  ;;  %v9905_v21 = vmul.u32.u64.high %v9877_v44, %v1941_v58, %v9904_v54  ;;  %v8974_v35 = vpop.eup %8973  ;;  %v1790_v37 = vxor.u32 2147483648, %v8972_v11  ;;  %v1660_v63 = vshrl.u32 %v1642_v26, %v1658_v17 }
 0x30d   : > { %v1663_v42 = vadd.s32 127, %v1662_v41  ;;  %v1787_v36 = vxor.u32 2147483648, %v8974_v35  ;;  %vm5113_vm1 = vcmp.eq.s32.totalorder %v9847_v59, 2  ;;  %v1937_v12 = vsel %vm1931_vm15, %v1934_v20, %v1936_v62 }
 0x30e   : > { %v8280_v13 = vadd.s32 4294967169, %v1798_v53  ;;  %vm1786_vm2 = vcmp.eq.s32.totalorder %v9873_v49, 0  ;;  %v5115_v6 = vsel %vm5113_vm1, %v1790_v37, %v8974_v35  ;;  %v1661_v7 = vor.u32 %v1660_v63, %v1659_v56 }
 0x30f   : > { %v1664_v25 = vshll.u32 %v1663_v42, 23  ;;  %vm1789_vm3 = vcmp.eq.s32.totalorder %v9873_v49, 2  ;;  %v5112_v5 = vsel %vm5110_vm7, %v8972_v11, %v1787_v36  ;;  %v1673_v16 = vsel %vm1588_vm8, %v1672_v19, %v9838_v38 }
 0x310   : > { %v1794_v10 = vand.u32 2147483647, %v9842_v60  ;;  %v5116_v39 = vsel %vm5109_vm11, %v5112_v5, %v5115_v6  ;;  %v1953_v26 = vmul.u32 %v9877_v44, %v1937_v12  ;;  %vm1955_vm4 = vc.u32 %v9901_v24, %v9904_v54 }
 0x311   : > { %v1665_v47 = vor.u32 4788187, %v1664_v25  ;;  %v1791_v8 = vsel %vm1789_vm3, %v1790_v37, %v8974_v35  ;;  %v5117_v45 = vsel %vm1782_vm12, nan, %v5116_v39  ;;  %v1956_v46 = vadd.s32 1, %v9905_v21 }
 0x312   : > { %v1804_v53 = vadd.s32 1, %v8280_v13  ;;  %v1788_v38 = vsel %vm1786_vm2, %v8972_v11, %v1787_v36  ;;  %8975 = vrcp.f32 %v5117_v45  ;;  %v1668_v59 = vcvt.s32.f32 %v1661_v7 }
 0x313   : > { %v1666_v2 = vand.u32 2147483647, %v1665_v47  ;;  %vm1785_vm5 = vcmp.lt.s32.totalorder %v9873_v49, 2  ;;  %v1957_v44 = vsel %vm1955_vm4, %v1956_v46, %v9905_v21  ;;  %v1801_v28 = vand.u32 8388607, %v1794_v10 }
 0x314   : > { %vm1805_vm6 = vcmp.gt.s32.totalorder %v1804_v53, 0  ;;  %v1675_v18 = vsel %vm9895_vm0, 0, %v1673_v16  ;;  %v1958_v30 = vadd.s32 %v1957_v44, %v1953_v26  ;;  %v1792_v1 = vsel %vm1785_vm5, %v1788_v38, %v1791_v8  ;;  %v9968_v8 = vpop.f32.mrb[27].mxu0 }
 0x315   : > { %v1669_v50 = vmul.f32 %v1668_v59, %v1666_v2  ;;  %v1806_v52 = vsel %vm1805_vm6, %v1804_v53, 0  ;;  %v9937_v58 = vadd.f32 %v9499_v14, %v9473_v51  ;;  %v1679_v49 = vadd.s32 3, %v1675_v18 }
 0x316   : > { %v1808_v9 = vand.u32 31, %v1806_v52  ;;  %v1959_v19 = vadd.s32 536870912, %v1958_v30  ;;  %v9939_v48 = vand.u32 3, %v1675_v18  ;;  %v1802_v17 = vor.u32 8388608, %v1801_v28 }
 0x317   : > { %v1670_v3 = vxor.u32 2147483648, %v1669_v50  ;;  %v1793_v20 = vsel %vm1782_vm12, nan, %v1792_v1  ;;  %v9947_v22 = vshrl.u32 %v1806_v52, 5  ;;  %v9965_v47 = vand.u32 3, %v1679_v49 }
 0x318   : > { %v1809_v41 = vsub.s32 32, %v1808_v9  ;;  %v9945_v11 = vshrl.u32 %v1959_v19, 30  ;;  %v1811_v14 = vshll.u32 %v9165_v23, %v1808_v9  ;;  %v1814_v37 = vshll.u32 %v9166_v27, %v1808_v9 }
 0x319   : > { %v1671_v62 = vsel %vm1588_vm8, %v1670_v3, %v1669_v50  ;;  %v1817_v63 = vshll.u32 %v9167_v29, %v1808_v9  ;;  %v1820_v15 = vshll.u32 %v9168_v31, %v1808_v9  ;;  %v1823_v6 = vshll.u32 %v9169_v33, %v1808_v9 }
 0x31a   : > { %v1674_v51 = vsel %vm9895_vm0, %v9573_v0, %v1671_v62  ;;  %v1812_v21 = vshrl.u32 %v9166_v27, %v1809_v41  ;;  %v1815_v35 = vshrl.u32 %v9167_v29, %v1809_v41  ;;  %v1961_v61 = vshll.u32 %v9945_v11, 30 }
 0x31b   : > { %8977 = vcosq.f32 %v1674_v51  ;;  %v1818_v56 = vshrl.u32 %v9168_v31, %v1809_v41  ;;  %v1821_v42 = vshrl.u32 %v9169_v33, %v1809_v41  ;;  %v1824_v7 = vshrl.u32 %v9170_v40, %v1809_v41 }
 0x31c   : > { %8979 = vsinq.f32 %v1674_v51  ;;  %v8976_v36 = vpop.eup %8975  ;;  %v9961_v12 = vsub.s32 %v1958_v30, %v1961_v61  ;;  %v1813_v13 = vor.u32 %v1812_v21, %v1811_v14  ;;  %v1816_v5 = vor.u32 %v1815_v35, %v1814_v37 }
 0x31d   : > { %v8037_v25 = vmul.f32 %v8976_v36, %v1793_v20  ;;  %v1819_v16 = vor.u32 %v1818_v56, %v1817_v63  ;;  %v1822_v39 = vor.u32 %v1821_v42, %v1820_v15  ;;  %vm5007_vm7 = vcmp.eq.s32.totalorder %v9939_v48, 0 }
 0x31e   : > { %v1964_v26 = vsub.s32 0, %v9961_v12  ;;  %vm5010_vm8 = vcmp.eq.s32.totalorder %v9939_v48, 2  ;;  %v1825_v45 = vor.u32 %v1824_v7, %v1823_v6  ;;  %v1842_v46 = vshll.u32 %v1802_v17, 8 }
 0x31f   : > { %8070 = vst.msk [vmem:[%s9829_s16 + $0x18] sm:$0xff] %vm8066_vm13, %v8037_v25  ;;  %vm1900_vm9 = vcmp.lt.s32.totalorder %v9687_v34, 0  ;;  %vm1826_vm10 = vcmp.lt.s32.totalorder %v9947_v22, 1  ;;  %vm1829_vm11 = vcmp.lt.s32.totalorder %v9947_v22, 4  ;;  %v2109_v38 = vand.u32 2139095040, %v9937_v58 }
 0x320   : > { %v8285_v53 = vmin.u32 %v1964_v26, %v9961_v12  ;;  %vm1678_vm12 = vweird.f32 %v9573_v0  ;;  %v1810_v2 = vshrl.u32 %v9165_v23, %v1809_v41  ;;  %v1831_v59 = vsel %vm1829_vm11, %v1819_v16, 2102212464 }
 0x321   : > { %v1834_v44 = vsel %vm1826_vm10, %v1813_v13, %v1816_v5  ;;  %v1835_v28 = vsel %vm1829_vm11, %v1822_v39, 920167782  ;;  %v1984_v18 = vsub.s32 4, %v9945_v11  ;;  %vm1827_vm14 = vcmp.lt.s32.totalorder %v9947_v22, 2 }
 0x322   : > { %v1966_v50 = vclz %v8285_v53  ;;  %vm1828_vm15 = vcmp.lt.s32.totalorder %v9947_v22, 3  ;;  %v1830_v30 = vsel %vm1826_vm10, %v1810_v2, %v1813_v13  ;;  %v1838_v1 = vsel %vm1826_vm10, %v1816_v5, %v1819_v16 }
 0x323   : > { %v1836_v52 = vsel %vm1828_vm15, %v1819_v16, %v1835_v28  ;;  %v1839_v9 = vsel %vm1829_vm11, %v1825_v45, 1326507024  ;;  %v1832_v49 = vsel %vm1828_vm15, %v1816_v5, %v1831_v59  ;;  %v2110_v42 = vshrl.u32 %v2109_v38, 23 }
 0x324   : > { %v8286_v19 = vadd.s32 4294967294, %v1966_v50  ;;  %v1837_v17 = vsel %vm1827_vm14, %v1834_v44, %v1836_v52  ;;  %v1840_v41 = vsel %vm1828_vm15, %v1822_v39, %v1839_v9  ;;  %v1833_v15 = vsel %vm1827_vm14, %v1830_v30, %v1832_v49  ;;  %v10031_v52 = vld [vmem:[%s12814_s6] ss:$0 sm:$0xff] }
 0x325   : > { %v8978_v3 = vpop.eup %8977  ;;  %v1841_v51 = vsel %vm1827_vm14, %v1838_v1, %v1840_v41  ;;  %v9988_v14 = vmul.u32.u64.low %v1842_v46, %v1837_v17  ;;  %v9989_v21 = vmul.u32.u64.high %v1842_v46, %v1837_v17, %v9988_v14  ;;  %vm5006_vm1 = vcmp.lt.s32.totalorder %v9939_v48, 2 }
 0x326   : > { %v8980_v20 = vpop.eup %8979  ;;  %v1686_v62 = vxor.u32 2147483648, %v8978_v3  ;;  %vm8287_vm0 = vcmp.lt.s32.totalorder %v8286_v19, 0  ;;  %v9992_v61 = vmul.u32.u64.low %v1842_v46, %v1841_v51  ;;  %v9993_v37 = vmul.u32.u64.high %v1842_v46, %v1841_v51, %v9992_v61 }
 0x327   : > { %v1683_v35 = vxor.u32 2147483648, %v8980_v20  ;;  %v1969_v63 = vsel %vm8287_vm0, 0, %v8286_v19  ;;  %v1954_v13 = vadd.s32 %v9904_v54, %v9901_v24  ;;  %v1985_v5 = vsel %vm1900_vm9, %v1984_v18, %v9945_v11 }
 0x328   : > { %v5012_v56 = vsel %vm5010_vm8, %v1686_v62, %v8980_v20  ;;  %v1970_v6 = vsub.s32 32, %v1969_v63  ;;  %v1974_v25 = vsub.s32 4294967266, %v1969_v63  ;;  %v1852_v16 = vadd.s32 1, %v9989_v21 }
 0x329   : > { %v5009_v36 = vsel %vm5007_vm7, %v8978_v3, %v1683_v35  ;;  %v1971_v39 = vshll.u32 %v9961_v12, %v1969_v63  ;;  %v1849_v48 = vmul.u32 %v1842_v46, %v1833_v15  ;;  %vm1851_vm2 = vc.u32 %v9993_v37, %v9988_v14 }
 0x32a   : > { %v5013_v7 = vsel %vm5006_vm1, %v5009_v36, %v5012_v56  ;;  %v1972_v26 = vshrl.u32 %v1954_v13, %v1970_v6  ;;  %v1975_v45 = vadd.s32 127, %v1974_v25  ;;  %v8292_v24 = vadd.s32 4294967169, %v2110_v42 }
 0x32b   : > { %v5014_v22 = vsel %vm1678_vm12, nan, %v5013_v7  ;;  %vm1685_vm3 = vcmp.eq.s32.totalorder %v9965_v47, 2  ;;  %vm10016_vm4 = vcmp.le.f32.partialorder %v1898_v55, 0.7853982  ;;  %v1853_v11 = vsel %vm1851_vm2, %v1852_v16, %v9989_v21 }
 0x32c   : > { %8981 = vrcp.f32 %v5014_v22  ;;  %v2106_v12 = vand.u32 2147483647, %v9937_v58  ;;  %v1973_v53 = vor.u32 %v1972_v26, %v1971_v39  ;;  %v1976_v46 = vshll.u32 %v1975_v45, 23 }
 0x32d   : > { %v1854_v38 = vadd.s32 %v1853_v11, %v1849_v48  ;;  %v2116_v2 = vadd.s32 1, %v8292_v24  ;;  %vm1682_vm5 = vcmp.eq.s32.totalorder %v9965_v47, 0  ;;  %v1687_v59 = vsel %vm1685_vm3, %v1686_v62, %v8980_v20 }
 0x32e   : > { %v1987_v44 = vsel %vm10016_vm4, 0, %v1985_v5  ;;  %v1684_v28 = vsel %vm1682_vm5, %v8978_v3, %v1683_v35  ;;  %v1977_v50 = vor.u32 4788187, %v1976_v46  ;;  %vm1681_vm7 = vcmp.lt.s32.totalorder %v9965_v47, 2  ;;  %v10060_v5 = vpop.f32.mrb[28].mxu0 }
 0x32f   : > { %v1855_v55 = vadd.s32 536870912, %v1854_v38  ;;  %vm2117_vm6 = vcmp.gt.s32.totalorder %v2116_v2, 0  ;;  %v2113_v18 = vand.u32 8388607, %v2106_v12  ;;  %v10035_v1 = vadd.f32 %v10031_v52, %v9546_v32 }
 0x330   : > { %v2118_v30 = vsel %vm2117_vm6, %v2116_v2, 0  ;;  %v1978_v9 = vand.u32 2147483647, %v1977_v50  ;;  %v1980_v3 = vcvt.s32.f32 %v1973_v53  ;;  %v1688_v17 = vsel %vm1681_vm7, %v1684_v28, %v1687_v59 }
 0x331   : > { %v10037_v19 = vshrl.u32 %v1855_v55, 30  ;;  %v2120_v49 = vand.u32 31, %v2118_v30  ;;  %v1991_v47 = vadd.s32 3, %v1987_v44  ;;  %v2114_v51 = vor.u32 8388608, %v2113_v18 }
 0x332   : > { %v1981_v41 = vmul.f32 %v1980_v3, %v1978_v9  ;;  %v2005_v21 = vand.u32 2139095040, %v10035_v1  ;;  %v1689_v32 = vsel %vm1678_vm12, nan, %v1688_v17  ;;  %v10047_v63 = vadd.f32 %v10031_v52, %v9619_v57 }
 0x333   : > { %v1857_v20 = vshll.u32 %v10037_v19, 30  ;;  %v2121_v62 = vsub.s32 32, %v2120_v49  ;;  %v10049_v42 = vand.u32 3, %v1991_v47  ;;  %v10051_v36 = vand.u32 3, %v1987_v44 }
 0x334   : > { %v1982_v61 = vxor.u32 2147483648, %v1981_v41  ;;  %v1850_v13 = vadd.s32 %v9988_v14, %v9993_v37  ;;  %v10068_v14 = vshll.u32 %v2114_v51, 8  ;;  %v2006_v37 = vshrl.u32 %v2005_v21, 23 }
 0x335   : > { %v10043_v56 = vsub.s32 %v1854_v38, %v1857_v20  ;;  %v2124_v7 = vshrl.u32 %v9166_v27, %v2121_v62  ;;  %v2127_v25 = vshrl.u32 %v9167_v29, %v2121_v62  ;;  %v2130_v16 = vshrl.u32 %v9168_v31, %v2121_v62 }
 0x336   : > { %v8982_v35 = vpop.eup %8981  ;;  %v1983_v6 = vsel %vm1900_vm9, %v1982_v61, %v1981_v41  ;;  %v2123_v39 = vshll.u32 %v9165_v23, %v2120_v49  ;;  %v2126_v26 = vshll.u32 %v9166_v27, %v2120_v49  ;;  %v10073_v48 = vshrl.u32 %v2118_v30, 5 }
 0x337   : > { %v8036_v15 = vmul.f32 %v8982_v35, %v1689_v32  ;;  %v1860_v0 = vsub.s32 0, %v10043_v56  ;;  %v1986_v57 = vsel %vm10016_vm4, %v9687_v34, %v1983_v6  ;;  %v2129_v45 = vshll.u32 %v9167_v29, %v2120_v49 }
 0x338   : > { %8983 = vcosq.f32 %v1986_v57  ;;  %v2002_v24 = vand.u32 2147483647, %v10035_v1  ;;  %v2125_v11 = vor.u32 %v2124_v7, %v2123_v39  ;;  %v2128_v53 = vor.u32 %v2127_v25, %v2126_v26 }
 0x339   : > { %8069 = vst.msk [vmem:[%s9829_s16 + $0x10] sm:$0xff] %vm8066_vm13, %v8036_v15  ;;  %v8281_v22 = vmin.u32 %v1860_v0, %v10043_v56  ;;  %8985 = vsinq.f32 %v1986_v57  ;;  %v2132_v46 = vshll.u32 %v9168_v31, %v2120_v49  ;;  %v2131_v38 = vor.u32 %v2130_v16, %v2129_v45 }
 0x33a   : > { %v2133_v2 = vshrl.u32 %v9169_v33, %v2121_v62  ;;  %v2135_v59 = vshll.u32 %v9169_v33, %v2120_v49  ;;  %v2136_v44 = vshrl.u32 %v9170_v40, %v2121_v62  ;;  %vm5319_vm8 = vcmp.eq.s32.totalorder %v10051_v36, 2 }
 0x33b   : > { %v1862_v54 = vclz %v8281_v22  ;;  %v1880_v50 = vsub.s32 4, %v10037_v19  ;;  %v2122_v55 = vshrl.u32 %v9165_v23, %v2121_v62  ;;  %v8288_v18 = vadd.s32 4294967169, %v2006_v37 }
 0x33c   : > { %vm5316_vm9 = vcmp.eq.s32.totalorder %v10051_v36, 0  ;;  %vm1796_vm10 = vcmp.lt.s32.totalorder %v9842_v60, 0  ;;  %v2134_v30 = vor.u32 %v2133_v2, %v2132_v46  ;;  %v2137_v9 = vor.u32 %v2136_v44, %v2135_v59 }
 0x33d   : > { %v8282_v28 = vadd.s32 4294967294, %v1862_v54  ;;  %vm2138_vm11 = vcmp.lt.s32.totalorder %v10073_v48, 1  ;;  %vm2139_vm12 = vcmp.lt.s32.totalorder %v10073_v48, 2  ;;  %vm1994_vm14 = vcmp.eq.s32.totalorder %v10049_v42, 0 }
 0x33e   : > { %vm1997_vm15 = vcmp.eq.s32.totalorder %v10049_v42, 2  ;;  %vm5315_vm0 = vcmp.lt.s32.totalorder %v10051_v36, 2  ;;  %vm2140_vm2 = vcmp.lt.s32.totalorder %v10073_v48, 3  ;;  %vm2141_vm3 = vcmp.lt.s32.totalorder %v10073_v48, 4 }
 0x33f   : > { %vm8283_vm1 = vcmp.lt.s32.totalorder %v8282_v28, 0  ;;  %v2146_v3 = vsel %vm2138_vm11, %v2125_v11, %v2128_v53  ;;  %vm1990_vm4 = vweird.f32 %v9687_v34  ;;  %v2147_v17 = vsel %vm2141_vm3, %v2134_v30, 920167782 }
 0x340   : > { %v1865_v49 = vsel %vm8283_vm1, 0, %v8282_v28  ;;  %v2150_v47 = vsel %vm2138_vm11, %v2128_v53, %v2131_v38  ;;  %v2151_v41 = vsel %vm2141_vm3, %v2137_v9, 1326507024  ;;  %v2142_v51 = vsel %vm2138_vm11, %v2122_v55, %v2125_v11 }
 0x341   : > { %v1866_v20 = vsub.s32 32, %v1865_v49  ;;  %v1870_v62 = vsub.s32 4294967266, %v1865_v49  ;;  %v2148_v21 = vsel %vm2140_vm2, %v2131_v38, %v2147_v17  ;;  %vm10104_vm5 = vcmp.le.f32.partialorder %v1794_v10, 0.7853982 }
 0x342   : > { %v1867_v32 = vshll.u32 %v10043_v56, %v1865_v49  ;;  %v2143_v61 = vsel %vm2141_vm3, %v2131_v38, 2102212464  ;;  %v2152_v15 = vsel %vm2140_vm2, %v2134_v30, %v2151_v41  ;;  %v2012_v6 = vadd.s32 1, %v8288_v18  ;;  %v8984_v0 = vpop.eup %8983 }
 0x343   : > { %vm1993_vm6 = vcmp.lt.s32.totalorder %v10049_v42, 2  ;;  %v1868_v7 = vshrl.u32 %v1850_v13, %v1866_v20  ;;  %v1871_v25 = vadd.s32 127, %v1870_v62  ;;  %v2149_v57 = vsel %vm2139_vm12, %v2146_v3, %v2148_v21  ;;  %v8986_v16 = vpop.eup %8985 }
 0x344   : > { %v2153_v10 = vsel %vm2139_vm12, %v2150_v47, %v2152_v15  ;;  %v1998_v37 = vxor.u32 2147483648, %v8984_v0  ;;  %vm2013_vm7 = vcmp.gt.s32.totalorder %v2012_v6, 0  ;;  %v1995_v39 = vxor.u32 2147483648, %v8986_v16 }
 0x345   : > { %v10117_v56 = vmul.u32.u64.low %v10068_v14, %v2153_v10  ;;  %v10118_v22 = vmul.u32.u64.high %v10068_v14, %v2153_v10, %v10117_v56  ;;  %v1869_v26 = vor.u32 %v1868_v7, %v1867_v32  ;;  %v1872_v45 = vshll.u32 %v1871_v25, 23  ;;  %v10164_v25 = vpop.f32.mrb[29].mxu0 }
 0x346   : > { %v2144_v13 = vsel %vm2140_vm2, %v2128_v53, %v2143_v61  ;;  %v5321_v54 = vsel %vm5319_vm8, %v1998_v37, %v8986_v16  ;;  %v10125_v11 = vmul.u32.u64.low %v10068_v14, %v2149_v57  ;;  %v10126_v46 = vmul.u32.u64.high %v10068_v14, %v2149_v57, %v10125_v11 }
 0x347   : > { %v2009_v38 = vand.u32 8388607, %v2002_v24  ;;  %v5318_v2 = vsel %vm5316_vm9, %v8984_v0, %v1995_v39  ;;  %v1873_v59 = vor.u32 4788187, %v1872_v45  ;;  %v1881_v44 = vsel %vm1796_vm10, %v1880_v50, %v10037_v19 }
 0x348   : > { %v2014_v53 = vsel %vm2013_vm7, %v2012_v6, 0  ;;  %v1996_v28 = vsel %vm1994_vm14, %v8984_v0, %v1995_v39  ;;  %v1999_v55 = vsel %vm1997_vm15, %v1998_v37, %v8986_v16  ;;  %v5322_v18 = vsel %vm5315_vm0, %v5318_v2, %v5321_v54 }
 0x349   : > { %v2145_v30 = vsel %vm2139_vm12, %v2142_v51, %v2144_v13  ;;  %v5323_v9 = vsel %vm1990_vm4, nan, %v5322_v18  ;;  %v1874_v3 = vand.u32 2147483647, %v1873_v59  ;;  %v1876_v49 = vcvt.s32.f32 %v1869_v26 }
 0x34a   : > { %vm2163_vm8 = vc.u32 %v10118_v22, %v10125_v11  ;;  %8987 = vrcp.f32 %v5323_v9  ;;  %v2164_v19 = vadd.s32 1, %v10126_v46  ;;  %v2010_v50 = vor.u32 8388608, %v2009_v38 }
 0x34b   : > { %v2016_v17 = vand.u32 31, %v2014_v53  ;;  %v1877_v47 = vmul.f32 %v1876_v49, %v1874_v3  ;;  %v1883_v36 = vsel %vm10104_vm5, 0, %v1881_v44  ;;  %v2161_v48 = vmul.u32 %v10068_v14, %v2145_v30 }
 0x34c   : > { %v2317_v41 = vand.u32 2139095040, %v10047_v63  ;;  %v2000_v20 = vsel %vm1993_vm6, %v1996_v28, %v1999_v55  ;;  %v2165_v62 = vsel %vm2163_vm8, %v2164_v19, %v10126_v46  ;;  %v10156_v51 = vshrl.u32 %v2014_v53, 5 }
 0x34d   : > { %v2017_v21 = vsub.s32 32, %v2016_v17  ;;  %v1878_v32 = vxor.u32 2147483648, %v1877_v47  ;;  %v2166_v61 = vadd.s32 %v2165_v62, %v2161_v48  ;;  %v2019_v15 = vshll.u32 %v9165_v23, %v2016_v17 }
 0x34e   : > { %v2022_v6 = vshll.u32 %v9166_v27, %v2016_v17  ;;  %v2025_v7 = vshll.u32 %v9167_v29, %v2016_v17  ;;  %v2028_v16 = vshll.u32 %v9168_v31, %v2016_v17  ;;  %v2031_v45 = vshll.u32 %v9169_v33, %v2016_v17 }
 0x34f   : > { %v2020_v0 = vshrl.u32 %v9166_v27, %v2017_v21  ;;  %v2023_v14 = vshrl.u32 %v9167_v29, %v2017_v21  ;;  %v2026_v42 = vshrl.u32 %v9168_v31, %v2017_v21  ;;  %v1879_v57 = vsel %vm1796_vm10, %v1878_v32, %v1877_v47 }
 0x350   : > { %v2167_v10 = vadd.s32 536870912, %v2166_v61  ;;  %v2029_v37 = vshrl.u32 %v9169_v33, %v2017_v21  ;;  %v1882_v56 = vsel %vm10104_vm5, %v9842_v60, %v1879_v57  ;;  %v2032_v46 = vshrl.u32 %v9170_v40, %v2017_v21 }
 0x351   : > { %v2021_v39 = vor.u32 %v2020_v0, %v2019_v15  ;;  %v2024_v26 = vor.u32 %v2023_v14, %v2022_v6  ;;  %8989 = vcosq.f32 %v1882_v56  ;;  %v2027_v38 = vor.u32 %v2026_v42, %v2025_v7 }
 0x352   : > { %v10174_v13 = vshrl.u32 %v2167_v10, 30  ;;  %v2030_v54 = vor.u32 %v2029_v37, %v2028_v16  ;;  %8991 = vsinq.f32 %v1882_v56  ;;  %v10177_v2 = vshll.u32 %v2010_v50, 8 }
 0x353   : > { %v2318_v59 = vshrl.u32 %v2317_v41, 23  ;;  %v2033_v53 = vor.u32 %v2032_v46, %v2031_v45  ;;  %vm2034_vm9 = vcmp.lt.s32.totalorder %v10156_v51, 1  ;;  %vm2037_vm10 = vcmp.lt.s32.totalorder %v10156_v51, 4 }
 0x354   : > { %v2169_v44 = vshll.u32 %v10174_v13, 30  ;;  %v8988_v35 = vpop.eup %8987  ;;  %v2001_v28 = vsel %vm1990_vm4, nan, %v2000_v20  ;;  %v1887_v55 = vadd.s32 3, %v1883_v36  ;;  %v2042_v18 = vsel %vm2034_vm9, %v2021_v39, %v2024_v26 }
 0x355   : > { %v2043_v30 = vsel %vm2037_vm10, %v2030_v54, 920167782  ;;  %v8039_v9 = vmul.f32 %v8988_v35, %v2001_v28  ;;  %v5211_v3 = vand.u32 3, %v1883_v36  ;;  %vm2036_vm11 = vcmp.lt.s32.totalorder %v10156_v51, 3 }
 0x356   : > { %v10188_v49 = vsub.s32 %v2166_v61, %v2169_v44  ;;  %vm2035_vm12 = vcmp.lt.s32.totalorder %v10156_v51, 2  ;;  %v2044_v19 = vsel %vm2036_vm11, %v2027_v38, %v2043_v30  ;;  %v2047_v34 = vsel %vm2037_vm10, %v2033_v53, 1326507024 }
 0x357   : > { %v8300_v50 = vadd.s32 4294967169, %v2318_v59  ;;  %8072 = vst.msk [vmem:[%s9829_s16 + $0x28] sm:$0xff] %vm8066_vm13, %v8039_v9  ;;  %v2039_v47 = vsel %vm2037_vm10, %v2027_v38, 2102212464  ;;  %v2045_v36 = vsel %vm2035_vm12, %v2042_v18, %v2044_v19  ;;  %v2046_v48 = vsel %vm2034_vm9, %v2024_v26, %v2027_v38 }
 0x358   : > { %v2172_v17 = vsub.s32 0, %v10188_v49  ;;  %v2018_v41 = vshrl.u32 %v9165_v23, %v2017_v21  ;;  %v2048_v20 = vsel %vm2036_vm11, %v2030_v54, %v2047_v34  ;;  %v1888_v61 = vand.u32 3, %v1887_v55 }
 0x359   : > { %v10209_v62 = vmul.u32.u64.low %v10177_v2, %v2045_v36  ;;  %v10210_v32 = vmul.u32.u64.high %v10177_v2, %v2045_v36, %v10209_v62  ;;  %v2040_v0 = vsel %vm2036_vm11, %v2024_v26, %v2039_v47  ;;  %v2049_v21 = vsel %vm2035_vm12, %v2046_v48, %v2048_v20 }
 0x35a   : > { %v8293_v15 = vmin.u32 %v2172_v17, %v10188_v49  ;;  %v2038_v6 = vsel %vm2034_vm9, %v2018_v41, %v2021_v39  ;;  %v2324_v14 = vadd.s32 1, %v8300_v50  ;;  %vm1886_vm14 = vweird.f32 %v9842_v60 }
 0x35b   : > { %v8990_v7 = vpop.eup %8989  ;;  %vm5212_vm15 = vcmp.lt.s32.totalorder %v5211_v3, 2  ;;  %v2314_v57 = vand.u32 2147483647, %v10047_v63  ;;  %vm5216_vm0 = vcmp.eq.s32.totalorder %v5211_v3, 2  ;;  %v2041_v45 = vsel %vm2035_vm12, %v2038_v6, %v2040_v0 }
 0x35c   : > { %v2174_v42 = vclz %v8293_v15  ;;  %v8992_v10 = vpop.eup %8991  ;;  %v1894_v16 = vxor.u32 2147483648, %v8990_v7  ;;  %v10223_v37 = vmul.u32.u64.low %v10177_v2, %v2049_v21  ;;  %v10224_v56 = vmul.u32.u64.high %v10177_v2, %v2049_v21, %v10223_v37 }
 0x35d   : > { %v1891_v39 = vxor.u32 2147483648, %v8992_v10  ;;  %vm2325_vm1 = vcmp.gt.s32.totalorder %v2324_v14, 0  ;;  %vm1890_vm2 = vcmp.eq.s32.totalorder %v1888_v61, 0  ;;  %vm1893_vm3 = vcmp.eq.s32.totalorder %v1888_v61, 2 }
 0x35e   : > { %v8294_v26 = vadd.s32 4294967294, %v2174_v42  ;;  %vm5213_vm4 = vcmp.eq.s32.totalorder %v5211_v3, 0  ;;  %v5218_v54 = vsel %vm5216_vm0, %v1894_v16, %v8992_v10  ;;  %v2060_v38 = vadd.s32 1, %v10210_v32 }
 0x35f   : > { %v5215_v46 = vsel %vm5213_vm4, %v8990_v7, %v1891_v39  ;;  %v2326_v59 = vsel %vm2325_vm1, %v2324_v14, 0  ;;  %v2162_v53 = vadd.s32 %v10125_v11, %v10118_v22  ;;  %v2057_v28 = vmul.u32 %v10177_v2, %v2041_v45 }
 0x360   : > { %vm8295_vm5 = vcmp.lt.s32.totalorder %v8294_v26, 0  ;;  %v5219_v44 = vsel %vm5212_vm15, %v5215_v46, %v5218_v54  ;;  %v1892_v51 = vsel %vm1890_vm2, %v8990_v7, %v1891_v39  ;;  %v1895_v55 = vsel %vm1893_vm3, %v1894_v16, %v8992_v10 }
 0x361   : > { %v2177_v35 = vsel %vm8295_vm5, 0, %v8294_v26  ;;  %v5220_v18 = vsel %vm1886_vm14, nan, %v5219_v44  ;;  %vm2059_vm6 = vc.u32 %v10224_v56, %v10209_v62  ;;  %v2328_v19 = vand.u32 31, %v2326_v59 }
 0x362   : > { %v2178_v30 = vsub.s32 32, %v2177_v35  ;;  %8993 = vrcp.f32 %v5220_v18  ;;  %v2182_v9 = vsub.s32 4294967266, %v2177_v35  ;;  %v2179_v3 = vshll.u32 %v10188_v49, %v2177_v35 }
 0x363   : > { %v2061_v22 = vsel %vm2059_vm6, %v2060_v38, %v10210_v32  ;;  %vm1889_vm7 = vcmp.lt.s32.totalorder %v1888_v61, 2  ;;  %v2329_v50 = vsub.s32 32, %v2328_v19  ;;  %v2321_v36 = vand.u32 8388607, %v2314_v57 }
 0x364   : > { %v2180_v34 = vshrl.u32 %v2162_v53, %v2178_v30  ;;  %v2183_v11 = vadd.s32 127, %v2182_v9  ;;  %v2062_v2 = vadd.s32 %v2061_v22, %v2057_v28  ;;  %v1896_v17 = vsel %vm1889_vm7, %v1892_v51, %v1895_v55  ;;  %v10280_v22 = vpop.f32.mrb[30].mxu0 }
 0x365   : > { %v10241_v48 = vshrl.u32 %v2326_v59, 5  ;;  %v2331_v15 = vshll.u32 %v9165_v23, %v2328_v19  ;;  %v2332_v49 = vshrl.u32 %v9166_v27, %v2329_v50  ;;  %v2335_v6 = vshrl.u32 %v9167_v29, %v2329_v50 }
 0x366   : > { %v2181_v47 = vor.u32 %v2180_v34, %v2179_v3  ;;  %v2184_v41 = vshll.u32 %v2183_v11, 23  ;;  %v2063_v20 = vadd.s32 536870912, %v2062_v2  ;;  %v2338_v32 = vshrl.u32 %v9168_v31, %v2329_v50 }
 0x367   : > { %v2340_v61 = vshll.u32 %v9168_v31, %v2328_v19  ;;  %v2341_v0 = vshrl.u32 %v9169_v33, %v2329_v50  ;;  %v2334_v7 = vshll.u32 %v9166_v27, %v2328_v19  ;;  %v2337_v42 = vshll.u32 %v9167_v29, %v2328_v19 }
 0x368   : > { %v2185_v21 = vor.u32 4788187, %v2184_v41  ;;  %v10249_v14 = vshrl.u32 %v2063_v20, 30  ;;  %v2188_v10 = vcvt.s32.f32 %v2181_v47  ;;  %v2333_v16 = vor.u32 %v2332_v49, %v2331_v15 }
 0x369   : > { %v2342_v37 = vor.u32 %v2341_v0, %v2340_v61  ;;  %v2344_v39 = vshrl.u32 %v9170_v40, %v2329_v50  ;;  %v2336_v54 = vor.u32 %v2335_v6, %v2334_v7  ;;  %v2343_v46 = vshll.u32 %v9169_v33, %v2328_v19 }
 0x36a   : > { %v2186_v26 = vand.u32 2147483647, %v2185_v21  ;;  %v2065_v45 = vshll.u32 %v10249_v14, 30  ;;  %v1897_v38 = vsel %vm1886_vm14, nan, %v1896_v17  ;;  %vm2108_vm8 = vcmp.lt.s32.totalorder %v9937_v58, 0 }
 0x36b   : > { %v2192_v59 = vsub.s32 4, %v10174_v13  ;;  %v2339_v44 = vor.u32 %v2338_v32, %v2337_v42  ;;  %v2345_v51 = vor.u32 %v2344_v39, %v2343_v46  ;;  %vm2349_vm9 = vcmp.lt.s32.totalorder %v10241_v48, 4 }
 0x36c   : > { %v8994_v53 = vpop.eup %8993  ;;  %v2189_v35 = vmul.f32 %v2188_v10, %v2186_v26  ;;  %v10260_v28 = vsub.s32 %v2062_v2, %v2065_v45  ;;  %v2322_v18 = vor.u32 8388608, %v2321_v36  ;;  %vm2346_vm10 = vcmp.lt.s32.totalorder %v10241_v48, 1 }
 0x36d   : > { %v8038_v55 = vmul.f32 %v8994_v53, %v1897_v38  ;;  %v2355_v60 = vsel %vm2349_vm9, %v2342_v37, 920167782  ;;  %vm2348_vm11 = vcmp.lt.s32.totalorder %v10241_v48, 3  ;;  %v2354_v19 = vsel %vm2346_vm10, %v2333_v16, %v2336_v54 }
 0x36e   : > { %v2190_v30 = vxor.u32 2147483648, %v2189_v35  ;;  %v2068_v9 = vsub.s32 0, %v10260_v28  ;;  %vm2107_vm12 = vcmp.le.f32.partialorder %v2106_v12, 0.7853982  ;;  %v2193_v3 = vsel %vm2108_vm8, %v2192_v59, %v10174_v13 }
 0x36f   : > { %8071 = vst.msk [vmem:[%s9829_s16 + $0x20] sm:$0xff] %vm8066_vm13, %v8038_v55  ;;  %vm2347_vm14 = vcmp.lt.s32.totalorder %v10241_v48, 2  ;;  %v2356_v34 = vsel %vm2348_vm11, %v2339_v44, %v2355_v60  ;;  %v2351_v17 = vsel %vm2349_vm9, %v2339_v44, 2102212464  ;;  %v2359_v12 = vsel %vm2349_vm9, %v2345_v51, 1326507024 }
 0x370   : > { %v2191_v11 = vsel %vm2108_vm8, %v2190_v30, %v2189_v35  ;;  %v8289_v2 = vmin.u32 %v2068_v9, %v10260_v28  ;;  %v2330_v47 = vshrl.u32 %v9165_v23, %v2329_v50  ;;  %v2357_v36 = vsel %vm2347_vm14, %v2354_v19, %v2356_v34 }
 0x371   : > { %v2194_v13 = vsel %vm2107_vm12, %v9937_v58, %v2191_v11  ;;  %v2358_v41 = vsel %vm2346_vm10, %v2336_v54, %v2339_v44  ;;  %v2195_v20 = vsel %vm2107_vm12, 0, %v2193_v3  ;;  %v2362_v49 = vshll.u32 %v2322_v18, 8 }
 0x372   : > { %8995 = vcosq.f32 %v2194_v13  ;;  %v2070_v15 = vclz %v8289_v2  ;;  %v2350_v6 = vsel %vm2346_vm10, %v2330_v47, %v2333_v16  ;;  %v2352_v32 = vsel %vm2348_vm11, %v2336_v54, %v2351_v17 }
 0x373   : > { %8997 = vsinq.f32 %v2194_v13  ;;  %v2360_v50 = vsel %vm2348_vm11, %v2342_v37, %v2359_v12  ;;  %v10303_v21 = vmul.u32.u64.low %v2362_v49, %v2357_v36  ;;  %v10304_v7 = vmul.u32.u64.high %v2362_v49, %v2357_v36, %v10303_v21 }
 0x374   : > { %v8290_v61 = vadd.s32 4294967294, %v2070_v15  ;;  %v2361_v0 = vsel %vm2347_vm14, %v2358_v41, %v2360_v50  ;;  %v2199_v42 = vadd.s32 3, %v2195_v20  ;;  %v10312_v16 = vadd.f32 %v10031_v52, %v9701_v43 }
 0x375   : > { %v10307_v10 = vmul.u32.u64.low %v2362_v49, %v2361_v0  ;;  %v10308_v39 = vmul.u32.u64.high %v2362_v49, %v2361_v0, %v10307_v10  ;;  %vm10316_vm15 = vcmp.le.f32.partialorder %v2002_v24, 0.7853982  ;;  %vm2004_vm0 = vcmp.lt.s32.totalorder %v10035_v1, 0 }
 0x376   : > { %vm8291_vm1 = vcmp.lt.s32.totalorder %v8290_v61, 0  ;;  %v2353_v26 = vsel %vm2347_vm14, %v2350_v6, %v2352_v32  ;;  %v5520_v45 = vand.u32 3, %v2195_v20  ;;  %v2088_v46 = vsub.s32 4, %v10249_v14 }
 0x377   : > { %v2073_v54 = vsel %vm8291_vm1, 0, %v8290_v61  ;;  %v2213_v38 = vand.u32 2139095040, %v10312_v16  ;;  %v2058_v43 = vadd.s32 %v10209_v62, %v10224_v56  ;;  %v2372_v44 = vadd.s32 1, %v10304_v7 }
 0x378   : > { %v2074_v59 = vsub.s32 32, %v2073_v54  ;;  %v2078_v24 = vsub.s32 4294967266, %v2073_v54  ;;  %vm2198_vm2 = vweird.f32 %v9937_v58  ;;  %v2200_v53 = vand.u32 3, %v2199_v42 }
 0x379   : > { %v2369_v35 = vmul.u32 %v2362_v49, %v2353_v26  ;;  %vm2371_vm3 = vc.u32 %v10308_v39, %v10303_v21  ;;  %v2214_v48 = vshrl.u32 %v2213_v38, 23  ;;  %v2075_v51 = vshll.u32 %v10260_v28, %v2073_v54 }
 0x37a   : > { %v2076_v55 = vshrl.u32 %v2058_v43, %v2074_v59  ;;  %v2079_v18 = vadd.s32 127, %v2078_v24  ;;  %v2373_v60 = vsel %vm2371_vm3, %v2372_v44, %v10304_v7  ;;  %v2089_v62 = vsel %vm2004_vm0, %v2088_v46, %v10249_v14 }
 0x37b   : > { %v2374_v56 = vadd.s32 %v2373_v60, %v2369_v35  ;;  %v2210_v30 = vand.u32 2147483647, %v10312_v16  ;;  %v8296_v9 = vadd.s32 4294967169, %v2214_v48  ;;  %vm5521_vm4 = vcmp.lt.s32.totalorder %v5520_v45, 2 }
 0x37c   : > { %v8996_v19 = vpop.eup %8995  ;;  %vm5522_vm5 = vcmp.eq.s32.totalorder %v5520_v45, 0  ;;  %v2077_v3 = vor.u32 %v2076_v55, %v2075_v51  ;;  %v2080_v34 = vshll.u32 %v2079_v18, 23  ;;  %vm5525_vm6 = vcmp.eq.s32.totalorder %v5520_v45, 2  ;;  %v10360_v51 = vpop.f32.mrb[31].mxu0 }
 0x37d   : > { %v8998_v11 = vpop.eup %8997  ;;  %v2206_v2 = vxor.u32 2147483648, %v8996_v19  ;;  %v2375_v28 = vadd.s32 536870912, %v2374_v56  ;;  %v2220_v17 = vadd.s32 1, %v8296_v9  ;;  %vm2202_vm7 = vcmp.eq.s32.totalorder %v2200_v53, 0 }
 0x37e   : > { %v2203_v12 = vxor.u32 2147483648, %v8998_v11  ;;  %v2081_v13 = vor.u32 4788187, %v2080_v34  ;;  %v2091_v14 = vsel %vm10316_vm15, 0, %v2089_v62  ;;  %v2217_v41 = vand.u32 8388607, %v2210_v30 }
 0x37f   : > { %v5527_v47 = vsel %vm5525_vm6, %v2206_v2, %v8998_v11  ;;  %v10339_v36 = vshrl.u32 %v2375_v28, 30  ;;  %vm2221_vm8 = vcmp.gt.s32.totalorder %v2220_v17, 0  ;;  %v2084_v49 = vcvt.s32.f32 %v2077_v3 }
 0x380   : > { %v5524_v20 = vsel %vm5522_vm5, %v8996_v19, %v2203_v12  ;;  %v2082_v15 = vand.u32 2147483647, %v2081_v13  ;;  %v2222_v6 = vsel %vm2221_vm8, %v2220_v17, 0  ;;  %vm2205_vm9 = vcmp.eq.s32.totalorder %v2200_v53, 2 }
 0x381   : > { %v5528_v32 = vsel %vm5521_vm4, %v5524_v20, %v5527_v47  ;;  %v2095_v50 = vadd.s32 3, %v2091_v14  ;;  %v2377_v61 = vshll.u32 %v10339_v36, 30  ;;  %v2204_v0 = vsel %vm2202_vm7, %v8996_v19, %v2203_v12 }
 0x382   : > { %v2207_v7 = vsel %vm2205_vm9, %v2206_v2, %v8998_v11  ;;  %v5529_v42 = vsel %vm2198_vm2, nan, %v5528_v32  ;;  %v2085_v10 = vmul.f32 %v2084_v49, %v2082_v15  ;;  %v2224_v54 = vand.u32 31, %v2222_v6 }
 0x383   : > { %8999 = vrcp.f32 %v5529_v42  ;;  %v10349_v26 = vsub.s32 %v2374_v56, %v2377_v61  ;;  %vm2201_vm10 = vcmp.lt.s32.totalorder %v2200_v53, 2  ;;  %v2218_v38 = vor.u32 8388608, %v2217_v41 }
 0x384   : > { %v2086_v46 = vxor.u32 2147483648, %v2085_v10  ;;  %v10351_v43 = vshrl.u32 %v2222_v6, 5  ;;  %v2208_v45 = vsel %vm2201_vm10, %v2204_v0, %v2207_v7  ;;  %v10356_v44 = vand.u32 3, %v2095_v50 }
 0x385   : > { %v2380_v59 = vsub.s32 0, %v10349_v26  ;;  %v10358_v35 = vand.u32 3, %v2091_v14  ;;  %v2225_v48 = vsub.s32 32, %v2224_v54  ;;  %v2370_v55 = vadd.s32 %v10303_v21, %v10308_v39 }
 0x386   : > { %v2087_v24 = vsel %vm2004_vm0, %v2086_v46, %v2085_v10  ;;  %v10370_v60 = vadd.f32 %v10031_v52, %v9868_v4  ;;  %v2209_v62 = vsel %vm2198_vm2, nan, %v2208_v45  ;;  %vm2242_vm11 = vcmp.lt.s32.totalorder %v10351_v43, 1 }
 0x387   : > { %v2090_v53 = vsel %vm10316_vm15, %v10035_v1, %v2087_v24  ;;  %v8301_v18 = vmin.u32 %v2380_v59, %v10349_v26  ;;  %v10375_v56 = vshll.u32 %v2218_v38, 8  ;;  %v2227_v9 = vshll.u32 %v9165_v23, %v2224_v54 }
 0x388   : > { %9001 = vcosq.f32 %v2090_v53  ;;  %v2230_v21 = vshll.u32 %v9166_v27, %v2224_v54  ;;  %v2228_v39 = vshrl.u32 %v9166_v27, %v2225_v48  ;;  %v2231_v19 = vshrl.u32 %v9167_v29, %v2225_v48 }
 0x389   : > { %9003 = vsinq.f32 %v2090_v53  ;;  %v2382_v37 = vclz %v8301_v18  ;;  %v2233_v4 = vshll.u32 %v9167_v29, %v2224_v54  ;;  %v2234_v58 = vshrl.u32 %v9168_v31, %v2225_v48 }
 0x38a   : > { %v2236_v34 = vshll.u32 %v9168_v31, %v2224_v54  ;;  %v2237_v11 = vshrl.u32 %v9169_v33, %v2225_v48  ;;  %v2239_v2 = vshll.u32 %v9169_v33, %v2224_v54  ;;  %vm5422_vm12 = vcmp.eq.s32.totalorder %v10358_v35, 2 }
 0x38b   : > { %v8302_v3 = vadd.s32 4294967294, %v2382_v37  ;;  %v2229_v28 = vor.u32 %v2228_v39, %v2227_v9  ;;  %v2232_v17 = vor.u32 %v2231_v19, %v2230_v21  ;;  %v2235_v12 = vor.u32 %v2234_v58, %v2233_v4 }
 0x38c   : > { %v2240_v13 = vshrl.u32 %v9170_v40, %v2225_v48  ;;  %v2226_v47 = vshrl.u32 %v9165_v23, %v2225_v48  ;;  %v2238_v41 = vor.u32 %v2237_v11, %v2236_v34  ;;  %vm2243_vm15 = vcmp.lt.s32.totalorder %v10351_v43, 2 }
 0x38d   : > { %v9000_v14 = vpop.eup %8999  ;;  %vm8303_vm14 = vcmp.lt.s32.totalorder %v8302_v3, 0  ;;  %vm5418_vm0 = vcmp.lt.s32.totalorder %v10358_v35, 2  ;;  %vm2245_vm1 = vcmp.lt.s32.totalorder %v10351_v43, 4  ;;  %vm2094_vm2 = vweird.f32 %v10035_v1 }
 0x38e   : > { %v8041_v20 = vmul.f32 %v9000_v14, %v2209_v62  ;;  %v2385_v15 = vsel %vm8303_vm14, 0, %v8302_v3  ;;  %v2241_v49 = vor.u32 %v2240_v13, %v2239_v2  ;;  %vm2244_vm3 = vcmp.lt.s32.totalorder %v10351_v43, 3 }
 0x38f   : > { %v2386_v6 = vsub.s32 32, %v2385_v15  ;;  %v2390_v32 = vsub.s32 4294967266, %v2385_v15  ;;  %v2247_v50 = vsel %vm2245_vm1, %v2235_v12, 2102212464  ;;  %v2387_v61 = vshll.u32 %v10349_v26, %v2385_v15 }
 0x390   : > { %8074 = vst.msk [vmem:[%s9829_s16 + $0x38] sm:$0xff] %vm8066_vm13, %v8041_v20  ;;  %v2246_v0 = vsel %vm2242_vm11, %v2226_v47, %v2229_v28  ;;  %v2250_v7 = vsel %vm2242_vm11, %v2229_v28, %v2232_v17  ;;  %v2251_v42 = vsel %vm2245_vm1, %v2238_v41, 920167782  ;;  %v2254_v38 = vsel %vm2242_vm11, %v2232_v17, %v2235_v12 }
 0x391   : > { %v2388_v10 = vshrl.u32 %v2370_v55, %v2386_v6  ;;  %v2391_v54 = vadd.s32 127, %v2390_v32  ;;  %v2252_v46 = vsel %vm2244_vm3, %v2235_v12, %v2251_v42  ;;  %v2248_v26 = vsel %vm2244_vm3, %v2232_v17, %v2247_v50 }
 0x392   : > { %v9002_v45 = vpop.eup %9001  ;;  %v2253_v59 = vsel %vm2243_vm15, %v2250_v7, %v2252_v46  ;;  %v2255_v24 = vsel %vm2245_vm1, %v2241_v49, 1326507024  ;;  %v2525_v48 = vand.u32 2139095040, %v10370_v60  ;;  %vm5419_vm4 = vcmp.eq.s32.totalorder %v10358_v35, 0 }
 0x393   : > { %v9004_v53 = vpop.eup %9003  ;;  %v2102_v55 = vxor.u32 2147483648, %v9002_v45  ;;  %v2389_v18 = vor.u32 %v2388_v10, %v2387_v61  ;;  %v2392_v62 = vshll.u32 %v2391_v54, 23  ;;  %v2256_v37 = vsel %vm2244_vm3, %v2238_v41, %v2255_v24 }
 0x394   : > { %v2099_v9 = vxor.u32 2147483648, %v9004_v53  ;;  %v2257_v21 = vsel %vm2243_vm15, %v2254_v38, %v2256_v37  ;;  %v10421_v39 = vmul.u32.u64.low %v10375_v56, %v2253_v59  ;;  %v10422_v19 = vmul.u32.u64.high %v10375_v56, %v2253_v59, %v10421_v39 }
 0x395   : > { %v5424_v4 = vsel %vm5422_vm12, %v2102_v55, %v9004_v53  ;;  %v2393_v58 = vor.u32 4788187, %v2392_v62  ;;  %v2400_v3 = vsub.s32 4, %v10339_v36  ;;  %v2249_v11 = vsel %vm2243_vm15, %v2246_v0, %v2248_v26 }
 0x396   : > { %v5421_v34 = vsel %vm5419_vm4, %v9002_v45, %v2099_v9  ;;  %v10432_v2 = vmul.u32.u64.low %v10375_v56, %v2257_v21  ;;  %v10433_v28 = vmul.u32.u64.high %v10375_v56, %v2257_v21, %v10432_v2  ;;  %v2396_v13 = vcvt.s32.f32 %v2389_v18 }
 0x397   : > { %v5425_v17 = vsel %vm5418_vm0, %v5421_v34, %v5424_v4  ;;  %v2394_v12 = vand.u32 2147483647, %v2393_v58  ;;  %v2526_v14 = vshrl.u32 %v2525_v48, 23  ;;  %vm2316_vm5 = vcmp.lt.s32.totalorder %v10047_v63, 0 }
 0x398   : > { %v5426_v47 = vsel %vm2094_vm2, nan, %v5425_v17  ;;  %v2268_v41 = vadd.s32 1, %v10422_v19  ;;  %v2401_v20 = vsel %vm2316_vm5, %v2400_v3, %v10339_v36  ;;  %vm2098_vm6 = vcmp.eq.s32.totalorder %v10356_v44, 0 }
 0x399   : > { %9005 = vrcp.f32 %v5426_v47  ;;  %v2397_v43 = vmul.f32 %v2396_v13, %v2394_v12  ;;  %v8308_v15 = vadd.s32 4294967169, %v2526_v14  ;;  %vm10447_vm7 = vcmp.le.f32.partialorder %v2314_v57, 0.7853982 }
 0x39a   : > { %v2265_v49 = vmul.u32 %v10375_v56, %v2249_v11  ;;  %vm2267_vm8 = vc.u32 %v10433_v28, %v10421_v39  ;;  %v2522_v50 = vand.u32 2147483647, %v10370_v60  ;;  %vm2101_vm9 = vcmp.eq.s32.totalorder %v10356_v44, 2 }
 0x39b   : > { %v2398_v6 = vxor.u32 2147483648, %v2397_v43  ;;  %v2269_v32 = vsel %vm2267_vm8, %v2268_v41, %v10422_v19  ;;  %v2532_v36 = vadd.s32 1, %v8308_v15  ;;  %v2403_v61 = vsel %vm10447_vm7, 0, %v2401_v20 }
 0x39c   : > { %v2270_v57 = vadd.s32 %v2269_v32, %v2265_v49  ;;  %v10461_v0 = vadd.f32 %v10031_v52, %v9968_v8  ;;  %v2100_v56 = vsel %vm2098_vm6, %v9002_v45, %v2099_v9  ;;  %v2103_v7 = vsel %vm2101_vm9, %v2102_v55, %v9004_v53 }
 0x39d   : > { %v2399_v42 = vsel %vm2316_vm5, %v2398_v6, %v2397_v43  ;;  %vm2533_vm10 = vcmp.gt.s32.totalorder %v2532_v36, 0  ;;  %vm2097_vm11 = vcmp.lt.s32.totalorder %v10356_v44, 2  ;;  %v2407_v38 = vadd.s32 3, %v2403_v61 }
 0x39e   : > { %v2402_v10 = vsel %vm10447_vm7, %v10047_v63, %v2399_v42  ;;  %v2271_v54 = vadd.s32 536870912, %v2270_v57  ;;  %v2534_v46 = vsel %vm2533_vm10, %v2532_v36, 0  ;;  %v2529_v8 = vand.u32 8388607, %v2522_v50 }
 0x39f   : > { %9007 = vcosq.f32 %v2402_v10  ;;  %v2536_v26 = vand.u32 31, %v2534_v46  ;;  %v2104_v45 = vsel %vm2097_vm11, %v2100_v56, %v2103_v7  ;;  %v5726_v59 = vand.u32 3, %v2403_v61 }
 0x3a0   : > { %9009 = vsinq.f32 %v2402_v10  ;;  %v10471_v24 = vshrl.u32 %v2271_v54, 30  ;;  %v2421_v44 = vand.u32 2139095040, %v10461_v0  ;;  %v2105_v18 = vsel %vm2094_vm2, nan, %v2104_v45 }
 0x3a1   : > { %v2537_v48 = vsub.s32 32, %v2536_v26  ;;  %v10477_v62 = vand.u32 3, %v2407_v38  ;;  %v2530_v37 = vor.u32 8388608, %v2529_v8  ;;  %v10481_v9 = vadd.f32 %v10031_v52, %v10060_v5 }
 0x3a2   : > { %v2273_v53 = vshll.u32 %v10471_v24, 30  ;;  %vm5728_vm12 = vcmp.eq.s32.totalorder %v5726_v59, 0  ;;  %vm5727_vm14 = vcmp.lt.s32.totalorder %v5726_v59, 2  ;;  %vm5731_vm15 = vcmp.eq.s32.totalorder %v5726_v59, 2 }
 0x3a3   : > { %v9006_v55 = vpop.eup %9005  ;;  %v2540_v4 = vshrl.u32 %v9166_v27, %v2537_v48  ;;  %v2543_v58 = vshrl.u32 %v9167_v29, %v2537_v48  ;;  %v2546_v1 = vshrl.u32 %v9168_v31, %v2537_v48  ;;  %v2549_v3 = vshrl.u32 %v9169_v33, %v2537_v48 }
 0x3a4   : > { %v8040_v21 = vmul.f32 %v9006_v55, %v2105_v18  ;;  %v10483_v19 = vsub.s32 %v2270_v57, %v2273_v53  ;;  %v2422_v34 = vshrl.u32 %v2421_v44, 23  ;;  %vm2406_vm0 = vweird.f32 %v10047_v63 }
 0x3a5   : > { %v2266_v52 = vadd.s32 %v10421_v39, %v10433_v28  ;;  %v2539_v11 = vshll.u32 %v9165_v23, %v2536_v26  ;;  %v2542_v2 = vshll.u32 %v9166_v27, %v2536_v26  ;;  %v10497_v17 = vshrl.u32 %v2534_v46, 5  ;;  %v10505_v39 = vpop.f32.mrb[32].mxu0 }
 0x3a6   : > { %8073 = vst.msk [vmem:[%s9829_s16 + $0x30] sm:$0xff] %vm8066_vm13, %v8040_v21  ;;  %v2276_v5 = vsub.s32 0, %v10483_v19  ;;  %v2545_v12 = vshll.u32 %v9167_v29, %v2536_v26  ;;  %v2548_v13 = vshll.u32 %v9168_v31, %v2536_v26  ;;  %v2418_v14 = vand.u32 2147483647, %v10461_v0 }
 0x3a7   : > { %v2541_v41 = vor.u32 %v2540_v4, %v2539_v11  ;;  %v2544_v43 = vor.u32 %v2543_v58, %v2542_v2  ;;  %v10503_v20 = vshll.u32 %v2530_v37, 8  ;;  %v2552_v49 = vshrl.u32 %v9170_v40, %v2537_v48 }
 0x3a8   : > { %v8297_v47 = vmin.u32 %v2276_v5, %v10483_v19  ;;  %v2547_v15 = vor.u32 %v2546_v1, %v2545_v12  ;;  %v2550_v35 = vor.u32 %v2549_v3, %v2548_v13  ;;  %v8304_v6 = vadd.s32 4294967169, %v2422_v34 }
 0x3a9   : > { %v9008_v28 = vpop.eup %9007  ;;  %vm2410_vm1 = vcmp.eq.s32.totalorder %v10477_v62, 0  ;;  %vm2413_vm2 = vcmp.eq.s32.totalorder %v10477_v62, 2  ;;  %v2296_v57 = vsub.s32 4, %v10471_v24  ;;  %v2551_v56 = vshll.u32 %v9169_v33, %v2536_v26 }
 0x3aa   : > { %v9010_v32 = vpop.eup %9009  ;;  %v2414_v36 = vxor.u32 2147483648, %v9008_v28  ;;  %v2278_v61 = vclz %v8297_v47  ;;  %v2538_v42 = vshrl.u32 %v9165_v23, %v2537_v48  ;;  %vm2554_vm3 = vcmp.lt.s32.totalorder %v10497_v17, 1 }
 0x3ab   : > { %v2411_v7 = vxor.u32 2147483648, %v9010_v32  ;;  %vm2556_vm4 = vcmp.lt.s32.totalorder %v10497_v17, 3  ;;  %vm2557_vm5 = vcmp.lt.s32.totalorder %v10497_v17, 4  ;;  %v2562_v46 = vsel %vm2554_vm3, %v2541_v41, %v2544_v43 }
 0x3ac   : > { %v5733_v10 = vsel %vm5731_vm15, %v2414_v36, %v9010_v32  ;;  %v8298_v54 = vadd.s32 4294967294, %v2278_v61  ;;  %v2553_v8 = vor.u32 %v2552_v49, %v2551_v56  ;;  %v2559_v26 = vsel %vm2557_vm5, %v2547_v15, 2102212464 }
 0x3ad   : > { %v5730_v38 = vsel %vm5728_vm12, %v9008_v28, %v2411_v7  ;;  %v2563_v45 = vsel %vm2557_vm5, %v2550_v35, 920167782  ;;  %vm2555_vm7 = vcmp.lt.s32.totalorder %v10497_v17, 2  ;;  %v2558_v18 = vsel %vm2554_vm3, %v2538_v42, %v2541_v41 }
 0x3ae   : > { %v5734_v48 = vsel %vm5727_vm14, %v5730_v38, %v5733_v10  ;;  %vm8299_vm6 = vcmp.lt.s32.totalorder %v8298_v54, 0  ;;  %v2564_v44 = vsel %vm2556_vm4, %v2547_v15, %v2563_v45  ;;  %v2560_v4 = vsel %vm2556_vm4, %v2544_v43, %v2559_v26 }
 0x3af   : > { %v5735_v53 = vsel %vm2406_vm0, nan, %v5734_v48  ;;  %v2281_v55 = vsel %vm8299_vm6, 0, %v8298_v54  ;;  %v2565_v37 = vsel %vm2555_vm7, %v2562_v46, %v2564_v44  ;;  %v2566_v58 = vsel %vm2554_vm3, %v2544_v43, %v2547_v15 }
 0x3b0   : > { %9011 = vrcp.f32 %v5735_v53  ;;  %v2282_v21 = vsub.s32 32, %v2281_v55  ;;  %v2286_v59 = vsub.s32 4294967266, %v2281_v55  ;;  %v2567_v1 = vsel %vm2557_vm5, %v2553_v8, 1326507024 }
 0x3b1   : > { %v10541_v3 = vmul.u32.u64.low %v10503_v20, %v2565_v37  ;;  %v10542_v34 = vmul.u32.u64.high %v10503_v20, %v2565_v37, %v10541_v3  ;;  %v2283_v5 = vshll.u32 %v10483_v19, %v2281_v55  ;;  %v2568_v12 = vsel %vm2556_vm4, %v2550_v35, %v2567_v1 }
 0x3b2   : > { %v2284_v11 = vshrl.u32 %v2266_v52, %v2282_v21  ;;  %v2287_v2 = vadd.s32 127, %v2286_v59  ;;  %v2412_v13 = vsel %vm2410_vm1, %v9008_v28, %v2411_v7  ;;  %v2415_v47 = vsel %vm2413_vm2, %v2414_v36, %v9010_v32  ;;  %v10588_v21 = vpop.f32.mrb[33].mxu0 }
 0x3b3   : > { %v2569_v41 = vsel %vm2555_vm7, %v2566_v58, %v2568_v12  ;;  %v2428_v43 = vadd.s32 1, %v8304_v6  ;;  %vm2409_vm8 = vcmp.lt.s32.totalorder %v10477_v62, 2  ;;  %v2561_v52 = vsel %vm2555_vm7, %v2558_v18, %v2560_v4 }
 0x3b4   : > { %v2285_v15 = vor.u32 %v2284_v11, %v2283_v5  ;;  %v2288_v49 = vshll.u32 %v2287_v2, 23  ;;  %v10555_v61 = vmul.u32.u64.low %v10503_v20, %v2569_v41  ;;  %v10556_v19 = vmul.u32.u64.high %v10503_v20, %v2569_v41, %v10555_v61 }
 0x3b5   : > { %v2580_v28 = vadd.s32 1, %v10542_v34  ;;  %vm2429_vm9 = vcmp.gt.s32.totalorder %v2428_v43, 0  ;;  %v2416_v35 = vsel %vm2409_vm8, %v2412_v13, %v2415_v47  ;;  %vm2212_vm10 = vcmp.lt.s32.totalorder %v10312_v16, 0 }
 0x3b6   : > { %v2289_v32 = vor.u32 4788187, %v2288_v49  ;;  %v2430_v36 = vsel %vm2429_vm9, %v2428_v43, 0  ;;  %vm10565_vm11 = vcmp.le.f32.partialorder %v2210_v30, 0.7853982  ;;  %v2297_v62 = vsel %vm2212_vm10, %v2296_v57, %v10471_v24 }
 0x3b7   : > { %v2425_v17 = vand.u32 8388607, %v2418_v14  ;;  %v2432_v56 = vand.u32 31, %v2430_v36  ;;  %v2292_v42 = vcvt.s32.f32 %v2285_v15  ;;  %v2577_v10 = vmul.u32 %v10503_v20, %v2561_v52 }
 0x3b8   : > { %v2290_v7 = vand.u32 2147483647, %v2289_v32  ;;  %vm2579_vm12 = vc.u32 %v10556_v19, %v10541_v3  ;;  %v2417_v30 = vsel %vm2406_vm0, nan, %v2416_v35  ;;  %v2733_v24 = vand.u32 2139095040, %v10481_v9 }
 0x3b9   : > { %v2581_v54 = vsel %vm2579_vm12, %v2580_v28, %v10542_v34  ;;  %v2433_v46 = vsub.s32 32, %v2432_v56  ;;  %v2435_v26 = vshll.u32 %v9165_v23, %v2432_v56  ;;  %v2438_v45 = vshll.u32 %v9166_v27, %v2432_v56 }
 0x3ba   : > { %v9012_v57 = vpop.eup %9011  ;;  %v2293_v38 = vmul.f32 %v2292_v42, %v2290_v7  ;;  %v2582_v8 = vadd.s32 %v2581_v54, %v2577_v10  ;;  %v2444_v63 = vshll.u32 %v9168_v31, %v2432_v56  ;;  %v10592_v59 = vshrl.u32 %v2430_v36, 5 }
 0x3bb   : > { %v8043_v20 = vmul.f32 %v9012_v57, %v2417_v30  ;;  %v2436_v48 = vshrl.u32 %v9166_v27, %v2433_v46  ;;  %v2439_v44 = vshrl.u32 %v9167_v29, %v2433_v46  ;;  %v2442_v18 = vshrl.u32 %v9168_v31, %v2433_v46 }
 0x3bc   : > { %v2294_v53 = vxor.u32 2147483648, %v2293_v38  ;;  %v2583_v55 = vadd.s32 536870912, %v2582_v8  ;;  %v2445_v37 = vshrl.u32 %v9169_v33, %v2433_v46  ;;  %v2441_v58 = vshll.u32 %v9167_v29, %v2432_v56 }
 0x3bd   : > { %8076 = vst.msk [vmem:[%s9829_s16 + $0x48] sm:$0xff] %vm8066_vm13, %v8043_v20  ;;  %v2437_v4 = vor.u32 %v2436_v48, %v2435_v26  ;;  %v2448_v1 = vshrl.u32 %v9170_v40, %v2433_v46  ;;  %v2440_v11 = vor.u32 %v2439_v44, %v2438_v45  ;;  %v2426_v13 = vor.u32 8388608, %v2425_v17  ;;  %v10635_v20 = vld [vmem:[%s12814_s6] ss:$0 sm:$0xff] }
 0x3be   : > { %v2295_v34 = vsel %vm2212_vm10, %v2294_v53, %v2293_v38  ;;  %v10598_v5 = vshrl.u32 %v2583_v55, 30  ;;  %v2446_v2 = vor.u32 %v2445_v37, %v2444_v63  ;;  %v2443_v47 = vor.u32 %v2442_v18, %v2441_v58 }
 0x3bf   : > { %v2298_v12 = vsel %vm10565_vm11, %v10312_v16, %v2295_v34  ;;  %v2447_v41 = vshll.u32 %v9169_v33, %v2432_v56  ;;  %v2299_v43 = vsel %vm10565_vm11, 0, %v2297_v62  ;;  %v2734_v49 = vshrl.u32 %v2733_v24, 23 }
 0x3c0   : > { %9013 = vcosq.f32 %v2298_v12  ;;  %v2585_v15 = vshll.u32 %v10598_v5, 30  ;;  %vm2450_vm14 = vcmp.lt.s32.totalorder %v10592_v59, 1  ;;  %vm2453_vm15 = vcmp.lt.s32.totalorder %v10592_v59, 4 }
 0x3c1   : > { %9015 = vsinq.f32 %v2298_v12  ;;  %v2449_v61 = vor.u32 %v2448_v1, %v2447_v41  ;;  %vm2452_vm0 = vcmp.lt.s32.totalorder %v10592_v59, 3  ;;  %v2458_v28 = vsel %vm2450_vm14, %v2437_v4, %v2440_v11 }
 0x3c2   : > { %v10609_v52 = vsub.s32 %v2582_v8, %v2585_v15  ;;  %v2459_v35 = vsel %vm2453_vm15, %v2446_v2, 920167782  ;;  %v2303_v36 = vadd.s32 3, %v2299_v43  ;;  %vm2451_vm1 = vcmp.lt.s32.totalorder %v10592_v59, 2 }
 0x3c3   : > { %v2460_v32 = vsel %vm2452_vm0, %v2443_v47, %v2459_v35  ;;  %v2463_v17 = vsel %vm2453_vm15, %v2449_v61, 1326507024  ;;  %v2466_v56 = vshll.u32 %v2426_v13, 8  ;;  %v8316_v7 = vadd.s32 4294967169, %v2734_v49 }
 0x3c4   : > { %v2588_v6 = vsub.s32 0, %v10609_v52  ;;  %v2461_v62 = vsel %vm2451_vm1, %v2458_v28, %v2460_v32  ;;  %v5623_v42 = vand.u32 3, %v2299_v43  ;;  %v2455_v30 = vsel %vm2453_vm15, %v2443_v47, 2102212464 }
 0x3c5   : > { %v2462_v54 = vsel %vm2450_vm14, %v2440_v11, %v2443_v47  ;;  %v2434_v24 = vshrl.u32 %v9165_v23, %v2433_v46  ;;  %v2464_v57 = vsel %vm2452_vm0, %v2446_v2, %v2463_v17  ;;  %vm2302_vm2 = vweird.f32 %v10312_v16 }
 0x3c6   : > { %v8309_v10 = vmin.u32 %v2588_v6, %v10609_v52  ;;  %v10626_v38 = vmul.u32.u64.low %v2466_v56, %v2461_v62  ;;  %v10627_v8 = vmul.u32.u64.high %v2466_v56, %v2461_v62, %v10626_v38  ;;  %v2730_v45 = vand.u32 2147483647, %v10481_v9 }
 0x3c7   : > { %v10639_v46 = vadd.f32 %v10635_v20, %v10164_v25  ;;  %v2454_v48 = vsel %vm2450_vm14, %v2434_v24, %v2437_v4  ;;  %v2456_v44 = vsel %vm2452_vm0, %v2440_v11, %v2455_v30  ;;  %v2465_v63 = vsel %vm2451_vm1, %v2462_v54, %v2464_v57 }
 0x3c8   : > { %v2590_v26 = vclz %v8309_v10  ;;  %v2740_v53 = vadd.s32 1, %v8316_v7  ;;  %v2304_v18 = vand.u32 3, %v2303_v36  ;;  %vm5624_vm3 = vcmp.lt.s32.totalorder %v5623_v42, 2 }
 0x3c9   : > { %v10647_v58 = vmul.u32.u64.low %v2466_v56, %v2465_v63  ;;  %v10648_v1 = vmul.u32.u64.high %v2466_v56, %v2465_v63, %v10647_v58  ;;  %vm5625_vm4 = vcmp.eq.s32.totalorder %v5623_v42, 0  ;;  %vm5628_vm6 = vcmp.eq.s32.totalorder %v5623_v42, 2 }
 0x3ca   : > { %v9014_v55 = vpop.eup %9013  ;;  %v8310_v37 = vadd.s32 4294967294, %v2590_v26  ;;  %vm2741_vm5 = vcmp.gt.s32.totalorder %v2740_v53, 0  ;;  %v2457_v4 = vsel %vm2451_vm1, %v2454_v48, %v2456_v44  ;;  %v2476_v13 = vadd.s32 1, %v10627_v8 }
 0x3cb   : > { %v9016_v34 = vpop.eup %9015  ;;  %v2310_v2 = vxor.u32 2147483648, %v9014_v55  ;;  %v2737_v47 = vand.u32 8388607, %v2730_v45  ;;  %v2578_v43 = vadd.s32 %v10541_v3, %v10556_v19  ;;  %v2742_v49 = vsel %vm2741_vm5, %v2740_v53, 0 }
 0x3cc   : > { %v2307_v25 = vxor.u32 2147483648, %v9016_v34  ;;  %vm8311_vm7 = vcmp.lt.s32.totalorder %v8310_v37, 0  ;;  %v2608_v35 = vsub.s32 4, %v10598_v5  ;;  %v2473_v59 = vmul.u32 %v2466_v56, %v2457_v4 }
 0x3cd   : > { %v5630_v11 = vsel %vm5628_vm6, %v2310_v2, %v9016_v34  ;;  %v2593_v12 = vsel %vm8311_vm7, 0, %v8310_v37  ;;  %vm2475_vm8 = vc.u32 %v10648_v1, %v10626_v38  ;;  %v2744_v19 = vand.u32 31, %v2742_v49 }
 0x3ce   : > { %v5627_v41 = vsel %vm5625_vm4, %v9014_v55, %v2307_v25  ;;  %v2594_v15 = vsub.s32 32, %v2593_v12  ;;  %v2598_v28 = vsub.s32 4294967266, %v2593_v12  ;;  %v2595_v36 = vshll.u32 %v10609_v52, %v2593_v12 }
 0x3cf   : > { %v5631_v61 = vsel %vm5624_vm3, %v5627_v41, %v5630_v11  ;;  %v2477_v3 = vsel %vm2475_vm8, %v2476_v13, %v10627_v8  ;;  %vm2305_vm9 = vcmp.lt.s32.totalorder %v2304_v18, 2  ;;  %vm2306_vm10 = vcmp.eq.s32.totalorder %v2304_v18, 0 }
 0x3d0   : > { %v5632_v32 = vsel %vm2302_vm2, nan, %v5631_v61  ;;  %v2596_v6 = vshrl.u32 %v2578_v43, %v2594_v15  ;;  %v2599_v62 = vadd.s32 127, %v2598_v28  ;;  %vm2524_vm11 = vcmp.lt.s32.totalorder %v10370_v60, 0 }
 0x3d1   : > { %9017 = vrcp.f32 %v5632_v32  ;;  %v2478_v17 = vadd.s32 %v2477_v3, %v2473_v59  ;;  %vm2309_vm12 = vcmp.eq.s32.totalorder %v2304_v18, 2  ;;  %v2745_v42 = vsub.s32 32, %v2744_v19 }
 0x3d2   : > { %v2597_v56 = vor.u32 %v2596_v6, %v2595_v36  ;;  %v2600_v7 = vshll.u32 %v2599_v62, 23  ;;  %v2308_v10 = vsel %vm2306_vm10, %v9014_v55, %v2307_v25  ;;  %v2311_v52 = vsel %vm2309_vm12, %v2310_v2, %v9016_v34 }
 0x3d3   : > { %v2479_v30 = vadd.s32 536870912, %v2478_v17  ;;  %v2738_v54 = vor.u32 8388608, %v2737_v47  ;;  %vm10668_vm14 = vcmp.le.f32.partialorder %v2522_v50, 0.7853982  ;;  %v2609_v8 = vsel %vm2524_vm11, %v2608_v35, %v10598_v5 }
 0x3d4   : > { %v2601_v57 = vor.u32 4788187, %v2600_v7  ;;  %v10675_v26 = vshrl.u32 %v2742_v49, 5  ;;  %v2748_v48 = vshrl.u32 %v9166_v27, %v2745_v42  ;;  %v2751_v63 = vshrl.u32 %v9167_v29, %v2745_v42 }
 0x3d5   : > { %v10678_v44 = vshrl.u32 %v2479_v30, 30  ;;  %v2754_v53 = vshrl.u32 %v9168_v31, %v2745_v42  ;;  %v2757_v50 = vshrl.u32 %v9169_v33, %v2745_v42  ;;  %v2312_v55 = vsel %vm2305_vm9, %v2308_v10, %v2311_v52 }
 0x3d6   : > { %v2602_v37 = vand.u32 2147483647, %v2601_v57  ;;  %v2604_v58 = vcvt.s32.f32 %v2597_v56  ;;  %v2756_v34 = vshll.u32 %v9168_v31, %v2744_v19  ;;  %v2747_v2 = vshll.u32 %v9165_v23, %v2744_v19 }
 0x3d7   : > { %v2481_v5 = vshll.u32 %v10678_v44, 30  ;;  %v2750_v25 = vshll.u32 %v9166_v27, %v2744_v19  ;;  %v2753_v4 = vshll.u32 %v9167_v29, %v2744_v19  ;;  %v2760_v13 = vshrl.u32 %v9170_v40, %v2745_v42 }
 0x3d8   : > { %v2605_v11 = vmul.f32 %v2604_v58, %v2602_v37  ;;  %v2758_v12 = vor.u32 %v2757_v50, %v2756_v34  ;;  %v10690_v47 = vshll.u32 %v2738_v54, 8  ;;  %v2749_v41 = vor.u32 %v2748_v48, %v2747_v2  ;;  %v10739_v58 = vpop.f32.mrb[34].mxu0 }
 0x3d9   : > { %v10692_v18 = vsub.s32 %v2478_v17, %v2481_v5  ;;  %v2752_v43 = vor.u32 %v2751_v63, %v2750_v25  ;;  %v2755_v15 = vor.u32 %v2754_v53, %v2753_v4  ;;  %v2313_v61 = vsel %vm2302_vm2, nan, %v2312_v55 }
 0x3da   : > { %v2606_v28 = vxor.u32 2147483648, %v2605_v11  ;;  %v2759_v35 = vshll.u32 %v9169_v33, %v2744_v19  ;;  %v2629_v59 = vand.u32 2139095040, %v10639_v46  ;;  %vm2762_vm15 = vcmp.lt.s32.totalorder %v10675_v26, 1 }
 0x3db   : > { %v9018_v49 = vpop.eup %9017  ;;  %v2484_v36 = vsub.s32 0, %v10692_v18  ;;  %vm2765_vm0 = vcmp.lt.s32.totalorder %v10675_v26, 4  ;;  %vm2420_vm1 = vcmp.lt.s32.totalorder %v10461_v0, 0  ;;  %vm2764_vm2 = vcmp.lt.s32.totalorder %v10675_v26, 3 }
 0x3dc   : > { %v8042_v32 = vmul.f32 %v9018_v49, %v2313_v61  ;;  %v2607_v6 = vsel %vm2524_vm11, %v2606_v28, %v2605_v11  ;;  %v2761_v62 = vor.u32 %v2760_v13, %v2759_v35  ;;  %v2771_v16 = vsel %vm2765_vm0, %v2758_v12, 920167782 }
 0x3dd   : > { %v2610_v3 = vsel %vm10668_vm14, %v10370_v60, %v2607_v6  ;;  %v8305_v19 = vmin.u32 %v2484_v36, %v10692_v18  ;;  %v2767_v17 = vsel %vm2765_vm0, %v2755_v15, 2102212464  ;;  %v2770_v56 = vsel %vm2762_vm15, %v2749_v41, %v2752_v43 }
 0x3de   : > { %8075 = vst.msk [vmem:[%s9829_s16 + $0x40] sm:$0xff] %vm8066_vm13, %v8042_v32  ;;  %9019 = vcosq.f32 %v2610_v3  ;;  %v2746_v7 = vshrl.u32 %v9165_v23, %v2745_v42  ;;  %vm2763_vm3 = vcmp.lt.s32.totalorder %v10675_v26, 2  ;;  %v2772_v10 = vsel %vm2764_vm2, %v2755_v15, %v2771_v16 }
 0x3df   : > { %9021 = vsinq.f32 %v2610_v3  ;;  %v2486_v52 = vclz %v8305_v19  ;;  %v2504_v30 = vsub.s32 4, %v10678_v44  ;;  %v2774_v54 = vsel %vm2762_vm15, %v2752_v43, %v2755_v15 }
 0x3e0   : > { %v2766_v57 = vsel %vm2762_vm15, %v2746_v7, %v2749_v41  ;;  %v2768_v48 = vsel %vm2764_vm2, %v2752_v43, %v2767_v17  ;;  %v2773_v42 = vsel %vm2763_vm3, %v2770_v56, %v2772_v10  ;;  %v2775_v63 = vsel %vm2765_vm0, %v2761_v62, 1326507024 }
 0x3e1   : > { %v8306_v53 = vadd.s32 4294967294, %v2486_v52  ;;  %v2776_v50 = vsel %vm2764_vm2, %v2758_v12, %v2775_v63  ;;  %v10735_v55 = vmul.u32.u64.low %v10690_v47, %v2773_v42  ;;  %v10736_v37 = vmul.u32.u64.high %v10690_v47, %v2773_v42, %v10735_v55 }
 0x3e2   : > { %v2611_v34 = vsel %vm10668_vm14, 0, %v2609_v8  ;;  %vm10745_vm4 = vcmp.le.f32.partialorder %v2418_v14, 0.7853982  ;;  %v2777_v2 = vsel %vm2763_vm3, %v2774_v54, %v2776_v50  ;;  %v2630_v25 = vshrl.u32 %v2629_v59, 23 }
 0x3e3   : > { %vm8307_vm5 = vcmp.lt.s32.totalorder %v8306_v53, 0  ;;  %v2769_v4 = vsel %vm2763_vm3, %v2766_v57, %v2768_v48  ;;  %v10754_v11 = vmul.u32.u64.low %v10690_v47, %v2777_v2  ;;  %v10755_v12 = vmul.u32.u64.high %v10690_v47, %v2777_v2, %v10754_v11 }
 0x3e4   : > { %v2474_v24 = vadd.s32 %v10626_v38, %v10648_v1  ;;  %v2489_v8 = vsel %vm8307_vm5, 0, %v8306_v53  ;;  %v2626_v14 = vand.u32 2147483647, %v10639_v46  ;;  %v8312_v13 = vadd.s32 4294967169, %v2630_v25 }
 0x3e5   : > { %vm2614_vm6 = vweird.f32 %v10370_v60  ;;  %v2490_v41 = vsub.s32 32, %v2489_v8  ;;  %v2494_v43 = vsub.s32 4294967266, %v2489_v8  ;;  %v2505_v26 = vsel %vm2420_vm1, %v2504_v30, %v10678_v44 }
 0x3e6   : > { %v2788_v15 = vadd.s32 1, %v10736_v37  ;;  %v2615_v49 = vadd.s32 3, %v2611_v34  ;;  %v5932_v61 = vand.u32 3, %v2611_v34  ;;  %v2785_v28 = vmul.u32 %v10690_v47, %v2769_v4 }
 0x3e7   : > { %v2636_v35 = vadd.s32 1, %v8312_v13  ;;  %v2491_v38 = vshll.u32 %v10692_v18, %v2489_v8  ;;  %v2492_v1 = vshrl.u32 %v2474_v24, %v2490_v41  ;;  %v2495_v59 = vadd.s32 127, %v2494_v43 }
 0x3e8   : > { %vm2787_vm7 = vc.u32 %v10755_v12, %v10735_v55  ;;  %v9020_v32 = vpop.eup %9019  ;;  %v2507_v36 = vsel %vm10745_vm4, 0, %v2505_v26  ;;  %v2633_v6 = vand.u32 8388607, %v2626_v14  ;;  %v2616_v19 = vand.u32 3, %v2615_v49 }
 0x3e9   : > { %v2789_v44 = vsel %vm2787_vm7, %v2788_v15, %v10736_v37  ;;  %vm2637_vm8 = vcmp.gt.s32.totalorder %v2636_v35, 0  ;;  %v9022_v62 = vpop.eup %9021  ;;  %v2622_v47 = vxor.u32 2147483648, %v9020_v32  ;;  %v2493_v16 = vor.u32 %v2492_v1, %v2491_v38 }
 0x3ea   : > { %v2496_v3 = vshll.u32 %v2495_v59, 23  ;;  %v2790_v18 = vadd.s32 %v2789_v44, %v2785_v28  ;;  %v2619_v17 = vxor.u32 2147483648, %v9022_v62  ;;  %vm5937_vm9 = vcmp.eq.s32.totalorder %v5932_v61, 2 }
 0x3eb   : > { %v2638_v56 = vsel %vm2637_vm8, %v2636_v35, 0  ;;  %vm5933_vm10 = vcmp.lt.s32.totalorder %v5932_v61, 2  ;;  %vm5934_vm11 = vcmp.eq.s32.totalorder %v5932_v61, 0  ;;  %v5939_v7 = vsel %vm5937_vm9, %v2622_v47, %v9022_v62 }
 0x3ec   : > { %v2497_v10 = vor.u32 4788187, %v2496_v3  ;;  %v5936_v52 = vsel %vm5934_vm11, %v9020_v32, %v2619_v17  ;;  %v2511_v30 = vadd.s32 3, %v2507_v36  ;;  %v2791_v54 = vadd.s32 536870912, %v2790_v18 }
 0x3ed   : > { %v2634_v57 = vor.u32 8388608, %v2633_v6  ;;  %v5940_v48 = vsel %vm5933_vm10, %v5936_v52, %v5939_v7  ;;  %v2500_v63 = vcvt.s32.f32 %v2493_v16  ;;  %v2640_v53 = vand.u32 31, %v2638_v56 }
 0x3ee   : > { %v2498_v42 = vand.u32 2147483647, %v2497_v10  ;;  %vm2618_vm12 = vcmp.eq.s32.totalorder %v2616_v19, 0  ;;  %v5941_v50 = vsel %vm2614_vm6, nan, %v5940_v48  ;;  %v10776_v37 = vshrl.u32 %v2791_v54, 30 }
 0x3ef   : > { %v10780_v34 = vadd.f32 %v10635_v20, %v10280_v22  ;;  %vm2621_vm14 = vcmp.eq.s32.totalorder %v2616_v19, 2  ;;  %9023 = vrcp.f32 %v5941_v50  ;;  %v2641_v25 = vsub.s32 32, %v2640_v53 }
 0x3f0   : > { %v2501_v2 = vmul.f32 %v2500_v63, %v2498_v42  ;;  %vm2617_vm15 = vcmp.lt.s32.totalorder %v2616_v19, 2  ;;  %v2620_v4 = vsel %vm2618_vm12, %v9020_v32, %v2619_v17  ;;  %v2623_v11 = vsel %vm2621_vm14, %v2622_v47, %v9022_v62 }
 0x3f1   : > { %v2793_v24 = vshll.u32 %v10776_v37, 30  ;;  %v10783_v13 = vand.u32 3, %v2511_v30  ;;  %v10785_v41 = vand.u32 3, %v2507_v36  ;;  %v10787_v43 = vshll.u32 %v2634_v57, 8 }
 0x3f2   : > { %v2502_v8 = vxor.u32 2147483648, %v2501_v2  ;;  %v2644_v22 = vshrl.u32 %v9166_v27, %v2641_v25  ;;  %v2647_v15 = vshrl.u32 %v9167_v29, %v2641_v25  ;;  %v2941_v49 = vand.u32 2139095040, %v10780_v34 }
 0x3f3   : > { %v10789_v26 = vsub.s32 %v2790_v18, %v2793_v24  ;;  %v2624_v61 = vsel %vm2617_vm15, %v2620_v4, %v2623_v11  ;;  %v10796_v35 = vshrl.u32 %v2638_v56, 5  ;;  %v2650_v38 = vshrl.u32 %v9168_v31, %v2641_v25  ;;  %v10811_v56 = vpop.f32.mrb[35].mxu0 }
 0x3f4   : > { %v2503_v28 = vsel %vm2420_vm1, %v2502_v8, %v2501_v2  ;;  %v2643_v32 = vshll.u32 %v9165_v23, %v2640_v53  ;;  %v2646_v36 = vshll.u32 %v9166_v27, %v2640_v53  ;;  %v2649_v44 = vshll.u32 %v9167_v29, %v2640_v53 }
 0x3f5   : > { %v2506_v1 = vsel %vm10745_vm4, %v10461_v0, %v2503_v28  ;;  %v2796_v59 = vsub.s32 0, %v10789_v26  ;;  %v2652_v6 = vshll.u32 %v9168_v31, %v2640_v53  ;;  %v2653_v62 = vshrl.u32 %v9169_v33, %v2641_v25 }
 0x3f6   : > { %9025 = vcosq.f32 %v2506_v1  ;;  %v2645_v16 = vor.u32 %v2644_v22, %v2643_v32  ;;  %v2648_v3 = vor.u32 %v2647_v15, %v2646_v36  ;;  %v2651_v5 = vor.u32 %v2650_v38, %v2649_v44 }
 0x3f7   : > { %9027 = vsinq.f32 %v2506_v1  ;;  %v8317_v47 = vmin.u32 %v2796_v59, %v10789_v26  ;;  %v2654_v18 = vor.u32 %v2653_v62, %v2652_v6  ;;  %v2655_v19 = vshll.u32 %v9169_v33, %v2640_v53 }
 0x3f8   : > { %v2656_v17 = vshrl.u32 %v9170_v40, %v2641_v25  ;;  %v2625_v7 = vsel %vm2614_vm6, nan, %v2624_v61  ;;  %v2786_v10 = vadd.s32 %v10735_v55, %v10755_v12  ;;  %v2942_v30 = vshrl.u32 %v2941_v49, 23 }
 0x3f9   : > { %v2798_v52 = vclz %v8317_v47  ;;  %v9024_v54 = vpop.eup %9023  ;;  %v2816_v57 = vsub.s32 4, %v10776_v37  ;;  %v2642_v48 = vshrl.u32 %v9165_v23, %v2641_v25  ;;  %vm2658_vm0 = vcmp.lt.s32.totalorder %v10796_v35, 1 }
 0x3fa   : > { %v2657_v42 = vor.u32 %v2656_v17, %v2655_v19  ;;  %v8045_v63 = vmul.f32 %v9024_v54, %v2625_v7  ;;  %vm5831_vm1 = vcmp.eq.s32.totalorder %v10785_v41, 0  ;;  %vm2732_vm2 = vcmp.lt.s32.totalorder %v10481_v9, 0 }
 0x3fb   : > { %v8318_v60 = vadd.s32 4294967294, %v2798_v52  ;;  %vm2660_vm3 = vcmp.lt.s32.totalorder %v10796_v35, 3  ;;  %vm2661_vm4 = vcmp.lt.s32.totalorder %v10796_v35, 4  ;;  %vm5830_vm5 = vcmp.lt.s32.totalorder %v10785_v41, 2 }
 0x3fc   : > { %v2663_v55 = vsel %vm2661_vm4, %v2651_v5, 2102212464  ;;  %v2666_v12 = vsel %vm2658_vm0, %v2645_v16, %v2648_v3  ;;  %v2667_v53 = vsel %vm2661_vm4, %v2654_v18, 920167782  ;;  %v2670_v50 = vsel %vm2658_vm0, %v2648_v3, %v2651_v5  ;;  %8078 = vst.msk [vmem:[%s9829_s16 + $0x58] sm:$0xff] %vm8066_vm13, %v8045_v63 }
 0x3fd   : > { %vm2510_vm6 = vweird.f32 %v10461_v0  ;;  %vm8319_vm7 = vcmp.lt.s32.totalorder %v8318_v60, 0  ;;  %vm2659_vm8 = vcmp.lt.s32.totalorder %v10796_v35, 2  ;;  %v2668_v2 = vsel %vm2660_vm3, %v2651_v5, %v2667_v53 }
 0x3fe   : > { %v2671_v25 = vsel %vm2661_vm4, %v2657_v42, 1326507024  ;;  %v2801_v4 = vsel %vm8319_vm7, 0, %v8318_v60  ;;  %v2662_v11 = vsel %vm2658_vm0, %v2642_v48, %v2645_v16  ;;  %v2669_v24 = vsel %vm2659_vm8, %v2666_v12, %v2668_v2 }
 0x3ff   : > { %v2672_v8 = vsel %vm2660_vm3, %v2654_v18, %v2671_v25  ;;  %v2802_v22 = vsub.s32 32, %v2801_v4  ;;  %v2806_v15 = vsub.s32 4294967266, %v2801_v4  ;;  %v2664_v49 = vsel %vm2660_vm3, %v2648_v3, %v2663_v55 }
 0x400   : > { %v2673_v61 = vsel %vm2659_vm8, %v2670_v50, %v2672_v8  ;;  %v9026_v28 = vpop.eup %9025  ;;  %vm10847_vm9 = vcmp.le.f32.partialorder %v2730_v45, 0.7853982  ;;  %v10856_v32 = vmul.u32.u64.low %v10787_v43, %v2669_v24  ;;  %v10857_v36 = vmul.u32.u64.high %v10787_v43, %v2669_v24, %v10856_v32 }
 0x401   : > { %v10852_v1 = vmul.u32.u64.low %v10787_v43, %v2673_v61  ;;  %v10853_v59 = vmul.u32.u64.high %v10787_v43, %v2673_v61, %v10852_v1  ;;  %v9028_v44 = vpop.eup %9027  ;;  %v2518_v6 = vxor.u32 2147483648, %v9026_v28  ;;  %v2803_v62 = vshll.u32 %v10789_v26, %v2801_v4 }
 0x402   : > { %v2804_v47 = vshrl.u32 %v2786_v10, %v2802_v22  ;;  %v2807_v16 = vadd.s32 127, %v2806_v15  ;;  %v2515_v3 = vxor.u32 2147483648, %v9028_v44  ;;  %vm5834_vm10 = vcmp.eq.s32.totalorder %v10785_v41, 2 }
 0x403   : > { %v2665_v45 = vsel %vm2659_vm8, %v2662_v11, %v2664_v49  ;;  %v8324_v5 = vadd.s32 4294967169, %v2942_v30  ;;  %vm2514_vm11 = vcmp.eq.s32.totalorder %v10783_v13, 0  ;;  %v5836_v18 = vsel %vm5834_vm10, %v2518_v6, %v9028_v44 }
 0x404   : > { %v2805_v19 = vor.u32 %v2804_v47, %v2803_v62  ;;  %v2808_v17 = vshll.u32 %v2807_v16, 23  ;;  %vm2517_vm12 = vcmp.eq.s32.totalorder %v10783_v13, 2  ;;  %v5833_v7 = vsel %vm5831_vm1, %v9026_v28, %v2515_v3  ;;  %v10911_v16 = vpop.f32.mrb[36].mxu0 }
 0x405   : > { %v2817_v26 = vsel %vm2732_vm2, %v2816_v57, %v10776_v37  ;;  %v2938_v10 = vand.u32 2147483647, %v10780_v34  ;;  %v5837_v35 = vsel %vm5830_vm5, %v5833_v7, %v5836_v18  ;;  %v2681_v30 = vmul.u32 %v10787_v43, %v2665_v45 }
 0x406   : > { %v2809_v52 = vor.u32 4788187, %v2808_v17  ;;  %vm2683_vm14 = vc.u32 %v10853_v59, %v10856_v32  ;;  %v2519_v54 = vsel %vm2517_vm12, %v2518_v6, %v9028_v44  ;;  %v5838_v48 = vsel %vm2510_vm6, nan, %v5837_v35 }
 0x407   : > { %v2684_v42 = vadd.s32 1, %v10857_v36  ;;  %v2948_v63 = vadd.s32 1, %v8324_v5  ;;  %v2516_v37 = vsel %vm2514_vm11, %v9026_v28, %v2515_v3  ;;  %9029 = vrcp.f32 %v5838_v48 }
 0x408   : > { %v2810_v57 = vand.u32 2147483647, %v2809_v52  ;;  %v2812_v41 = vcvt.s32.f32 %v2805_v19  ;;  %vm2513_vm15 = vcmp.lt.s32.totalorder %v10783_v13, 2  ;;  %v2945_v60 = vand.u32 8388607, %v2938_v10 }
 0x409   : > { %v2685_v43 = vsel %vm2683_vm14, %v2684_v42, %v10857_v36  ;;  %vm2949_vm0 = vcmp.gt.s32.totalorder %v2948_v63, 0  ;;  %v2819_v12 = vsel %vm10847_vm9, 0, %v2817_v26  ;;  %v2520_v2 = vsel %vm2513_vm15, %v2516_v37, %v2519_v54 }
 0x40a   : > { %v2813_v55 = vmul.f32 %v2812_v41, %v2810_v57  ;;  %v2686_v53 = vadd.s32 %v2685_v43, %v2681_v30  ;;  %v2950_v50 = vsel %vm2949_vm0, %v2948_v63, 0  ;;  %v10890_v24 = vadd.f32 %v10635_v20, %v10360_v51 }
 0x40b   : > { %v2952_v25 = vand.u32 31, %v2950_v50  ;;  %v2823_v13 = vadd.s32 3, %v2819_v12  ;;  %v10892_v8 = vand.u32 3, %v2819_v12  ;;  %v2946_v22 = vor.u32 8388608, %v2945_v60 }
 0x40c   : > { %v2814_v4 = vxor.u32 2147483648, %v2813_v55  ;;  %v2687_v11 = vadd.s32 536870912, %v2686_v53  ;;  %v2521_v49 = vsel %vm2510_vm6, nan, %v2520_v2  ;;  %v10900_v1 = vshrl.u32 %v2950_v50, 5 }
 0x40d   : > { %v2953_v15 = vsub.s32 32, %v2952_v25  ;;  %v2955_v36 = vshll.u32 %v9165_v23, %v2952_v25  ;;  %v2958_v62 = vshll.u32 %v9166_v27, %v2952_v25  ;;  %v2961_v38 = vshll.u32 %v9167_v29, %v2952_v25 }
 0x40e   : > { %v2815_v61 = vsel %vm2732_vm2, %v2814_v4, %v2813_v55  ;;  %v10898_v28 = vshrl.u32 %v2687_v11, 30  ;;  %v2964_v3 = vshll.u32 %v9168_v31, %v2952_v25  ;;  %v2967_v17 = vshll.u32 %v9169_v33, %v2952_v25 }
 0x40f   : > { %v2818_v51 = vsel %vm10847_vm9, %v10481_v9, %v2815_v61  ;;  %v2956_v44 = vshrl.u32 %v9166_v27, %v2953_v15  ;;  %v2959_v6 = vshrl.u32 %v9167_v29, %v2953_v15  ;;  %v2962_v47 = vshrl.u32 %v9168_v31, %v2953_v15 }
 0x410   : > { %9031 = vcosq.f32 %v2818_v51  ;;  %v2689_v0 = vshll.u32 %v10898_v28, 30  ;;  %v2965_v45 = vshrl.u32 %v9169_v33, %v2953_v15  ;;  %v2968_v7 = vshrl.u32 %v9170_v40, %v2953_v15 }
 0x411   : > { %9033 = vsinq.f32 %v2818_v51  ;;  %v9030_v5 = vpop.eup %9029  ;;  %v2957_v19 = vor.u32 %v2956_v44, %v2955_v36  ;;  %v2960_v35 = vor.u32 %v2959_v6, %v2958_v62  ;;  %v2963_v52 = vor.u32 %v2962_v47, %v2961_v38 }
 0x412   : > { %v10916_v18 = vsub.s32 %v2686_v53, %v2689_v0  ;;  %v8044_v26 = vmul.f32 %v9030_v5, %v2521_v49  ;;  %v2966_v30 = vor.u32 %v2965_v45, %v2964_v3  ;;  %v10920_v54 = vand.u32 3, %v2823_v13 }
 0x413   : > { %vm6140_vm1 = vcmp.eq.s32.totalorder %v10892_v8, 0  ;;  %vm6143_vm2 = vcmp.eq.s32.totalorder %v10892_v8, 2  ;;  %v2969_v42 = vor.u32 %v2968_v7, %v2967_v17  ;;  %v2986_v63 = vshll.u32 %v2946_v22, 8 }
 0x414   : > { %v2692_v48 = vsub.s32 0, %v10916_v18  ;;  %8077 = vst.msk [vmem:[%s9829_s16 + $0x50] sm:$0xff] %vm8066_vm13, %v8044_v26  ;;  %vm2628_vm3 = vcmp.lt.s32.totalorder %v10639_v46, 0  ;;  %vm2970_vm4 = vcmp.lt.s32.totalorder %v10900_v1, 1  ;;  %vm2973_vm5 = vcmp.lt.s32.totalorder %v10900_v1, 4 }
 0x415   : > { %v2837_v57 = vand.u32 2139095040, %v10890_v24  ;;  %vm2822_vm6 = vweird.f32 %v10481_v9  ;;  %v2954_v41 = vshrl.u32 %v9165_v23, %v2953_v15  ;;  %v2975_v43 = vsel %vm2973_vm5, %v2963_v52, 2102212464 }
 0x416   : > { %v8313_v37 = vmin.u32 %v2692_v48, %v10916_v18  ;;  %v2978_v60 = vsel %vm2970_vm4, %v2957_v19, %v2960_v35  ;;  %v2979_v55 = vsel %vm2973_vm5, %v2966_v30, 920167782  ;;  %v2712_v53 = vsub.s32 4, %v10898_v28 }
 0x417   : > { %vm2971_vm7 = vcmp.lt.s32.totalorder %v10900_v1, 2  ;;  %vm2972_vm8 = vcmp.lt.s32.totalorder %v10900_v1, 3  ;;  %v2974_v50 = vsel %vm2970_vm4, %v2954_v41, %v2957_v19  ;;  %v2982_v25 = vsel %vm2970_vm4, %v2960_v35, %v2963_v52 }
 0x418   : > { %v2694_v12 = vclz %v8313_v37  ;;  %v2980_v2 = vsel %vm2972_vm8, %v2963_v52, %v2979_v55  ;;  %v2983_v4 = vsel %vm2973_vm5, %v2969_v42, 1326507024  ;;  %v2976_v22 = vsel %vm2972_vm8, %v2960_v35, %v2975_v43 }
 0x419   : > { %v2981_v15 = vsel %vm2971_vm7, %v2978_v60, %v2980_v2  ;;  %v2984_v49 = vsel %vm2972_vm8, %v2966_v30, %v2983_v4  ;;  %v2977_v45 = vsel %vm2971_vm7, %v2974_v50, %v2976_v22  ;;  %v2838_v5 = vshrl.u32 %v2837_v57, 23 }
 0x41a   : > { %v9032_v11 = vpop.eup %9031  ;;  %v8314_v13 = vadd.s32 4294967294, %v2694_v12  ;;  %v2985_v36 = vsel %vm2971_vm7, %v2982_v25, %v2984_v49  ;;  %v10941_v44 = vmul.u32.u64.low %v2986_v63, %v2981_v15  ;;  %v10942_v6 = vmul.u32.u64.high %v2986_v63, %v2981_v15, %v10941_v44 }
 0x41b   : > { %v9034_v61 = vpop.eup %9033  ;;  %v2830_v51 = vxor.u32 2147483648, %v9032_v11  ;;  %v10945_v62 = vmul.u32.u64.low %v2986_v63, %v2985_v36  ;;  %v10946_v47 = vmul.u32.u64.high %v2986_v63, %v2985_v36, %v10945_v62  ;;  %vm6139_vm10 = vcmp.lt.s32.totalorder %v10892_v8, 2 }
 0x41c   : > { %v2827_v0 = vxor.u32 2147483648, %v9034_v61  ;;  %vm8315_vm9 = vcmp.lt.s32.totalorder %v8314_v13, 0  ;;  %v2682_v17 = vadd.s32 %v10856_v32, %v10853_v59  ;;  %v2713_v52 = vsel %vm2628_vm3, %v2712_v53, %v10898_v28 }
 0x41d   : > { %v6145_v38 = vsel %vm6143_vm2, %v2830_v51, %v9034_v61  ;;  %v2697_v3 = vsel %vm8315_vm9, 0, %v8314_v13  ;;  %v2996_v30 = vadd.s32 1, %v10942_v6  ;;  %v2993_v8 = vmul.u32 %v2986_v63, %v2977_v45 }
 0x41e   : > { %v6142_v19 = vsel %vm6140_vm1, %v9032_v11, %v2827_v0  ;;  %v2698_v7 = vsub.s32 32, %v2697_v3  ;;  %v2702_v35 = vsub.s32 4294967266, %v2697_v3  ;;  %v2699_v48 = vshll.u32 %v10916_v18, %v2697_v3 }
 0x41f   : > { %v6146_v26 = vsel %vm6139_vm10, %v6142_v19, %v6145_v38  ;;  %vm2995_vm11 = vc.u32 %v10946_v47, %v10941_v44  ;;  %v8320_v59 = vadd.s32 4294967169, %v2838_v5  ;;  %vm2829_vm12 = vcmp.eq.s32.totalorder %v10920_v54, 2 }
 0x420   : > { %v6147_v1 = vsel %vm2822_vm6, nan, %v6146_v26  ;;  %v2700_v42 = vshrl.u32 %v2682_v17, %v2698_v7  ;;  %v2703_v37 = vadd.s32 127, %v2702_v35  ;;  %vm10969_vm14 = vcmp.le.f32.partialorder %v2626_v14, 0.7853982  ;;  %v10999_v17 = vpop.f32.mrb[37].mxu0 }
 0x421   : > { %9035 = vrcp.f32 %v6147_v1  ;;  %v2997_v28 = vsel %vm2995_vm11, %v2996_v30, %v10942_v6  ;;  %v2834_v18 = vand.u32 2147483647, %v10890_v24  ;;  %v2844_v43 = vadd.s32 1, %v8320_v59 }
 0x422   : > { %v2701_v57 = vor.u32 %v2700_v42, %v2699_v48  ;;  %v2704_v63 = vshll.u32 %v2703_v37, 23  ;;  %v2998_v41 = vadd.s32 %v2997_v28, %v2993_v8  ;;  %vm2826_vm15 = vcmp.eq.s32.totalorder %v10920_v54, 0 }
 0x423   : > { %v2831_v60 = vsel %vm2829_vm12, %v2830_v51, %v9034_v61  ;;  %v2715_v55 = vsel %vm10969_vm14, 0, %v2713_v52  ;;  %v2828_v12 = vsel %vm2826_vm15, %v9032_v11, %v2827_v0  ;;  %vm2845_vm0 = vcmp.gt.s32.totalorder %v2844_v43, 0 }
 0x424   : > { %v2705_v53 = vor.u32 4788187, %v2704_v63  ;;  %v2999_v14 = vadd.s32 536870912, %v2998_v41  ;;  %vm2825_vm1 = vcmp.lt.s32.totalorder %v10920_v54, 2  ;;  %v2841_v50 = vand.u32 8388607, %v2834_v18 }
 0x425   : > { %v2846_v2 = vsel %vm2845_vm0, %v2844_v43, 0  ;;  %v10983_v25 = vadd.f32 %v10635_v20, %v10505_v39  ;;  %v2708_v13 = vcvt.s32.f32 %v2701_v57  ;;  %v2832_v49 = vsel %vm2825_vm1, %v2828_v12, %v2831_v60 }
 0x426   : > { %v2706_v4 = vand.u32 2147483647, %v2705_v53  ;;  %v10985_v22 = vshrl.u32 %v2999_v14, 30  ;;  %v2848_v15 = vand.u32 31, %v2846_v2  ;;  %v2719_v11 = vadd.s32 3, %v2715_v55 }
 0x427   : > { %v3149_v54 = vand.u32 2139095040, %v10983_v25  ;;  %v2833_v0 = vsel %vm2822_vm6, nan, %v2832_v49  ;;  %v2842_v38 = vor.u32 8388608, %v2841_v50  ;;  %v10995_v5 = vand.u32 3, %v2715_v55 }
 0x428   : > { %v2709_v61 = vmul.f32 %v2708_v13, %v2706_v4  ;;  %v3001_v51 = vshll.u32 %v10985_v22, 30  ;;  %v2849_v36 = vsub.s32 32, %v2848_v15  ;;  %v10993_v45 = vand.u32 3, %v2719_v11 }
 0x429   : > { %v2994_v19 = vadd.s32 %v10941_v44, %v10946_v47  ;;  %v3146_v44 = vand.u32 2147483647, %v10983_v25  ;;  %v3150_v47 = vshrl.u32 %v3149_v54, 23  ;;  %v2851_v48 = vshll.u32 %v9165_v23, %v2848_v15 }
 0x42a   : > { %v2710_v39 = vxor.u32 2147483648, %v2709_v61  ;;  %v10991_v62 = vsub.s32 %v2998_v41, %v3001_v51  ;;  %v2852_v26 = vshrl.u32 %v9166_v27, %v2849_v36  ;;  %v2855_v35 = vshrl.u32 %v9167_v29, %v2849_v36 }
 0x42b   : > { %v9036_v6 = vpop.eup %9035  ;;  %v2858_v30 = vshrl.u32 %v9168_v31, %v2849_v36  ;;  %v2854_v42 = vshll.u32 %v9166_v27, %v2848_v15  ;;  %v11016_v8 = vshrl.u32 %v2846_v2, 5  ;;  %v2857_v37 = vshll.u32 %v9167_v29, %v2848_v15 }
 0x42c   : > { %v8047_v3 = vmul.f32 %v9036_v6, %v2833_v0  ;;  %v2711_v7 = vsel %vm2628_vm3, %v2710_v39, %v2709_v61  ;;  %v3004_v9 = vsub.s32 0, %v10991_v62  ;;  %v11019_v59 = vshll.u32 %v2842_v38, 8 }
 0x42d   : > { %v2714_v52 = vsel %vm10969_vm14, %v10639_v46, %v2711_v7  ;;  %v2853_v28 = vor.u32 %v2852_v26, %v2851_v48  ;;  %v2856_v57 = vor.u32 %v2855_v35, %v2854_v42  ;;  %v2860_v63 = vshll.u32 %v9168_v31, %v2848_v15 }
 0x42e   : > { %8080 = vst.msk [vmem:[%s9829_s16 + $0x68] sm:$0xff] %vm8066_vm13, %v8047_v3  ;;  %9037 = vcosq.f32 %v2714_v52  ;;  %v8325_v1 = vmin.u32 %v3004_v9, %v10991_v62  ;;  %v2859_v41 = vor.u32 %v2858_v30, %v2857_v37  ;;  %v2861_v43 = vshrl.u32 %v9169_v33, %v2849_v36 }
 0x42f   : > { %9039 = vsinq.f32 %v2714_v52  ;;  %v2863_v60 = vshll.u32 %v9169_v33, %v2848_v15  ;;  %v2864_v55 = vshrl.u32 %v9170_v40, %v2849_v36  ;;  %vm6040_vm2 = vcmp.eq.s32.totalorder %v10995_v5, 2 }
 0x430   : > { %v3006_v32 = vclz %v8325_v1  ;;  %v2850_v53 = vshrl.u32 %v9165_v23, %v2849_v36  ;;  %v8332_v14 = vadd.s32 4294967169, %v3150_v47  ;;  %v11029_v50 = vand.u32 8388607, %v3146_v44 }
 0x431   : > { %vm6037_vm3 = vcmp.eq.s32.totalorder %v10995_v5, 0  ;;  %v2862_v2 = vor.u32 %v2861_v43, %v2860_v63  ;;  %v2865_v4 = vor.u32 %v2864_v55, %v2863_v60  ;;  %vm2866_vm4 = vcmp.lt.s32.totalorder %v11016_v8, 1 }
 0x432   : > { %v8326_v12 = vadd.s32 4294967294, %v3006_v32  ;;  %vm2867_vm5 = vcmp.lt.s32.totalorder %v11016_v8, 2  ;;  %vm2722_vm6 = vcmp.eq.s32.totalorder %v10993_v45, 0  ;;  %vm2725_vm7 = vcmp.eq.s32.totalorder %v10993_v45, 2 }
 0x433   : > { %vm6036_vm8 = vcmp.lt.s32.totalorder %v10995_v5, 2  ;;  %vm2868_vm10 = vcmp.lt.s32.totalorder %v11016_v8, 3  ;;  %vm2869_vm11 = vcmp.lt.s32.totalorder %v11016_v8, 4  ;;  %v2874_v13 = vsel %vm2866_vm4, %v2853_v28, %v2856_v57 }
 0x434   : > { %vm8327_vm9 = vcmp.lt.s32.totalorder %v8326_v12, 0  ;;  %vm2718_vm12 = vweird.f32 %v10639_v46  ;;  %v2875_v49 = vsel %vm2869_vm11, %v2862_v2, 920167782  ;;  %v2878_v11 = vsel %vm2866_vm4, %v2856_v57, %v2859_v41 }
 0x435   : > { %v3009_v15 = vsel %vm8327_vm9, 0, %v8326_v12  ;;  %v2879_v61 = vsel %vm2869_vm11, %v2865_v4, 1326507024  ;;  %v2870_v54 = vsel %vm2866_vm4, %v2850_v53, %v2853_v28  ;;  %v2876_v6 = vsel %vm2868_vm10, %v2859_v41, %v2875_v49 }
 0x436   : > { %v3010_v51 = vsub.s32 32, %v3009_v15  ;;  %v3014_v36 = vsub.s32 4294967266, %v3009_v15  ;;  %vm2721_vm14 = vcmp.lt.s32.totalorder %v10993_v45, 2  ;;  %vm2940_vm15 = vcmp.lt.s32.totalorder %v10780_v34, 0 }
 0x437   : > { %v3011_v0 = vshll.u32 %v10991_v62, %v3009_v15  ;;  %v2871_v39 = vsel %vm2869_vm11, %v2859_v41, 2102212464  ;;  %v2880_v38 = vsel %vm2868_vm10, %v2862_v2, %v2879_v61  ;;  %v3156_v3 = vadd.s32 1, %v8332_v14 }
 0x438   : > { %v9038_v7 = vpop.eup %9037  ;;  %v3012_v9 = vshrl.u32 %v2994_v19, %v3010_v51  ;;  %v3015_v26 = vadd.s32 127, %v3014_v36  ;;  %v2877_v35 = vsel %vm2867_vm5, %v2874_v13, %v2876_v6  ;;  %v2881_v52 = vsel %vm2867_vm5, %v2878_v11, %v2880_v38 }
 0x439   : > { %v9040_v30 = vpop.eup %9039  ;;  %v2726_v47 = vxor.u32 2147483648, %v9038_v7  ;;  %v11058_v1 = vmul.u32.u64.low %v11019_v59, %v2881_v52  ;;  %v11059_v48 = vmul.u32.u64.high %v11019_v59, %v2881_v52, %v11058_v1  ;;  %vm3157_vm0 = vcmp.gt.s32.totalorder %v3156_v3, 0 }
 0x43a   : > { %v2723_v62 = vxor.u32 2147483648, %v9040_v30  ;;  %v3013_v42 = vor.u32 %v3012_v9, %v3011_v0  ;;  %v3016_v37 = vshll.u32 %v3015_v26, 23  ;;  %v2872_v19 = vsel %vm2868_vm10, %v2856_v57, %v2871_v39 }
 0x43b   : > { %v6042_v32 = vsel %vm6040_vm2, %v2726_v47, %v9040_v30  ;;  %v11066_v28 = vmul.u32.u64.low %v11019_v59, %v2877_v35  ;;  %v11067_v63 = vmul.u32.u64.high %v11019_v59, %v2877_v35, %v11066_v28  ;;  %v11072_v41 = vadd.f32 %v10635_v20, %v10588_v21 }
 0x43c   : > { %v6039_v43 = vsel %vm6037_vm3, %v9038_v7, %v2723_v62  ;;  %vm11078_vm1 = vcmp.le.f32.partialorder %v2938_v10, 0.7853982  ;;  %v3017_v57 = vor.u32 4788187, %v3016_v37  ;;  %v3024_v55 = vsub.s32 4, %v10985_v22 }
 0x43d   : > { %v3158_v12 = vsel %vm3157_vm0, %v3156_v3, 0  ;;  %v2724_v53 = vsel %vm2722_vm6, %v9038_v7, %v2723_v62  ;;  %v2727_v21 = vsel %vm2725_vm7, %v2726_v47, %v9040_v30  ;;  %v6043_v20 = vsel %vm6036_vm8, %v6039_v43, %v6042_v32 }
 0x43e   : > { %v2873_v14 = vsel %vm2867_vm5, %v2870_v54, %v2872_v19  ;;  %v6044_v10 = vsel %vm2718_vm12, nan, %v6043_v20  ;;  %v3018_v2 = vand.u32 2147483647, %v3017_v57  ;;  %v3020_v4 = vcvt.s32.f32 %v3013_v42 }
 0x43f   : > { %vm2891_vm2 = vc.u32 %v11059_v48, %v11066_v28  ;;  %9041 = vrcp.f32 %v6044_v10  ;;  %v2892_v13 = vadd.s32 1, %v11067_v63  ;;  %v3154_v15 = vor.u32 8388608, %v11029_v50 }
 0x440   : > { %v3160_v49 = vand.u32 31, %v3158_v12  ;;  %v2728_v5 = vsel %vm2721_vm14, %v2724_v53, %v2727_v21  ;;  %v3021_v11 = vmul.f32 %v3020_v4, %v3018_v2  ;;  %v3025_v8 = vsel %vm2940_vm15, %v3024_v55, %v10985_v22  ;;  %v11145_v4 = vpop.f32.mrb[38].mxu0 }
 0x441   : > { %v2889_v61 = vmul.u32 %v11019_v59, %v2873_v14  ;;  %v2893_v51 = vsel %vm2891_vm2, %v2892_v13, %v11067_v63  ;;  %v11104_v36 = vshrl.u32 %v3158_v12, 5  ;;  %v3045_v6 = vand.u32 2139095040, %v11072_v41 }
 0x442   : > { %v3161_v54 = vsub.s32 32, %v3160_v49  ;;  %v3022_v0 = vxor.u32 2147483648, %v3021_v11  ;;  %v3163_v39 = vshll.u32 %v9165_v23, %v3160_v49  ;;  %v3166_v45 = vshll.u32 %v9166_v27, %v3160_v49 }
 0x443   : > { %v2894_v50 = vadd.s32 %v2893_v51, %v2889_v61  ;;  %v3169_v22 = vshll.u32 %v9167_v29, %v3160_v49  ;;  %v3172_v26 = vshll.u32 %v9168_v31, %v3160_v49  ;;  %v3175_v1 = vshll.u32 %v9169_v33, %v3160_v49 }
 0x444   : > { %v3164_v38 = vshrl.u32 %v9166_v27, %v3161_v54  ;;  %v3167_v3 = vshrl.u32 %v9167_v29, %v3161_v54  ;;  %v3170_v59 = vshrl.u32 %v9168_v31, %v3161_v54  ;;  %v3023_v7 = vsel %vm2940_vm15, %v3022_v0, %v3021_v11 }
 0x445   : > { %v2895_v9 = vadd.s32 536870912, %v2894_v50  ;;  %v3173_v35 = vshrl.u32 %v9169_v33, %v3161_v54  ;;  %v3026_v52 = vsel %vm11078_vm1, %v10780_v34, %v3023_v7  ;;  %v3176_v37 = vshrl.u32 %v9170_v40, %v3161_v54 }
 0x446   : > { %v3165_v30 = vor.u32 %v3164_v38, %v3163_v39  ;;  %v3168_v47 = vor.u32 %v3167_v3, %v3166_v45  ;;  %9043 = vcosq.f32 %v3026_v52  ;;  %v3027_v19 = vsel %vm11078_vm1, 0, %v3025_v8 }
 0x447   : > { %v11121_v62 = vshrl.u32 %v2895_v9, 30  ;;  %v3174_v42 = vor.u32 %v3173_v35, %v3172_v26  ;;  %9045 = vsinq.f32 %v3026_v52  ;;  %v3171_v32 = vor.u32 %v3170_v59, %v3169_v22 }
 0x448   : > { %v3177_v43 = vor.u32 %v3176_v37, %v3175_v1  ;;  %vm3178_vm3 = vcmp.lt.s32.totalorder %v11104_v36, 1  ;;  %vm3181_vm4 = vcmp.lt.s32.totalorder %v11104_v36, 4  ;;  %v2729_v55 = vsel %vm2718_vm12, nan, %v2728_v5 }
 0x449   : > { %v2897_v63 = vshll.u32 %v11121_v62, 30  ;;  %v9042_v57 = vpop.eup %9041  ;;  %v3186_v12 = vsel %vm3178_vm3, %v3165_v30, %v3168_v47  ;;  %v3187_v60 = vsel %vm3181_vm4, %v3174_v42, 920167782  ;;  %v3046_v53 = vshrl.u32 %v3045_v6, 23 }
 0x44a   : > { %v8046_v21 = vmul.f32 %v9042_v57, %v2729_v55  ;;  %vm3180_vm5 = vcmp.lt.s32.totalorder %v11104_v36, 3  ;;  %v11138_v14 = vshll.u32 %v3154_v15, 8  ;;  %v3031_v10 = vadd.s32 3, %v3027_v19 }
 0x44b   : > { %v11135_v20 = vsub.s32 %v2894_v50, %v2897_v63  ;;  %vm3179_vm6 = vcmp.lt.s32.totalorder %v11104_v36, 2  ;;  %v3188_v46 = vsel %vm3180_vm5, %v3171_v32, %v3187_v60  ;;  %v3191_v2 = vsel %vm3181_vm4, %v3177_v43, 1326507024 }
 0x44c   : > { %8079 = vst.msk [vmem:[%s9829_s16 + $0x60] sm:$0xff] %vm8066_vm13, %v8046_v21  ;;  %v3183_v49 = vsel %vm3181_vm4, %v3171_v32, 2102212464  ;;  %v3189_v15 = vsel %vm3179_vm6, %v3186_v12, %v3188_v46  ;;  %v3190_v5 = vsel %vm3178_vm3, %v3168_v47, %v3171_v32  ;;  %v3192_v11 = vsel %vm3180_vm5, %v3174_v42, %v3191_v2 }
 0x44d   : > { %v2900_v13 = vsub.s32 0, %v11135_v20  ;;  %v11159_v8 = vmul.u32.u64.low %v11138_v14, %v3189_v15  ;;  %v11160_v61 = vmul.u32.u64.high %v11138_v14, %v3189_v15, %v11159_v8  ;;  %v8328_v51 = vadd.s32 4294967169, %v3046_v53 }
 0x44e   : > { %vm3030_vm7 = vweird.f32 %v10780_v34  ;;  %v6344_v6 = vand.u32 3, %v3027_v19  ;;  %v3162_v50 = vshrl.u32 %v9165_v23, %v3161_v54  ;;  %vm11168_vm8 = vcmp.le.f32.partialorder %v2834_v18, 0.7853982 }
 0x44f   : > { %v8321_v0 = vmin.u32 %v2900_v13, %v11135_v20  ;;  %vm2836_vm9 = vcmp.lt.s32.totalorder %v10890_v24, 0  ;;  %v3193_v45 = vsel %vm3179_vm6, %v3190_v5, %v3192_v11  ;;  %v3042_v38 = vand.u32 2147483647, %v11072_v41 }
 0x450   : > { %v3052_v3 = vadd.s32 1, %v8328_v51  ;;  %v9044_v22 = vpop.eup %9043  ;;  %v3032_v59 = vand.u32 3, %v3031_v10  ;;  %v3182_v54 = vsel %vm3178_vm3, %v3162_v50, %v3165_v30  ;;  %v3184_v18 = vsel %vm3180_vm5, %v3168_v47, %v3183_v49 }
 0x451   : > { %v2902_v7 = vclz %v8321_v0  ;;  %v9046_v9 = vpop.eup %9045  ;;  %v3038_v26 = vxor.u32 2147483648, %v9044_v22  ;;  %v2920_v35 = vsub.s32 4, %v11121_v62  ;;  %vm6349_vm10 = vcmp.eq.s32.totalorder %v6344_v6, 2 }
 0x452   : > { %v11182_v52 = vmul.u32.u64.low %v11138_v14, %v3193_v45  ;;  %v11183_v1 = vmul.u32.u64.high %v11138_v14, %v3193_v45, %v11182_v52  ;;  %v3035_v42 = vxor.u32 2147483648, %v9046_v9  ;;  %vm3053_vm11 = vcmp.gt.s32.totalorder %v3052_v3, 0 }
 0x453   : > { %v8322_v37 = vadd.s32 4294967294, %v2902_v7  ;;  %vm6345_vm12 = vcmp.lt.s32.totalorder %v6344_v6, 2  ;;  %vm6346_vm14 = vcmp.eq.s32.totalorder %v6344_v6, 0  ;;  %v6351_v19 = vsel %vm6349_vm10, %v3038_v26, %v9046_v9 }
 0x454   : > { %v3185_v30 = vsel %vm3179_vm6, %v3182_v54, %v3184_v18  ;;  %vm3033_vm15 = vcmp.lt.s32.totalorder %v3032_v59, 2  ;;  %v6348_v47 = vsel %vm6346_vm14, %v9044_v22, %v3035_v42  ;;  %v3204_v32 = vadd.s32 1, %v11160_v61 }
 0x455   : > { %vm8323_vm0 = vcmp.lt.s32.totalorder %v8322_v37, 0  ;;  %v3054_v63 = vsel %vm3053_vm11, %v3052_v3, 0  ;;  %vm3034_vm1 = vcmp.eq.s32.totalorder %v3032_v59, 0  ;;  %v6352_v43 = vsel %vm6345_vm12, %v6348_v47, %v6351_v19 }
 0x456   : > { %v2905_v57 = vsel %vm8323_vm0, 0, %v8322_v37  ;;  %v2921_v55 = vsel %vm2836_vm9, %v2920_v35, %v11121_v62  ;;  %v6353_v12 = vsel %vm3030_vm7, nan, %v6352_v43  ;;  %v2890_v36 = vadd.s32 %v11066_v28, %v11059_v48  ;;  %v11223_v43 = vpop.f32.mrb[39].mxu0 }
 0x457   : > { %v2906_v60 = vsub.s32 32, %v2905_v57  ;;  %v3201_v53 = vmul.u32 %v11138_v14, %v3185_v30  ;;  %9047 = vrcp.f32 %v6353_v12  ;;  %v2910_v21 = vsub.s32 4294967266, %v2905_v57 }
 0x458   : > { %vm3203_vm2 = vc.u32 %v11183_v1, %v11159_v8  ;;  %v3056_v10 = vand.u32 31, %v3054_v63  ;;  %vm3037_vm3 = vcmp.eq.s32.totalorder %v3032_v59, 2  ;;  %v2923_v62 = vsel %vm11168_vm8, 0, %v2921_v55 }
 0x459   : > { %v2908_v46 = vshrl.u32 %v2890_v36, %v2906_v60  ;;  %v3205_v2 = vsel %vm3203_vm2, %v3204_v32, %v11160_v61  ;;  %v2907_v13 = vshll.u32 %v11135_v20, %v2905_v57  ;;  %v2911_v49 = vadd.s32 127, %v2910_v21 }
 0x45a   : > { %v3206_v48 = vadd.s32 %v3205_v2, %v3201_v53  ;;  %v3057_v28 = vsub.s32 32, %v3056_v10  ;;  %v3036_v14 = vsel %vm3034_vm1, %v9044_v22, %v3035_v42  ;;  %v3039_v15 = vsel %vm3037_vm3, %v3038_v26, %v9046_v9 }
 0x45b   : > { %v3049_v5 = vand.u32 8388607, %v3042_v38  ;;  %v11205_v11 = vshrl.u32 %v3054_v63, 5  ;;  %v2909_v51 = vor.u32 %v2908_v46, %v2907_v13  ;;  %v2912_v6 = vshll.u32 %v2911_v49, 23 }
 0x45c   : > { %v3207_v0 = vadd.s32 536870912, %v3206_v48  ;;  %v3068_v50 = vshll.u32 %v9168_v31, %v3056_v10  ;;  %v3060_v61 = vshrl.u32 %v9166_v27, %v3057_v28  ;;  %v3063_v20 = vshrl.u32 %v9167_v29, %v3057_v28 }
 0x45d   : > { %v3066_v45 = vshrl.u32 %v9168_v31, %v3057_v28  ;;  %v3069_v3 = vshrl.u32 %v9169_v33, %v3057_v28  ;;  %v3040_v22 = vsel %vm3033_vm15, %v3036_v14, %v3039_v15  ;;  %v2913_v7 = vor.u32 4788187, %v2912_v6 }
 0x45e   : > { %v11213_v54 = vshrl.u32 %v3207_v0, 30  ;;  %v3059_v18 = vshll.u32 %v9165_v23, %v3056_v10  ;;  %v3062_v9 = vshll.u32 %v9166_v27, %v3056_v10  ;;  %v3065_v26 = vshll.u32 %v9167_v29, %v3056_v10 }
 0x45f   : > { %v3070_v35 = vor.u32 %v3069_v3, %v3068_v50  ;;  %v3072_v52 = vshrl.u32 %v9170_v40, %v3057_v28  ;;  %v2914_v42 = vand.u32 2147483647, %v2913_v7  ;;  %v2916_v37 = vcvt.s32.f32 %v2909_v51 }
 0x460   : > { %v3209_v19 = vshll.u32 %v11213_v54, 30  ;;  %v3071_v30 = vshll.u32 %v9169_v33, %v3056_v10  ;;  %v3041_v59 = vsel %vm3030_vm7, nan, %v3040_v22  ;;  %v3061_v47 = vor.u32 %v3060_v61, %v3059_v18  ;;  %v11268_v22 = vld [vmem:[%s12814_s6] ss:$0 sm:$0xff] }
 0x461   : > { %v3064_v32 = vor.u32 %v3063_v20, %v3062_v9  ;;  %v3067_v63 = vor.u32 %v3066_v45, %v3065_v26  ;;  %v9048_v57 = vpop.eup %9047  ;;  %v2917_v55 = vmul.f32 %v2916_v37, %v2914_v42  ;;  %vm3077_vm4 = vcmp.lt.s32.totalorder %v11205_v11, 4 }
 0x462   : > { %v11225_v12 = vsub.s32 %v3206_v48, %v3209_v19  ;;  %v3073_v36 = vor.u32 %v3072_v52, %v3071_v30  ;;  %v8049_v60 = vmul.f32 %v9048_v57, %v3041_v59  ;;  %v3083_v53 = vsel %vm3077_vm4, %v3070_v35, 920167782 }
 0x463   : > { %v2918_v21 = vxor.u32 2147483648, %v2917_v55  ;;  %vm3074_vm5 = vcmp.lt.s32.totalorder %v11205_v11, 1  ;;  %vm3076_vm6 = vcmp.lt.s32.totalorder %v11205_v11, 3  ;;  %v2927_v10 = vadd.s32 3, %v2923_v62 }
 0x464   : > { %v3212_v34 = vsub.s32 0, %v11225_v12  ;;  %8082 = vst.msk [vmem:[%s9829_s16 + $0x78] sm:$0xff] %vm8066_vm13, %v8049_v60  ;;  %v3050_v46 = vor.u32 8388608, %v3049_v5  ;;  %v3082_v2 = vsel %vm3074_vm5, %v3061_v47, %v3064_v32  ;;  %v3084_v13 = vsel %vm3076_vm6, %v3067_v63, %v3083_v53 }
 0x465   : > { %v2919_v49 = vsel %vm2836_vm9, %v2918_v21, %v2917_v55  ;;  %vm3075_vm7 = vcmp.lt.s32.totalorder %v11205_v11, 2  ;;  %v3087_v14 = vsel %vm3077_vm4, %v3073_v36, 1326507024  ;;  %v3058_v5 = vshrl.u32 %v9165_v23, %v3057_v28 }
 0x466   : > { %v8333_v48 = vmin.u32 %v3212_v34, %v11225_v12  ;;  %v2922_v15 = vsel %vm11168_vm8, %v10890_v24, %v2919_v49  ;;  %v3079_v51 = vsel %vm3077_vm4, %v3067_v63, 2102212464  ;;  %v3086_v6 = vsel %vm3074_vm5, %v3064_v32, %v3067_v63 }
 0x467   : > { %9049 = vcosq.f32 %v2922_v15  ;;  %v11253_v0 = vand.u32 3, %v2923_v62  ;;  %v3085_v61 = vsel %vm3075_vm7, %v3082_v2, %v3084_v13  ;;  %v3078_v39 = vsel %vm3074_vm5, %v3058_v5, %v3061_v47 }
 0x468   : > { %v3214_v50 = vclz %v8333_v48  ;;  %9051 = vsinq.f32 %v2922_v15  ;;  %v3088_v28 = vsel %vm3076_vm6, %v3070_v35, %v3087_v14  ;;  %v3090_v20 = vshll.u32 %v3050_v46, 8 }
 0x469   : > { %v3080_v3 = vsel %vm3076_vm6, %v3064_v32, %v3079_v51  ;;  %v3089_v62 = vsel %vm3075_vm7, %v3086_v6, %v3088_v28  ;;  %v11272_v7 = vadd.f32 %v11268_v22, %v10739_v58  ;;  %v11281_v52 = vand.u32 3, %v2927_v10 }
 0x46a   : > { %v8334_v45 = vadd.s32 4294967294, %v3214_v50  ;;  %v11274_v18 = vmul.u32.u64.low %v3090_v20, %v3089_v62  ;;  %v11275_v9 = vmul.u32.u64.high %v3090_v20, %v3089_v62, %v11274_v18  ;;  %vm11285_vm8 = vcmp.le.f32.partialorder %v3146_v44, 0.7853982 }
 0x46b   : > { %v11277_v26 = vmul.u32.u64.low %v3090_v20, %v3085_v61  ;;  %v11278_v35 = vmul.u32.u64.high %v3090_v20, %v3085_v61, %v11277_v26  ;;  %vm3148_vm9 = vcmp.lt.s32.totalorder %v10983_v25, 0  ;;  %vm6243_vm11 = vcmp.eq.s32.totalorder %v11253_v0, 0 }
 0x46c   : > { %vm8335_vm10 = vcmp.lt.s32.totalorder %v8334_v45, 0  ;;  %v3081_v37 = vsel %vm3075_vm7, %v3078_v39, %v3080_v3  ;;  %v3357_v19 = vand.u32 2139095040, %v11272_v7  ;;  %vm6242_vm12 = vcmp.lt.s32.totalorder %v11253_v0, 2 }
 0x46d   : > { %v3217_v58 = vsel %vm8335_vm10, 0, %v8334_v45  ;;  %v3202_v30 = vadd.s32 %v11159_v8, %v11183_v1  ;;  %v3232_v47 = vsub.s32 4, %v11213_v54  ;;  %vm2926_vm14 = vweird.f32 %v10890_v24 }
 0x46e   : > { %v3218_v44 = vsub.s32 32, %v3217_v58  ;;  %v3222_v59 = vsub.s32 4294967266, %v3217_v58  ;;  %vm3099_vm15 = vc.u32 %v11275_v9, %v11277_v26  ;;  %v3100_v32 = vadd.s32 1, %v11278_v35 }
 0x46f   : > { %v3358_v11 = vshrl.u32 %v3357_v19, 23  ;;  %v11304_v63 = vadd.f32 %v11268_v22, %v10811_v56  ;;  %v3219_v57 = vshll.u32 %v11225_v12, %v3217_v58  ;;  %v3097_v1 = vmul.u32 %v3090_v20, %v3081_v37 }
 0x470   : > { %v3220_v55 = vshrl.u32 %v3202_v30, %v3218_v44  ;;  %v3223_v8 = vadd.s32 127, %v3222_v59  ;;  %vm6246_vm0 = vcmp.eq.s32.totalorder %v11253_v0, 2  ;;  %v3101_v36 = vsel %vm3099_vm15, %v3100_v32, %v11278_v35 }
 0x471   : > { %v3354_v60 = vand.u32 2147483647, %v11272_v7  ;;  %v8340_v53 = vadd.s32 4294967169, %v3358_v11  ;;  %v9050_v21 = vpop.eup %9049  ;;  %v3233_v56 = vsel %vm3148_vm9, %v3232_v47, %v11213_v54  ;;  %v3102_v46 = vadd.s32 %v3101_v36, %v3097_v1 }
 0x472   : > { %v3221_v34 = vor.u32 %v3220_v55, %v3219_v57  ;;  %v3224_v10 = vshll.u32 %v3223_v8, 23  ;;  %v9052_v2 = vpop.eup %9051  ;;  %vm2930_vm1 = vcmp.eq.s32.totalorder %v11281_v52, 0  ;;  %v2934_v12 = vxor.u32 2147483648, %v9050_v21 }
 0x473   : > { %v3364_v13 = vadd.s32 1, %v8340_v53  ;;  %v3253_v49 = vand.u32 2139095040, %v11304_v63  ;;  %v2931_v48 = vxor.u32 2147483648, %v9052_v2  ;;  %vm2933_vm2 = vcmp.eq.s32.totalorder %v11281_v52, 2 }
 0x474   : > { %v3225_v14 = vor.u32 4788187, %v3224_v10  ;;  %v3103_v15 = vadd.s32 536870912, %v3102_v46  ;;  %v6248_v5 = vsel %vm6246_vm0, %v2934_v12, %v9052_v2  ;;  %v3235_v51 = vsel %vm11285_vm8, 0, %v3233_v56 }
 0x475   : > { %v3361_v54 = vand.u32 8388607, %v3354_v60  ;;  %vm3365_vm3 = vcmp.gt.s32.totalorder %v3364_v13, 0  ;;  %v6245_v6 = vsel %vm6243_vm11, %v9050_v21, %v2931_v48  ;;  %v3228_v61 = vcvt.s32.f32 %v3221_v34 }
 0x476   : > { %v3226_v50 = vand.u32 2147483647, %v3225_v14  ;;  %v3104_v39 = vshrl.u32 %v3103_v15, 30  ;;  %v2935_v28 = vsel %vm2933_vm2, %v2934_v12, %v9052_v2  ;;  %v6249_v20 = vsel %vm6242_vm12, %v6245_v6, %v6248_v5 }
 0x477   : > { %v3366_v45 = vsel %vm3365_vm3, %v3364_v13, 0  ;;  %v3254_v3 = vshrl.u32 %v3253_v49, 23  ;;  %v2932_v62 = vsel %vm2930_vm1, %v9050_v21, %v2931_v48  ;;  %v6250_v18 = vsel %vm2926_vm14, nan, %v6249_v20 }
 0x478   : > { %v3229_v35 = vmul.f32 %v3228_v61, %v3226_v50  ;;  %v3105_v58 = vshll.u32 %v3104_v39, 30  ;;  %vm2929_vm4 = vcmp.lt.s32.totalorder %v11281_v52, 2  ;;  %9053 = vrcp.f32 %v6250_v18 }
 0x479   : > { %v3239_v37 = vadd.s32 3, %v3235_v51  ;;  %v3368_v19 = vand.u32 31, %v3366_v45  ;;  %v3362_v0 = vor.u32 8388608, %v3361_v54  ;;  %v3250_v59 = vand.u32 2147483647, %v11304_v63  ;;  %v11374_v54 = vpop.f32.mrb[40].mxu0 }
 0x47a   : > { %v3230_v30 = vxor.u32 2147483648, %v3229_v35  ;;  %v11331_v44 = vsub.s32 %v3102_v46, %v3105_v58  ;;  %v2936_v47 = vsel %vm2929_vm4, %v2932_v62, %v2935_v28  ;;  %vm3044_vm5 = vcmp.lt.s32.totalorder %v11072_v41, 0 }
 0x47b   : > { %v3369_v32 = vsub.s32 32, %v3368_v19  ;;  %v3128_v55 = vsub.s32 4, %v3104_v39  ;;  %v8336_v52 = vadd.s32 4294967169, %v3254_v3  ;;  %v11341_v1 = vand.u32 3, %v3239_v37 }
 0x47c   : > { %v3231_v11 = vsel %vm3148_vm9, %v3230_v30, %v3229_v35  ;;  %v3108_v57 = vsub.s32 0, %v11331_v44  ;;  %v11343_v36 = vand.u32 3, %v3235_v51  ;;  %v3098_v53 = vadd.s32 %v11277_v26, %v11275_v9 }
 0x47d   : > { %v3234_v8 = vsel %vm11285_vm8, %v10983_v25, %v3231_v11  ;;  %v11348_v34 = vshll.u32 %v3362_v0, 8  ;;  %v11352_v10 = vand.u32 8388607, %v3250_v59  ;;  %v2937_v42 = vsel %vm2926_vm14, nan, %v2936_v47 }
 0x47e   : > { %9055 = vcosq.f32 %v3234_v8  ;;  %v8329_v21 = vmin.u32 %v3108_v57, %v11331_v44  ;;  %v11356_v56 = vshrl.u32 %v3366_v45, 5  ;;  %v3372_v46 = vshrl.u32 %v9166_v27, %v3369_v32 }
 0x47f   : > { %9057 = vsinq.f32 %v3234_v8  ;;  %v11361_v9 = vsel %vm3044_vm5, %v3128_v55, %v3104_v39  ;;  %v3375_v26 = vshrl.u32 %v9167_v29, %v3369_v32  ;;  %v11364_v12 = vadd.s32 1, %v8336_v52 }
 0x480   : > { %v3110_v2 = vclz %v8329_v21  ;;  %v3371_v13 = vshll.u32 %v9165_v23, %v3368_v19  ;;  %v3374_v49 = vshll.u32 %v9166_v27, %v3368_v19  ;;  %v3377_v24 = vshll.u32 %v9167_v29, %v3368_v19 }
 0x481   : > { %v3378_v48 = vshrl.u32 %v9168_v31, %v3369_v32  ;;  %vm6555_vm6 = vcmp.eq.s32.totalorder %v11343_v36, 2  ;;  %v3370_v15 = vshrl.u32 %v9165_v23, %v3369_v32  ;;  %v3380_v5 = vshll.u32 %v9168_v31, %v3368_v19 }
 0x482   : > { %v8330_v14 = vadd.s32 4294967294, %v3110_v2  ;;  %v3381_v51 = vshrl.u32 %v9169_v33, %v3369_v32  ;;  %v9054_v6 = vpop.eup %9053  ;;  %vm3245_vm7 = vcmp.eq.s32.totalorder %v11341_v1, 2  ;;  %vm6552_vm8 = vcmp.eq.s32.totalorder %v11343_v36, 0 }
 0x483   : > { %v3373_v50 = vor.u32 %v3372_v46, %v3371_v13  ;;  %v3379_v61 = vor.u32 %v3378_v48, %v3377_v24  ;;  %v3383_v39 = vshll.u32 %v9169_v33, %v3368_v19  ;;  %v3384_v28 = vshrl.u32 %v9170_v40, %v3369_v32 }
 0x484   : > { %v8048_v20 = vmul.f32 %v9054_v6, %v2937_v42  ;;  %vm3242_vm9 = vcmp.eq.s32.totalorder %v11341_v1, 0  ;;  %vm6551_vm10 = vcmp.lt.s32.totalorder %v11343_v36, 2  ;;  %vm8331_vm11 = vcmp.lt.s32.totalorder %v8330_v14, 0 }
 0x485   : > { %v3376_v45 = vor.u32 %v3375_v26, %v3374_v49  ;;  %v3382_v3 = vor.u32 %v3381_v51, %v3380_v5  ;;  %vm3238_vm12 = vweird.f32 %v10983_v25  ;;  %v3113_v62 = vsel %vm8331_vm11, 0, %v8330_v14 }
 0x486   : > { %v3385_v18 = vor.u32 %v3384_v28, %v3383_v39  ;;  %vm3386_vm14 = vcmp.lt.s32.totalorder %v11356_v56, 1  ;;  %vm3389_vm15 = vcmp.lt.s32.totalorder %v11356_v56, 4  ;;  %8081 = vst.msk [vmem:[%s9829_s16 + $0x70] sm:$0xff] %vm8066_vm13, %v8048_v20  ;;  %v3114_v35 = vsub.s32 32, %v3113_v62 }
 0x487   : > { %v3118_v58 = vsub.s32 4294967266, %v3113_v62  ;;  %vm3387_vm0 = vcmp.lt.s32.totalorder %v11356_v56, 2  ;;  %v3391_v37 = vsel %vm3389_vm15, %v3379_v61, 2102212464  ;;  %v3115_v19 = vshll.u32 %v11331_v44, %v3113_v62 }
 0x488   : > { %vm3388_vm1 = vcmp.lt.s32.totalorder %v11356_v56, 3  ;;  %v3390_v30 = vsel %vm3386_vm14, %v3370_v15, %v3373_v50  ;;  %v3395_v0 = vsel %vm3389_vm15, %v3382_v3, 920167782  ;;  %v9056_v47 = vpop.eup %9055  ;;  %v3116_v32 = vshrl.u32 %v3098_v53, %v3114_v35 }
 0x489   : > { %v3119_v11 = vadd.s32 127, %v3118_v58  ;;  %v3392_v57 = vsel %vm3388_vm1, %v3376_v45, %v3391_v37  ;;  %v3398_v55 = vsel %vm3386_vm14, %v3376_v45, %v3379_v61  ;;  %v9058_v52 = vpop.eup %9057  ;;  %v3246_v8 = vxor.u32 2147483648, %v9056_v47 }
 0x48a   : > { %v3394_v44 = vsel %vm3386_vm14, %v3373_v50, %v3376_v45  ;;  %v3396_v21 = vsel %vm3388_vm1, %v3379_v61, %v3395_v0  ;;  %v3399_v42 = vsel %vm3389_vm15, %v3385_v18, 1326507024  ;;  %v3243_v46 = vxor.u32 2147483648, %v9058_v52 }
 0x48b   : > { %v3117_v53 = vor.u32 %v3116_v32, %v3115_v19  ;;  %v3120_v2 = vshll.u32 %v3119_v11, 23  ;;  %v3400_v26 = vsel %vm3388_vm1, %v3382_v3, %v3399_v42  ;;  %v6557_v13 = vsel %vm6555_vm6, %v3246_v8, %v9058_v52 }
 0x48c   : > { %v3393_v49 = vsel %vm3387_vm0, %v3390_v30, %v3392_v57  ;;  %v3401_v24 = vsel %vm3387_vm0, %v3398_v55, %v3400_v26  ;;  %vm3261_vm2 = vcmp.gt.s32.totalorder %v11364_v12, 0  ;;  %v3247_v48 = vsel %vm3245_vm7, %v3246_v8, %v9058_v52 }
 0x48d   : > { %v6554_v14 = vsel %vm6552_vm8, %v9056_v47, %v3243_v46  ;;  %v3121_v15 = vor.u32 4788187, %v3120_v2  ;;  %v3397_v5 = vsel %vm3387_vm0, %v3394_v44, %v3396_v21  ;;  %v3244_v51 = vsel %vm3242_vm9, %v9056_v47, %v3243_v46 }
 0x48e   : > { %v6558_v6 = vsel %vm6551_vm10, %v6554_v14, %v6557_v13  ;;  %v11426_v50 = vmul.u32.u64.low %v11348_v34, %v3401_v24  ;;  %v11427_v61 = vmul.u32.u64.high %v11348_v34, %v3401_v24, %v11426_v50  ;;  %v3124_v20 = vcvt.s32.f32 %v3117_v53  ;;  %v11470_v13 = vpop.f32.mrb[41].mxu0 }
 0x48f   : > { %v6559_v39 = vsel %vm3238_vm12, nan, %v6558_v6  ;;  %v3122_v28 = vand.u32 2147483647, %v3121_v15  ;;  %v3262_v45 = vsel %vm3261_vm2, %v11364_v12, 0  ;;  %vm11434_vm3 = vcmp.le.f32.partialorder %v3042_v38, 0.7853982 }
 0x490   : > { %9059 = vrcp.f32 %v6559_v39  ;;  %v11439_v36 = vmul.u32.u64.low %v11348_v34, %v3397_v5  ;;  %v11440_v3 = vmul.u32.u64.high %v11348_v34, %v3397_v5, %v11439_v36  ;;  %vm3241_vm4 = vcmp.lt.s32.totalorder %v11341_v1, 2 }
 0x491   : > { %v3125_v62 = vmul.f32 %v3124_v20, %v3122_v28  ;;  %v3258_v18 = vor.u32 8388608, %v11352_v10  ;;  %v3264_v35 = vand.u32 31, %v3262_v45  ;;  %v3248_v58 = vsel %vm3241_vm4, %v3244_v51, %v3247_v48 }
 0x492   : > { %v3131_v12 = vsel %vm11434_vm3, 0, %v11361_v9  ;;  %v3409_v38 = vmul.u32 %v11348_v34, %v3393_v49  ;;  %v11449_v37 = vshrl.u32 %v3262_v45, 5  ;;  %vm3411_vm6 = vc.u32 %v11427_v61, %v11439_v36 }
 0x493   : > { %v3126_v19 = vxor.u32 2147483648, %v3125_v62  ;;  %v3265_v30 = vsub.s32 32, %v3264_v35  ;;  %v3267_v1 = vshll.u32 %v9165_v23, %v3264_v35  ;;  %v3412_v0 = vadd.s32 1, %v11440_v3 }
 0x494   : > { %v3270_v10 = vshll.u32 %v9166_v27, %v3264_v35  ;;  %v3273_v47 = vshll.u32 %v9167_v29, %v3264_v35  ;;  %v3276_v32 = vshll.u32 %v9168_v31, %v3264_v35  ;;  %v3279_v57 = vshll.u32 %v9169_v33, %v3264_v35 }
 0x495   : > { %v3127_v34 = vsel %vm3044_vm5, %v3126_v19, %v3125_v62  ;;  %v3268_v9 = vshrl.u32 %v9166_v27, %v3265_v30  ;;  %v3271_v11 = vshrl.u32 %v9167_v29, %v3265_v30  ;;  %v3413_v52 = vsel %vm3411_vm6, %v3412_v0, %v11440_v3 }
 0x496   : > { %v3130_v55 = vsel %vm11434_vm3, %v11072_v41, %v3127_v34  ;;  %v3274_v8 = vshrl.u32 %v9168_v31, %v3265_v30  ;;  %v3277_v44 = vshrl.u32 %v9169_v33, %v3265_v30  ;;  %v3414_v21 = vadd.s32 %v3413_v52, %v3409_v38 }
 0x497   : > { %9061 = vcosq.f32 %v3130_v55  ;;  %v3269_v42 = vor.u32 %v3268_v9, %v3267_v1  ;;  %v3272_v46 = vor.u32 %v3271_v11, %v3270_v10  ;;  %v3280_v26 = vshrl.u32 %v9170_v40, %v3265_v30 }
 0x498   : > { %9063 = vsinq.f32 %v3130_v55  ;;  %v3275_v53 = vor.u32 %v3274_v8, %v3273_v47  ;;  %v3278_v2 = vor.u32 %v3277_v44, %v3276_v32  ;;  %v3249_v49 = vsel %vm3238_vm12, nan, %v3248_v58 }
 0x499   : > { %v3415_v24 = vadd.s32 536870912, %v3414_v21  ;;  %vm3282_vm5 = vcmp.lt.s32.totalorder %v11449_v37, 1  ;;  %vm3285_vm7 = vcmp.lt.s32.totalorder %v11449_v37, 4  ;;  %v3281_v14 = vor.u32 %v3280_v26, %v3279_v57 }
 0x49a   : > { %v9060_v48 = vpop.eup %9059  ;;  %vm3284_vm8 = vcmp.lt.s32.totalorder %v11449_v37, 3  ;;  %v3290_v15 = vsel %vm3282_vm5, %v3269_v42, %v3272_v46  ;;  %v3291_v5 = vsel %vm3285_vm7, %v3278_v2, 920167782  ;;  %vm3283_vm9 = vcmp.lt.s32.totalorder %v11449_v37, 2 }
 0x49b   : > { %v8051_v51 = vmul.f32 %v9060_v48, %v3249_v49  ;;  %v11481_v6 = vshrl.u32 %v3415_v24, 30  ;;  %v3292_v25 = vsel %vm3284_vm8, %v3275_v53, %v3291_v5  ;;  %v3294_v39 = vsel %vm3282_vm5, %v3272_v46, %v3275_v53 }
 0x49c   : > { %v3293_v50 = vsel %vm3283_vm9, %v3290_v15, %v3292_v25  ;;  %v3295_v28 = vsel %vm3285_vm7, %v3281_v14, 1326507024  ;;  %v3298_v20 = vshll.u32 %v3258_v18, 8  ;;  %v3287_v56 = vsel %vm3285_vm7, %v3275_v53, 2102212464 }
 0x49d   : > { %8084 = vst.msk [vmem:[%s9829_s16 + $0x88] sm:$0xff] %vm8066_vm13, %v8051_v51  ;;  %v3417_v45 = vshll.u32 %v11481_v6, 30  ;;  %v3296_v3 = vsel %vm3284_vm8, %v3278_v2, %v3295_v28  ;;  %v11507_v18 = vadd.f32 %v11268_v22, %v10911_v16  ;;  %v3135_v38 = vadd.s32 3, %v3131_v12 }
 0x49e   : > { %v3297_v62 = vsel %vm3283_vm9, %v3294_v39, %v3296_v3  ;;  %v11501_v35 = vmul.u32.u64.low %v3298_v20, %v3293_v50  ;;  %v11502_v58 = vmul.u32.u64.high %v3298_v20, %v3293_v50, %v11501_v35  ;;  %v6447_v19 = vand.u32 3, %v3131_v12 }
 0x49f   : > { %v3418_v1 = vsub.s32 %v3414_v21, %v3417_v45  ;;  %v3266_v0 = vshrl.u32 %v9165_v23, %v3265_v30  ;;  %v11510_v10 = vmul.u32.u64.low %v3298_v20, %v3297_v62  ;;  %v11511_v47 = vmul.u32.u64.high %v3298_v20, %v3297_v62, %v11510_v10 }
 0x4a0   : > { %v3565_v32 = vand.u32 2139095040, %v11507_v18  ;;  %v3288_v57 = vsel %vm3284_vm8, %v3272_v46, %v3287_v56  ;;  %v3136_v52 = vand.u32 3, %v3135_v38  ;;  %vm6452_vm10 = vcmp.eq.s32.totalorder %v6447_v19, 2 }
 0x4a1   : > { %v9062_v34 = vpop.eup %9061  ;;  %v3420_v9 = vsub.s32 0, %v3418_v1  ;;  %v3286_v11 = vsel %vm3282_vm5, %v3266_v0, %v3269_v42  ;;  %vm6449_vm11 = vcmp.eq.s32.totalorder %v6447_v19, 0  ;;  %vm6448_vm12 = vcmp.lt.s32.totalorder %v6447_v19, 2 }
 0x4a2   : > { %v9064_v16 = vpop.eup %9063  ;;  %v3142_v55 = vxor.u32 2147483648, %v9062_v34  ;;  %v3289_v44 = vsel %vm3283_vm9, %v3286_v11, %v3288_v57  ;;  %v3566_v21 = vshrl.u32 %v3565_v32, 23  ;;  %v3308_v42 = vadd.s32 1, %v11502_v58 }
 0x4a3   : > { %v3139_v12 = vxor.u32 2147483648, %v9064_v16  ;;  %v8341_v8 = vmin.u32 %v3420_v9, %v3418_v1  ;;  %vm3134_vm14 = vweird.f32 %v11072_v41  ;;  %vm3356_vm15 = vcmp.lt.s32.totalorder %v11272_v7, 0 }
 0x4a4   : > { %v6454_v30 = vsel %vm6452_vm10, %v3142_v55, %v9064_v16  ;;  %v3440_v24 = vsub.s32 4, %v11481_v6  ;;  %v3305_v48 = vmul.u32 %v3298_v20, %v3289_v44  ;;  %vm3307_vm0 = vc.u32 %v11511_v47, %v11501_v35 }
 0x4a5   : > { %v6451_v53 = vsel %vm6449_vm11, %v9062_v34, %v3139_v12  ;;  %v3422_v2 = vclz %v8341_v8  ;;  %v3562_v37 = vand.u32 2147483647, %v11507_v18  ;;  %v8348_v14 = vadd.s32 4294967169, %v3566_v21 }
 0x4a6   : > { %v6455_v46 = vsel %vm6448_vm12, %v6451_v53, %v6454_v30  ;;  %vm3138_vm1 = vcmp.eq.s32.totalorder %v3136_v52, 0  ;;  %vm3141_vm2 = vcmp.eq.s32.totalorder %v3136_v52, 2  ;;  %v3309_v15 = vsel %vm3307_vm0, %v3308_v42, %v11502_v58 }
 0x4a7   : > { %v6456_v26 = vsel %vm3134_vm14, nan, %v6455_v46  ;;  %v8342_v49 = vadd.s32 4294967294, %v3422_v2  ;;  %v3410_v5 = vadd.s32 %v11439_v36, %v11427_v61  ;;  %v3310_v25 = vadd.s32 %v3309_v15, %v3305_v48  ;;  %v11572_v48 = vpop.f32.mrb[42].mxu0 }
 0x4a8   : > { %9065 = vrcp.f32 %v6456_v26  ;;  %v3572_v50 = vadd.s32 1, %v8348_v14  ;;  %v3143_v39 = vsel %vm3141_vm2, %v3142_v55, %v9064_v16  ;;  %v3441_v45 = vsel %vm3356_vm15, %v3440_v24, %v11481_v6 }
 0x4a9   : > { %vm8343_vm3 = vcmp.lt.s32.totalorder %v8342_v49, 0  ;;  %v3140_v56 = vsel %vm3138_vm1, %v9062_v34, %v3139_v12  ;;  %v3311_v3 = vadd.s32 536870912, %v3310_v25  ;;  %v3569_v62 = vand.u32 8388607, %v3562_v37 }
 0x4aa   : > { %v3425_v51 = vsel %vm8343_vm3, 0, %v8342_v49  ;;  %vm3573_vm4 = vcmp.gt.s32.totalorder %v3572_v50, 0  ;;  %vm3137_vm6 = vcmp.lt.s32.totalorder %v3136_v52, 2  ;;  %vm11539_vm5 = vcmp.le.f32.partialorder %v3354_v60, 0.7853982 }
 0x4ab   : > { %v3426_v28 = vsub.s32 32, %v3425_v51  ;;  %v3430_v20 = vsub.s32 4294967266, %v3425_v51  ;;  %v3427_v58 = vshll.u32 %v3418_v1, %v3425_v51  ;;  %v3574_v61 = vsel %vm3573_vm4, %v3572_v50, 0 }
 0x4ac   : > { %v11543_v0 = vshrl.u32 %v3311_v3, 30  ;;  %v3576_v6 = vand.u32 31, %v3574_v61  ;;  %v3144_v10 = vsel %vm3137_vm6, %v3140_v56, %v3143_v39  ;;  %v11547_v9 = vsel %vm11539_vm5, 0, %v3441_v45 }
 0x4ad   : > { %v3428_v38 = vshrl.u32 %v3410_v5, %v3426_v28  ;;  %v3431_v19 = vadd.s32 127, %v3430_v20  ;;  %v3570_v11 = vor.u32 8388608, %v3569_v62  ;;  %v11552_v60 = vadd.f32 %v11268_v22, %v10999_v17 }
 0x4ae   : > { %v3313_v1 = vshll.u32 %v11543_v0, 30  ;;  %v3577_v57 = vsub.s32 32, %v3576_v6  ;;  %v3145_v52 = vsel %vm3134_vm14, nan, %v3144_v10  ;;  %v11557_v12 = vand.u32 3, %v11547_v9 }
 0x4af   : > { %v3429_v32 = vor.u32 %v3428_v38, %v3427_v58  ;;  %v3432_v34 = vshll.u32 %v3431_v19, 23  ;;  %v3306_v53 = vadd.s32 %v11501_v35, %v11511_v47  ;;  %v11566_v46 = vshll.u32 %v3570_v11, 8 }
 0x4b0   : > { %v11559_v8 = vsub.s32 %v3310_v25, %v3313_v1  ;;  %v3580_v17 = vshrl.u32 %v9166_v27, %v3577_v57  ;;  %v3583_v42 = vshrl.u32 %v9167_v29, %v3577_v57  ;;  %v3575_v26 = vshrl.u32 %v3574_v61, 5 }
 0x4b1   : > { %v3433_v16 = vor.u32 4788187, %v3432_v34  ;;  %v3436_v21 = vcvt.s32.f32 %v3429_v32  ;;  %v3586_v49 = vshrl.u32 %v9168_v31, %v3577_v57  ;;  %v3461_v24 = vand.u32 2139095040, %v11552_v60 }
 0x4b2   : > { %v9066_v55 = vpop.eup %9065  ;;  %v3316_v2 = vsub.s32 0, %v11559_v8  ;;  %v3579_v47 = vshll.u32 %v9165_v23, %v3576_v6  ;;  %v3582_v14 = vshll.u32 %v9166_v27, %v3576_v6  ;;  %v3585_v15 = vshll.u32 %v9167_v29, %v3576_v6 }
 0x4b3   : > { %v8050_v30 = vmul.f32 %v9066_v55, %v3145_v52  ;;  %v3434_v44 = vand.u32 2147483647, %v3433_v16  ;;  %v3336_v51 = vsub.s32 4, %v11543_v0  ;;  %v3588_v25 = vshll.u32 %v9168_v31, %v3576_v6 }
 0x4b4   : > { %v8337_v35 = vmin.u32 %v3316_v2, %v11559_v8  ;;  %v3589_v50 = vshrl.u32 %v9169_v33, %v3577_v57  ;;  %v3581_v28 = vor.u32 %v3580_v17, %v3579_v47  ;;  %v3584_v20 = vor.u32 %v3583_v42, %v3582_v14 }
 0x4b5   : > { %8083 = vst.msk [vmem:[%s9829_s16 + $0x80] sm:$0xff] %vm8066_vm13, %v8050_v30  ;;  %v3437_v41 = vmul.f32 %v3436_v21, %v3434_v44  ;;  %v3587_v45 = vor.u32 %v3586_v49, %v3585_v15  ;;  %v3591_v62 = vshll.u32 %v9169_v33, %v3576_v6  ;;  %v3592_v58 = vshrl.u32 %v9170_v40, %v3577_v57 }
 0x4b6   : > { %v3318_v39 = vclz %v8337_v35  ;;  %v3590_v3 = vor.u32 %v3589_v50, %v3588_v25  ;;  %v3578_v61 = vshrl.u32 %v9165_v23, %v3577_v57  ;;  %vm3594_vm7 = vcmp.lt.s32.totalorder %v3575_v26, 1 }
 0x4b7   : > { %v3438_v5 = vxor.u32 2147483648, %v3437_v41  ;;  %v3593_v10 = vor.u32 %v3592_v58, %v3591_v62  ;;  %vm3596_vm8 = vcmp.lt.s32.totalorder %v3575_v26, 3  ;;  %vm3597_vm9 = vcmp.lt.s32.totalorder %v3575_v26, 4 }
 0x4b8   : > { %v8338_v19 = vadd.s32 4294967294, %v3318_v39  ;;  %v3598_v32 = vsel %vm3594_vm7, %v3578_v61, %v3581_v28  ;;  %v3599_v6 = vsel %vm3597_vm9, %v3587_v45, 2102212464  ;;  %v3602_v36 = vsel %vm3594_vm7, %v3581_v28, %v3584_v20 }
 0x4b9   : > { %v3439_v56 = vsel %vm3356_vm15, %v3438_v5, %v3437_v41  ;;  %v3600_v1 = vsel %vm3596_vm8, %v3584_v20, %v3599_v6  ;;  %v3603_v11 = vsel %vm3597_vm9, %v3590_v3, 920167782  ;;  %vm3595_vm11 = vcmp.lt.s32.totalorder %v3575_v26, 2 }
 0x4ba   : > { %v3442_v38 = vsel %vm11539_vm5, %v11272_v7, %v3439_v56  ;;  %vm8339_vm10 = vcmp.lt.s32.totalorder %v8338_v19, 0  ;;  %v3601_v52 = vsel %vm3595_vm11, %v3598_v32, %v3600_v1  ;;  %v3604_v30 = vsel %vm3596_vm8, %v3587_v45, %v3603_v11 }
 0x4bb   : > { %9067 = vcosq.f32 %v3442_v38  ;;  %v3321_v34 = vsel %vm8339_vm10, 0, %v8338_v19  ;;  %v3606_v44 = vsel %vm3594_vm7, %v3584_v20, %v3587_v45  ;;  %v3607_v21 = vsel %vm3597_vm9, %v3593_v10, 1326507024 }
 0x4bc   : > { %9069 = vsinq.f32 %v3442_v38  ;;  %v3322_v16 = vsub.s32 32, %v3321_v34  ;;  %v3323_v57 = vshll.u32 %v11559_v8, %v3321_v34  ;;  %v3326_v55 = vsub.s32 4294967266, %v3321_v34 }
 0x4bd   : > { %v3605_v42 = vsel %vm3595_vm11, %v3602_v36, %v3604_v30  ;;  %v3608_v41 = vsel %vm3596_vm8, %v3590_v3, %v3607_v21  ;;  %v3462_v8 = vshrl.u32 %v3461_v24, 23  ;;  %v3447_v50 = vadd.s32 3, %v11547_v9 }
 0x4be   : > { %v3324_v2 = vshrl.u32 %v3306_v53, %v3322_v16  ;;  %v3327_v17 = vadd.s32 127, %v3326_v55  ;;  %v3609_v49 = vsel %vm3595_vm11, %v3606_v44, %v3608_v41  ;;  %vm11611_vm12 = vcmp.le.f32.partialorder %v3250_v59, 0.7853982 }
 0x4bf   : > { %v11600_v35 = vmul.u32.u64.low %v11566_v46, %v3605_v42  ;;  %v11601_v47 = vmul.u32.u64.high %v11566_v46, %v3605_v42, %v11600_v35  ;;  %v11605_v5 = vmul.u32.u64.low %v11566_v46, %v3609_v49  ;;  %v11606_v25 = vmul.u32.u64.high %v11566_v46, %v3609_v49, %v11605_v5 }
 0x4c0   : > { %v3325_v14 = vor.u32 %v3324_v2, %v3323_v57  ;;  %v3328_v15 = vshll.u32 %v3327_v17, 23  ;;  %vm3252_vm14 = vcmp.lt.s32.totalorder %v11304_v63, 0  ;;  %v8344_v26 = vadd.s32 4294967169, %v3462_v8 }
 0x4c1   : > { %vm6758_vm15 = vcmp.eq.s32.totalorder %v11557_v12, 0  ;;  %vm6761_vm0 = vcmp.eq.s32.totalorder %v11557_v12, 2  ;;  %v11620_v39 = vadd.f32 %v11268_v22, %v11145_v4  ;;  %v3337_v59 = vsel %vm3252_vm14, %v3336_v51, %v11543_v0 }
 0x4c2   : > { %v3329_v24 = vor.u32 4788187, %v3328_v15  ;;  %v3617_v9 = vmul.u32 %v11566_v46, %v3601_v52  ;;  %v3620_v20 = vadd.s32 1, %v11601_v47  ;;  %v3468_v45 = vadd.s32 1, %v8344_v26 }
 0x4c3   : > { %v3332_v58 = vcvt.s32.f32 %v3325_v14  ;;  %vm3619_vm1 = vc.u32 %v11606_v25, %v11600_v35  ;;  %v3458_v22 = vand.u32 2147483647, %v11552_v60  ;;  %v3339_v51 = vsel %vm11611_vm12, 0, %v3337_v59 }
 0x4c4   : > { %v3330_v62 = vand.u32 2147483647, %v3329_v24  ;;  %v3621_v4 = vsel %vm3619_vm1, %v3620_v20, %v11601_v47  ;;  %vm3469_vm2 = vcmp.gt.s32.totalorder %v3468_v45, 0  ;;  %v3448_v61 = vand.u32 3, %v3447_v50 }
 0x4c5   : > { %v9068_v28 = vpop.eup %9067  ;;  %v3622_v19 = vadd.s32 %v3621_v4, %v3617_v9  ;;  %vm6757_vm3 = vcmp.lt.s32.totalorder %v11557_v12, 2  ;;  %v3470_v32 = vsel %vm3469_vm2, %v3468_v45, 0  ;;  %vm3446_vm4 = vweird.f32 %v11272_v7 }
 0x4c6   : > { %v9070_v56 = vpop.eup %9069  ;;  %v3454_v3 = vxor.u32 2147483648, %v9068_v28  ;;  %v3333_v46 = vmul.f32 %v3332_v58, %v3330_v62  ;;  %v3343_v11 = vadd.s32 3, %v3339_v51  ;;  %v3465_v16 = vand.u32 8388607, %v3458_v22 }
 0x4c7   : > { %v3451_v38 = vxor.u32 2147483648, %v9070_v56  ;;  %v3623_v1 = vadd.s32 536870912, %v3622_v19  ;;  %v3472_v57 = vand.u32 31, %v3470_v32  ;;  %v3773_v52 = vand.u32 2139095040, %v11620_v39 }
 0x4c8   : > { %v6763_v0 = vsel %vm6761_vm0, %v3454_v3, %v9070_v56  ;;  %v3334_v34 = vxor.u32 2147483648, %v3333_v46  ;;  %vm3450_vm6 = vcmp.eq.s32.totalorder %v3448_v61, 0  ;;  %vm3453_vm5 = vcmp.eq.s32.totalorder %v3448_v61, 2 }
 0x4c9   : > { %v6760_v10 = vsel %vm6758_vm15, %v9068_v28, %v3451_v38  ;;  %v11645_v12 = vshrl.u32 %v3623_v1, 30  ;;  %v3473_v44 = vsub.s32 32, %v3472_v57  ;;  %v3452_v21 = vsel %vm3450_vm6, %v9068_v28, %v3451_v38 }
 0x4ca   : > { %v6764_v6 = vsel %vm6757_vm3, %v6760_v10, %v6763_v0  ;;  %v3335_v55 = vsel %vm3252_vm14, %v3334_v34, %v3333_v46  ;;  %v3455_v2 = vsel %vm3453_vm5, %v3454_v3, %v9070_v56  ;;  %vm3449_vm7 = vcmp.lt.s32.totalorder %v3448_v61, 2  ;;  %v11671_v56 = vpop.f32.mrb[43].mxu0 }
 0x4cb   : > { %v6765_v36 = vsel %vm3446_vm4, nan, %v6764_v6  ;;  %v3338_v30 = vsel %vm11611_vm12, %v11304_v63, %v3335_v55  ;;  %v3625_v17 = vshll.u32 %v11645_v12, 30  ;;  %v11652_v42 = vand.u32 3, %v3339_v51 }
 0x4cc   : > { %9071 = vrcp.f32 %v6765_v36  ;;  %v11654_v41 = vand.u32 3, %v3343_v11  ;;  %v3466_v47 = vor.u32 8388608, %v3465_v16  ;;  %v3774_v8 = vshrl.u32 %v3773_v52, 23 }
 0x4cd   : > { %9073 = vcosq.f32 %v3338_v30  ;;  %v11656_v49 = vsub.s32 %v3622_v19, %v3625_v17  ;;  %v3456_v14 = vsel %vm3449_vm7, %v3452_v21, %v3455_v2  ;;  %v3476_v15 = vshrl.u32 %v9166_v27, %v3473_v44 }
 0x4ce   : > { %9075 = vsinq.f32 %v3338_v30  ;;  %v3479_v5 = vshrl.u32 %v9167_v29, %v3473_v44  ;;  %v3485_v50 = vshrl.u32 %v9169_v33, %v3473_v44  ;;  %v11662_v26 = vshrl.u32 %v3470_v32, 5 }
 0x4cf   : > { %v3628_v53 = vsub.s32 0, %v11656_v49  ;;  %v3482_v24 = vshrl.u32 %v9168_v31, %v3473_v44  ;;  %v3484_v28 = vshll.u32 %v9168_v31, %v3472_v57  ;;  %vm6655_vm8 = vcmp.eq.s32.totalorder %v11652_v42, 0 }
 0x4d0   : > { %v3475_v59 = vshll.u32 %v9165_v23, %v3472_v57  ;;  %v3478_v9 = vshll.u32 %v9166_v27, %v3472_v57  ;;  %v3487_v20 = vshll.u32 %v9169_v33, %v3472_v57  ;;  %v3488_v45 = vshrl.u32 %v9170_v40, %v3473_v44 }
 0x4d1   : > { %vm6654_vm9 = vcmp.lt.s32.totalorder %v11652_v42, 2  ;;  %vm6658_vm10 = vcmp.eq.s32.totalorder %v11652_v42, 2  ;;  %v8349_v3 = vmin.u32 %v3628_v53, %v11656_v49  ;;  %v3481_v62 = vshll.u32 %v9167_v29, %v3472_v57 }
 0x4d2   : > { %v3486_v58 = vor.u32 %v3485_v50, %v3484_v28  ;;  %vm3342_vm11 = vweird.f32 %v11304_v63  ;;  %v3477_v38 = vor.u32 %v3476_v15, %v3475_v59  ;;  %v3480_v4 = vor.u32 %v3479_v5, %v3478_v9 }
 0x4d3   : > { %v3489_v0 = vor.u32 %v3488_v45, %v3487_v20  ;;  %v11678_v46 = vshll.u32 %v3466_v47, 8  ;;  %v3457_v19 = vsel %vm3446_vm4, nan, %v3456_v14  ;;  %v3618_v61 = vadd.s32 %v11600_v35, %v11606_v25 }
 0x4d4   : > { %v3630_v10 = vclz %v8349_v3  ;;  %v3483_v32 = vor.u32 %v3482_v24, %v3481_v62  ;;  %vm3349_vm12 = vcmp.eq.s32.totalorder %v11654_v41, 2  ;;  %vm3564_vm14 = vcmp.lt.s32.totalorder %v11507_v18, 0 }
 0x4d5   : > { %v3648_v34 = vsub.s32 4, %v11645_v12  ;;  %vm3493_vm15 = vcmp.lt.s32.totalorder %v11662_v26, 4  ;;  %v8356_v1 = vadd.s32 4294967169, %v3774_v8  ;;  %vm3346_vm0 = vcmp.eq.s32.totalorder %v11654_v41, 0 }
 0x4d6   : > { %v9072_v51 = vpop.eup %9071  ;;  %v8350_v7 = vadd.s32 4294967294, %v3630_v10  ;;  %v3474_v11 = vshrl.u32 %v9165_v23, %v3473_v44  ;;  %vm3490_vm1 = vcmp.lt.s32.totalorder %v11662_v26, 1  ;;  %v3499_v35 = vsel %vm3493_vm15, %v3486_v58, 920167782 }
 0x4d7   : > { %v8053_v6 = vmul.f32 %v9072_v51, %v3457_v19  ;;  %v9074_v36 = vpop.eup %9073  ;;  %vm3492_vm2 = vcmp.lt.s32.totalorder %v11662_v26, 3  ;;  %v3498_v57 = vsel %vm3490_vm1, %v3477_v38, %v3480_v4  ;;  %v3503_v55 = vsel %vm3493_vm15, %v3489_v0, 1326507024 }
 0x4d8   : > { %v9076_v25 = vpop.eup %9075  ;;  %v3350_v16 = vxor.u32 2147483648, %v9074_v36  ;;  %vm8351_vm3 = vcmp.lt.s32.totalorder %v8350_v7, 0  ;;  %v3500_v30 = vsel %vm3492_vm2, %v3483_v32, %v3499_v35  ;;  %v3502_v44 = vsel %vm3490_vm1, %v3480_v4, %v3483_v32 }
 0x4d9   : > { %8086 = vst.msk [vmem:[%s9829_s16 + $0x98] sm:$0xff] %vm8066_vm13, %v8053_v6  ;;  %v3347_v52 = vxor.u32 2147483648, %v9076_v25  ;;  %v3633_v2 = vsel %vm8351_vm3, 0, %v8350_v7  ;;  %v3495_v17 = vsel %vm3493_vm15, %v3483_v32, 2102212464  ;;  %v3504_v47 = vsel %vm3492_vm2, %v3486_v58, %v3503_v55 }
 0x4da   : > { %v6660_v21 = vsel %vm6658_vm10, %v3350_v16, %v9076_v25  ;;  %v3634_v14 = vsub.s32 32, %v3633_v2  ;;  %vm3491_vm4 = vcmp.lt.s32.totalorder %v11662_v26, 2  ;;  %v3494_v15 = vsel %vm3490_vm1, %v3474_v11, %v3477_v38 }
 0x4db   : > { %v6657_v8 = vsel %vm6655_vm8, %v9074_v36, %v3347_v52  ;;  %v3638_v50 = vsub.s32 4294967266, %v3633_v2  ;;  %v3501_v53 = vsel %vm3491_vm4, %v3498_v57, %v3500_v30  ;;  %v3505_v24 = vsel %vm3491_vm4, %v3502_v44, %v3504_v47 }
 0x4dc   : > { %v6661_v5 = vsel %vm6654_vm9, %v6657_v8, %v6660_v21  ;;  %v3635_v59 = vshll.u32 %v11656_v49, %v3633_v2  ;;  %v3636_v9 = vshrl.u32 %v3618_v61, %v3634_v14  ;;  %v3496_v20 = vsel %vm3492_vm2, %v3480_v4, %v3495_v17 }
 0x4dd   : > { %v6662_v28 = vsel %vm3342_vm11, nan, %v6661_v5  ;;  %v3639_v45 = vadd.s32 127, %v3638_v50  ;;  %v11727_v42 = vmul.u32.u64.low %v11678_v46, %v3505_v24  ;;  %v11728_v3 = vmul.u32.u64.high %v11678_v46, %v3505_v24, %v11727_v42 }
 0x4de   : > { %9077 = vrcp.f32 %v6662_v28  ;;  %v3351_v62 = vsel %vm3349_vm12, %v3350_v16, %v9076_v25  ;;  %v3649_v58 = vsel %vm3564_vm14, %v3648_v34, %v11645_v12  ;;  %v3348_v4 = vsel %vm3346_vm0, %v9074_v36, %v3347_v52 }
 0x4df   : > { %v11736_v38 = vmul.u32.u64.low %v11678_v46, %v3501_v53  ;;  %v11737_v49 = vmul.u32.u64.high %v11678_v46, %v3501_v53, %v11736_v38  ;;  %v3637_v0 = vor.u32 %v3636_v9, %v3635_v59  ;;  %v3640_v51 = vshll.u32 %v3639_v45, 23 }
 0x4e0   : > { %v3780_v19 = vadd.s32 1, %v8356_v1  ;;  %vm3345_vm6 = vcmp.lt.s32.totalorder %v11654_v41, 2  ;;  %vm11745_vm5 = vcmp.le.f32.partialorder %v3562_v37, 0.7853982  ;;  %v3497_v12 = vsel %vm3491_vm4, %v3494_v15, %v3496_v20 }
 0x4e1   : > { %v3641_v10 = vor.u32 4788187, %v3640_v51  ;;  %vm3515_vm7 = vc.u32 %v11728_v3, %v11736_v38  ;;  %v3770_v32 = vand.u32 2147483647, %v11620_v39  ;;  %v3352_v6 = vsel %vm3345_vm6, %v3348_v4, %v3351_v62  ;;  %v11788_v4 = vld [vmem:[%s12814_s6] ss:$0 sm:$0xff] }
 0x4e2   : > { %vm3781_vm8 = vcmp.gt.s32.totalorder %v3780_v19, 0  ;;  %v3651_v41 = vsel %vm11745_vm5, 0, %v3649_v58  ;;  %v3516_v34 = vadd.s32 1, %v11737_v49  ;;  %v3644_v36 = vcvt.s32.f32 %v3637_v0 }
 0x4e3   : > { %v3782_v37 = vsel %vm3781_vm8, %v3780_v19, 0  ;;  %v3642_v1 = vand.u32 2147483647, %v3641_v10  ;;  %v3513_v7 = vmul.u32 %v11678_v46, %v3497_v12  ;;  %v3777_v16 = vand.u32 8388607, %v3770_v32  ;;  %v11798_v10 = vpop.f32.mrb[44].mxu0 }
 0x4e4   : > { %v3784_v26 = vand.u32 31, %v3782_v37  ;;  %v3517_v11 = vsel %vm3515_vm7, %v3516_v34, %v11737_v49  ;;  %v3353_v55 = vsel %vm3342_vm11, nan, %v3352_v6  ;;  %v3655_v52 = vadd.s32 3, %v3651_v41 }
 0x4e5   : > { %v3645_v35 = vmul.f32 %v3644_v36, %v3642_v1  ;;  %v3518_v25 = vadd.s32 %v3517_v11, %v3513_v7  ;;  %v11763_v30 = vshrl.u32 %v3782_v37, 5  ;;  %v11792_v0 = vadd.f32 %v11788_v4, %v11223_v43 }
 0x4e6   : > { %v3785_v57 = vsub.s32 32, %v3784_v26  ;;  %v3787_v44 = vshll.u32 %v9165_v23, %v3784_v26  ;;  %v3796_v47 = vshll.u32 %v9168_v31, %v3784_v26  ;;  %v3790_v53 = vshll.u32 %v9166_v27, %v3784_v26 }
 0x4e7   : > { %v3646_v46 = vxor.u32 2147483648, %v3645_v35  ;;  %v3519_v2 = vadd.s32 536870912, %v3518_v25  ;;  %v3793_v59 = vshll.u32 %v9167_v29, %v3784_v26  ;;  %v3799_v20 = vshll.u32 %v9169_v33, %v3784_v26 }
 0x4e8   : > { %v9078_v21 = vpop.eup %9077  ;;  %v3788_v17 = vshrl.u32 %v9166_v27, %v3785_v57  ;;  %v3791_v14 = vshrl.u32 %v9167_v29, %v3785_v57  ;;  %v3794_v15 = vshrl.u32 %v9168_v31, %v3785_v57  ;;  %v3797_v63 = vshrl.u32 %v9169_v33, %v3785_v57 }
 0x4e9   : > { %v8052_v8 = vmul.f32 %v9078_v21, %v3353_v55  ;;  %v3647_v5 = vsel %vm3564_vm14, %v3646_v46, %v3645_v35  ;;  %v11773_v50 = vshrl.u32 %v3519_v2, 30  ;;  %v3800_v24 = vshrl.u32 %v9170_v40, %v3785_v57 }
 0x4ea   : > { %v3650_v28 = vsel %vm11745_vm5, %v11507_v18, %v3647_v5  ;;  %v3798_v9 = vor.u32 %v3797_v63, %v3796_v47  ;;  %v3789_v42 = vor.u32 %v3788_v17, %v3787_v44  ;;  %v3792_v62 = vor.u32 %v3791_v14, %v3790_v53 }
 0x4eb   : > { %8085 = vst.msk [vmem:[%s9829_s16 + $0x90] sm:$0xff] %vm8066_vm13, %v8052_v8  ;;  %9079 = vcosq.f32 %v3650_v28  ;;  %v3521_v45 = vshll.u32 %v11773_v50, 30  ;;  %v3795_v58 = vor.u32 %v3794_v15, %v3793_v59  ;;  %v3801_v49 = vor.u32 %v3800_v24, %v3799_v20 }
 0x4ec   : > { %9081 = vsinq.f32 %v3650_v28  ;;  %vm3805_vm9 = vcmp.lt.s32.totalorder %v11763_v30, 4  ;;  %v6962_v19 = vand.u32 3, %v3651_v41  ;;  %v3778_v61 = vor.u32 8388608, %v3777_v16 }
 0x4ed   : > { %v11794_v51 = vsub.s32 %v3518_v25, %v3521_v45  ;;  %vm3802_vm10 = vcmp.lt.s32.totalorder %v11763_v30, 1  ;;  %v3811_v12 = vsel %vm3805_vm9, %v3798_v9, 920167782  ;;  %v11800_v6 = vand.u32 3, %v3655_v52 }
 0x4ee   : > { %vm3804_vm11 = vcmp.lt.s32.totalorder %v11763_v30, 3  ;;  %v3810_v43 = vsel %vm3802_vm10, %v3789_v42, %v3792_v62  ;;  %v3807_v37 = vsel %vm3805_vm9, %v3795_v58, 2102212464  ;;  %v3815_v41 = vsel %vm3805_vm9, %v3801_v49, 1326507024 }
 0x4ef   : > { %v3524_v34 = vsub.s32 0, %v11794_v51  ;;  %v3812_v1 = vsel %vm3804_vm11, %v3795_v58, %v3811_v12  ;;  %v3669_v36 = vand.u32 2139095040, %v11792_v0  ;;  %vm3460_vm12 = vcmp.lt.s32.totalorder %v11552_v60, 0 }
 0x4f0   : > { %v3786_v26 = vshrl.u32 %v9165_v23, %v3785_v57  ;;  %vm3803_vm14 = vcmp.lt.s32.totalorder %v11763_v30, 2  ;;  %v3814_v11 = vsel %vm3802_vm10, %v3792_v62, %v3795_v58  ;;  %vm3654_vm15 = vweird.f32 %v11507_v18 }
 0x4f1   : > { %v8345_v7 = vmin.u32 %v3524_v34, %v11794_v51  ;;  %vm6963_vm0 = vcmp.lt.s32.totalorder %v6962_v19, 2  ;;  %v3813_v35 = vsel %vm3803_vm14, %v3810_v43, %v3812_v1  ;;  %v3816_v25 = vsel %vm3804_vm11, %v3798_v9, %v3815_v41 }
 0x4f2   : > { %v3818_v16 = vshll.u32 %v3778_v61, 8  ;;  %vm6964_vm1 = vcmp.eq.s32.totalorder %v6962_v19, 0  ;;  %v3806_v57 = vsel %vm3802_vm10, %v3786_v26, %v3789_v42  ;;  %v3808_v52 = vsel %vm3804_vm11, %v3792_v62, %v3807_v37 }
 0x4f3   : > { %v3526_v55 = vclz %v8345_v7  ;;  %vm11826_vm2 = vcmp.le.f32.partialorder %v3458_v22, 0.7853982  ;;  %v3817_v21 = vsel %vm3803_vm14, %v3814_v11, %v3816_v25  ;;  %v3670_v17 = vshrl.u32 %v3669_v36, 23 }
 0x4f4   : > { %v11832_v46 = vmul.u32.u64.low %v3818_v16, %v3813_v35  ;;  %v11833_v2 = vmul.u32.u64.high %v3818_v16, %v3813_v35, %v11832_v46  ;;  %vm6967_vm3 = vcmp.eq.s32.totalorder %v6962_v19, 2  ;;  %vm3658_vm4 = vcmp.eq.s32.totalorder %v11800_v6, 0 }
 0x4f5   : > { %v9080_v47 = vpop.eup %9079  ;;  %v8346_v8 = vadd.s32 4294967294, %v3526_v55  ;;  %v11836_v14 = vmul.u32.u64.low %v3818_v16, %v3817_v21  ;;  %v11837_v15 = vmul.u32.u64.high %v3818_v16, %v3817_v21, %v11836_v14  ;;  %vm3661_vm6 = vcmp.eq.s32.totalorder %v11800_v6, 2 }
 0x4f6   : > { %v9082_v63 = vpop.eup %9081  ;;  %v3662_v22 = vxor.u32 2147483648, %v9080_v47  ;;  %v3544_v5 = vsub.s32 4, %v11773_v50  ;;  %v3809_v24 = vsel %vm3803_vm14, %v3806_v57, %v3808_v52  ;;  %v11846_v28 = vadd.f32 %v11788_v4, %v11374_v54 }
 0x4f7   : > { %v3659_v53 = vxor.u32 2147483648, %v9082_v63  ;;  %vm8347_vm5 = vcmp.lt.s32.totalorder %v8346_v8, 0  ;;  %v3828_v20 = vadd.s32 1, %v11833_v2  ;;  %v8352_v45 = vadd.s32 4294967169, %v3670_v17 }
 0x4f8   : > { %v6969_v59 = vsel %vm6967_vm3, %v3662_v22, %v9082_v63  ;;  %v3529_v9 = vsel %vm8347_vm5, 0, %v8346_v8  ;;  %v3514_v62 = vadd.s32 %v11736_v38, %v11728_v3  ;;  %v3666_v49 = vand.u32 2147483647, %v11792_v0 }
 0x4f9   : > { %v6966_v42 = vsel %vm6964_vm1, %v9080_v47, %v3659_v53  ;;  %v3530_v58 = vsub.s32 32, %v3529_v9  ;;  %v3534_v61 = vsub.s32 4294967266, %v3529_v9  ;;  %v3545_v54 = vsel %vm3460_vm12, %v3544_v5, %v11773_v50 }
 0x4fa   : > { %v6970_v30 = vsel %vm6963_vm0, %v6966_v42, %v6969_v59  ;;  %v3825_v12 = vmul.u32 %v3818_v16, %v3809_v24  ;;  %v3531_v43 = vshll.u32 %v11794_v51, %v3529_v9  ;;  %vm3827_vm7 = vc.u32 %v11837_v15, %v11832_v46 }
 0x4fb   : > { %v6971_v34 = vsel %vm3654_vm15, nan, %v6970_v30  ;;  %v3532_v37 = vshrl.u32 %v3514_v62, %v3530_v58  ;;  %v3535_v3 = vadd.s32 127, %v3534_v61  ;;  %v3829_v38 = vsel %vm3827_vm7, %v3828_v20, %v11833_v2 }
 0x4fc   : > { %9083 = vrcp.f32 %v6971_v34  ;;  %v3676_v19 = vadd.s32 1, %v8352_v45  ;;  %v3663_v1 = vsel %vm3661_vm6, %v3662_v22, %v9082_v63  ;;  %v3547_v50 = vsel %vm11826_vm2, 0, %v3545_v54  ;;  %v11882_v22 = vpop.f32.mrb[45].mxu0 }
 0x4fd   : > { %v3830_v41 = vadd.s32 %v3829_v38, %v3825_v12  ;;  %v3981_v36 = vand.u32 2139095040, %v11846_v28  ;;  %v3660_v51 = vsel %vm3658_vm4, %v9080_v47, %v3659_v53  ;;  %v3533_v7 = vor.u32 %v3532_v37, %v3531_v43 }
 0x4fe   : > { %v3536_v26 = vshll.u32 %v3535_v3, 23  ;;  %vm3677_vm8 = vcmp.gt.s32.totalorder %v3676_v19, 0  ;;  %vm3657_vm9 = vcmp.lt.s32.totalorder %v11800_v6, 2  ;;  %v3551_v16 = vadd.s32 3, %v3547_v50 }
 0x4ff   : > { %v3831_v11 = vadd.s32 536870912, %v3830_v41  ;;  %v3678_v35 = vsel %vm3677_vm8, %v3676_v19, 0  ;;  %v3673_v55 = vand.u32 8388607, %v3666_v49  ;;  %v3664_v52 = vsel %vm3657_vm9, %v3660_v51, %v3663_v1 }
 0x500   : > { %v3537_v25 = vor.u32 4788187, %v3536_v26  ;;  %v3680_v57 = vand.u32 31, %v3678_v35  ;;  %v3540_v17 = vcvt.s32.f32 %v3533_v7  ;;  %v3982_v47 = vshrl.u32 %v3981_v36, 23 }
 0x501   : > { %v11873_v21 = vshrl.u32 %v3831_v11, 30  ;;  %v11875_v14 = vand.u32 3, %v3547_v50  ;;  %v11880_v6 = vadd.f32 %v11788_v4, %v11470_v13  ;;  %v11884_v53 = vand.u32 3, %v3551_v16 }
 0x502   : > { %v3538_v2 = vand.u32 2147483647, %v3537_v25  ;;  %v3681_v8 = vsub.s32 32, %v3680_v57  ;;  %v3674_v24 = vor.u32 8388608, %v3673_v55  ;;  %v3665_v9 = vsel %vm3654_vm15, nan, %v3664_v52 }
 0x503   : > { %v3833_v63 = vshll.u32 %v11873_v21, 30  ;;  %v3683_v58 = vshll.u32 %v9165_v23, %v3680_v57  ;;  %v8364_v61 = vadd.s32 4294967169, %v3982_v47  ;;  %v3686_v18 = vshll.u32 %v9166_v27, %v3680_v57 }
 0x504   : > { %v3541_v5 = vmul.f32 %v3540_v17, %v3538_v2  ;;  %v3684_v59 = vshrl.u32 %v9166_v27, %v3681_v8  ;;  %v3687_v45 = vshrl.u32 %v9167_v29, %v3681_v8  ;;  %v3690_v42 = vshrl.u32 %v9168_v31, %v3681_v8 }
 0x505   : > { %v11889_v20 = vsub.s32 %v3830_v41, %v3833_v63  ;;  %v3693_v30 = vshrl.u32 %v9169_v33, %v3681_v8  ;;  %v3689_v34 = vshll.u32 %v9167_v29, %v3680_v57  ;;  %v3679_v37 = vshrl.u32 %v3678_v35, 5 }
 0x506   : > { %v9084_v13 = vpop.eup %9083  ;;  %v3542_v62 = vxor.u32 2147483648, %v3541_v5  ;;  %v3685_v3 = vor.u32 %v3684_v59, %v3683_v58  ;;  %v3692_v38 = vshll.u32 %v9168_v31, %v3680_v57  ;;  %v3688_v50 = vor.u32 %v3687_v45, %v3686_v18 }
 0x507   : > { %v8055_v54 = vmul.f32 %v9084_v13, %v3665_v9  ;;  %v3836_v12 = vsub.s32 0, %v11889_v20  ;;  %v3691_v41 = vor.u32 %v3690_v42, %v3689_v34  ;;  %v3695_v51 = vshll.u32 %v9169_v33, %v3680_v57 }
 0x508   : > { %v3543_v43 = vsel %vm3460_vm12, %v3542_v62, %v3541_v5  ;;  %v3694_v36 = vor.u32 %v3693_v30, %v3692_v38  ;;  %v3696_v7 = vshrl.u32 %v9170_v40, %v3681_v8  ;;  %vm3772_vm10 = vcmp.lt.s32.totalorder %v11620_v39, 0 }
 0x509   : > { %8088 = vst.msk [vmem:[%s9829_s16 + $0xa8] sm:$0xff] %vm8066_vm13, %v8055_v54  ;;  %v3546_v19 = vsel %vm11826_vm2, %v11552_v60, %v3543_v43  ;;  %v8357_v1 = vmin.u32 %v3836_v12, %v11889_v20  ;;  %v3826_v26 = vadd.s32 %v11832_v46, %v11837_v15  ;;  %v3714_v35 = vshll.u32 %v3674_v24, 8 }
 0x50a   : > { %9085 = vcosq.f32 %v3546_v19  ;;  %v3856_v44 = vsub.s32 4, %v11873_v21  ;;  %v3682_v25 = vshrl.u32 %v9165_v23, %v3681_v8  ;;  %v3697_v16 = vor.u32 %v3696_v7, %v3695_v51 }
 0x50b   : > { %9087 = vsinq.f32 %v3546_v19  ;;  %v3838_v11 = vclz %v8357_v1  ;;  %v3988_v55 = vadd.s32 1, %v8364_v61  ;;  %vm3698_vm11 = vcmp.lt.s32.totalorder %v3679_v37, 1 }
 0x50c   : > { %vm3700_vm12 = vcmp.lt.s32.totalorder %v3679_v37, 3  ;;  %vm3701_vm14 = vcmp.lt.s32.totalorder %v3679_v37, 4  ;;  %v3706_v2 = vsel %vm3698_vm11, %v3685_v3, %v3688_v50  ;;  %v3710_v47 = vsel %vm3698_vm11, %v3688_v50, %v3691_v41 }
 0x50d   : > { %v8358_v52 = vadd.s32 4294967294, %v3838_v11  ;;  %v3703_v57 = vsel %vm3701_vm14, %v3691_v41, 2102212464  ;;  %v3707_v17 = vsel %vm3701_vm14, %v3694_v36, 920167782  ;;  %vm3699_vm1 = vcmp.lt.s32.totalorder %v3679_v37, 2 }
 0x50e   : > { %vm11916_vm15 = vcmp.le.f32.partialorder %v3770_v32, 0.7853982  ;;  %v3708_v15 = vsel %vm3700_vm12, %v3691_v41, %v3707_v17  ;;  %v3711_v8 = vsel %vm3701_vm14, %v3697_v16, 1326507024  ;;  %v3702_v5 = vsel %vm3698_vm11, %v3682_v25, %v3685_v3 }
 0x50f   : > { %vm8359_vm0 = vcmp.lt.s32.totalorder %v8358_v52, 0  ;;  %v3709_v24 = vsel %vm3699_vm1, %v3706_v2, %v3708_v15  ;;  %v3712_v59 = vsel %vm3700_vm12, %v3694_v36, %v3711_v8  ;;  %vm3550_vm2 = vweird.f32 %v11552_v60 }
 0x510   : > { %v3841_v63 = vsel %vm8359_vm0, 0, %v8358_v52  ;;  %v3704_v32 = vsel %vm3700_vm12, %v3688_v50, %v3703_v57  ;;  %v3713_v42 = vsel %vm3699_vm1, %v3710_v47, %v3712_v59  ;;  %vm3989_vm3 = vcmp.gt.s32.totalorder %v3988_v55, 0 }
 0x511   : > { %v3842_v9 = vsub.s32 32, %v3841_v63  ;;  %v3846_v45 = vsub.s32 4294967266, %v3841_v63  ;;  %v11926_v13 = vmul.u32.u64.low %v3714_v35, %v3713_v42  ;;  %v11927_v62 = vmul.u32.u64.high %v3714_v35, %v3713_v42, %v11926_v13 }
 0x512   : > { %v11929_v58 = vmul.u32.u64.low %v3714_v35, %v3709_v24  ;;  %v11930_v30 = vmul.u32.u64.high %v3714_v35, %v3709_v24, %v11929_v58  ;;  %v3843_v61 = vshll.u32 %v11889_v20, %v3841_v63  ;;  %vm6860_vm4 = vcmp.lt.s32.totalorder %v11875_v14, 2 }
 0x513   : > { %v3844_v54 = vshrl.u32 %v3826_v26, %v3842_v9  ;;  %v3847_v12 = vadd.s32 127, %v3846_v45  ;;  %vm6861_vm6 = vcmp.eq.s32.totalorder %v11875_v14, 0  ;;  %v3857_v34 = vsel %vm3772_vm10, %v3856_v44, %v11873_v21 }
 0x514   : > { %v9086_v18 = vpop.eup %9085  ;;  %v3705_v43 = vsel %vm3699_vm1, %v3702_v5, %v3704_v32  ;;  %v3990_v50 = vsel %vm3989_vm3, %v3988_v55, 0  ;;  %vm6864_vm5 = vcmp.eq.s32.totalorder %v11875_v14, 2  ;;  %vm3723_vm7 = vc.u32 %v11927_v62, %v11929_v58 }
 0x515   : > { %v9088_v3 = vpop.eup %9087  ;;  %v3558_v38 = vxor.u32 2147483648, %v9086_v18  ;;  %v3845_v19 = vor.u32 %v3844_v54, %v3843_v61  ;;  %v3848_v1 = vshll.u32 %v3847_v12, 23  ;;  %v3724_v41 = vadd.s32 1, %v11930_v30 }
 0x516   : > { %v3555_v20 = vxor.u32 2147483648, %v9088_v3  ;;  %v3721_v7 = vmul.u32 %v3714_v35, %v3705_v43  ;;  %v3978_v21 = vand.u32 2147483647, %v11846_v28  ;;  %v3859_v26 = vsel %vm11916_vm15, 0, %v3857_v34 }
 0x517   : > { %v6866_v36 = vsel %vm6864_vm5, %v3558_v38, %v9088_v3  ;;  %v3849_v51 = vor.u32 4788187, %v3848_v1  ;;  %v3725_v11 = vsel %vm3723_vm7, %v3724_v41, %v11930_v30  ;;  %v3992_v44 = vand.u32 31, %v3990_v50 }
 0x518   : > { %v6863_v37 = vsel %vm6861_vm6, %v9086_v18, %v3555_v20  ;;  %vm3553_vm8 = vcmp.lt.s32.totalorder %v11884_v53, 2  ;;  %v3852_v55 = vcvt.s32.f32 %v3845_v19  ;;  %v3726_v52 = vadd.s32 %v3725_v11, %v3721_v7 }
 0x519   : > { %v6867_v25 = vsel %vm6860_vm4, %v6863_v37, %v6866_v36  ;;  %v3850_v16 = vand.u32 2147483647, %v3849_v51  ;;  %vm3554_vm9 = vcmp.eq.s32.totalorder %v11884_v53, 0  ;;  %vm3557_vm11 = vcmp.eq.s32.totalorder %v11884_v53, 2 }
 0x51a   : > { %v6868_v35 = vsel %vm3550_vm2, nan, %v6867_v25  ;;  %v3993_v57 = vsub.s32 32, %v3992_v44  ;;  %v3727_v17 = vadd.s32 536870912, %v3726_v52  ;;  %v3985_v47 = vand.u32 8388607, %v3978_v21 }
 0x51b   : > { %9089 = vrcp.f32 %v6868_v35  ;;  %v3853_v2 = vmul.f32 %v3852_v55, %v3850_v16  ;;  %v3559_v15 = vsel %vm3557_vm11, %v3558_v38, %v9088_v3  ;;  %v3863_v14 = vadd.s32 3, %v3859_v26 }
 0x51c   : > { %v11959_v8 = vand.u32 3, %v3859_v26  ;;  %v11961_v63 = vshrl.u32 %v3990_v50, 5  ;;  %v11963_v24 = vshrl.u32 %v3727_v17, 30  ;;  %v3996_v59 = vshrl.u32 %v9166_v27, %v3993_v57  ;;  %v11984_v50 = vpop.f32.mrb[46].mxu0 }
 0x51d   : > { %v3854_v5 = vxor.u32 2147483648, %v3853_v2  ;;  %v3999_v9 = vshrl.u32 %v9167_v29, %v3993_v57  ;;  %v3556_v45 = vsel %vm3554_vm9, %v9086_v18, %v3555_v20  ;;  %v4002_v32 = vshrl.u32 %v9168_v31, %v3993_v57 }
 0x51e   : > { %v4004_v42 = vshll.u32 %v9168_v31, %v3992_v44  ;;  %v4005_v13 = vshrl.u32 %v9169_v33, %v3993_v57  ;;  %v3729_v61 = vshll.u32 %v11963_v24, 30  ;;  %v3995_v54 = vshll.u32 %v9165_v23, %v3992_v44 }
 0x51f   : > { %v3855_v30 = vsel %vm3772_vm10, %v3854_v5, %v3853_v2  ;;  %v3998_v12 = vshll.u32 %v9166_v27, %v3992_v44  ;;  %v4001_v18 = vshll.u32 %v9167_v29, %v3992_v44  ;;  %v4008_v3 = vshrl.u32 %v9170_v40, %v3993_v57 }
 0x520   : > { %v3858_v34 = vsel %vm11916_vm15, %v11620_v39, %v3855_v30  ;;  %v4006_v43 = vor.u32 %v4005_v13, %v4004_v42  ;;  %v11982_v38 = vsub.s32 %v3726_v52, %v3729_v61  ;;  %v3997_v19 = vor.u32 %v3996_v59, %v3995_v54 }
 0x521   : > { %9091 = vcosq.f32 %v3858_v34  ;;  %v4000_v1 = vor.u32 %v3999_v9, %v3998_v12  ;;  %v3560_v20 = vsel %vm3553_vm8, %v3556_v45, %v3559_v15  ;;  %v4003_v41 = vor.u32 %v4002_v32, %v4001_v18 }
 0x522   : > { %9093 = vsinq.f32 %v3858_v34  ;;  %v4007_v46 = vshll.u32 %v9169_v33, %v3992_v44  ;;  %v3732_v36 = vsub.s32 0, %v11982_v38  ;;  %v3986_v51 = vor.u32 8388608, %v3985_v47 }
 0x523   : > { %vm4013_vm10 = vcmp.lt.s32.totalorder %v11961_v63, 4  ;;  %v3874_v7 = vand.u32 2147483647, %v11880_v6  ;;  %v11992_v37 = vand.u32 3, %v3863_v14  ;;  %vm4010_vm12 = vcmp.lt.s32.totalorder %v11961_v63, 1 }
 0x524   : > { %v4009_v26 = vor.u32 %v4008_v3, %v4007_v46  ;;  %v4019_v53 = vsel %vm4013_vm10, %v4006_v43, 920167782  ;;  %v3561_v44 = vsel %vm3550_vm2, nan, %v3560_v20  ;;  %v8353_v25 = vmin.u32 %v3732_v36, %v11982_v38 }
 0x525   : > { %v9090_v11 = vpop.eup %9089  ;;  %vm4012_vm14 = vcmp.lt.s32.totalorder %v11961_v63, 3  ;;  %v4018_v16 = vsel %vm4010_vm12, %v3997_v19, %v4000_v1  ;;  %vm7170_vm15 = vcmp.eq.s32.totalorder %v11959_v8, 0  ;;  %vm7173_vm0 = vcmp.eq.s32.totalorder %v11959_v8, 2 }
 0x526   : > { %v8054_v55 = vmul.f32 %v9090_v11, %v3561_v44  ;;  %v4020_v52 = vsel %vm4012_vm14, %v4003_v41, %v4019_v53  ;;  %v3877_v35 = vand.u32 2139095040, %v11880_v6  ;;  %vm7169_vm1 = vcmp.lt.s32.totalorder %v11959_v8, 2 }
 0x527   : > { %v3734_v60 = vclz %v8353_v25  ;;  %vm4011_vm2 = vcmp.lt.s32.totalorder %v11961_v63, 2  ;;  %v4015_v2 = vsel %vm4013_vm10, %v4003_v41, 2102212464  ;;  %v4026_v17 = vshll.u32 %v3986_v51, 8 }
 0x528   : > { %8087 = vst.msk [vmem:[%s9829_s16 + $0xa0] sm:$0xff] %vm8066_vm13, %v8054_v55  ;;  %vm3862_vm3 = vweird.f32 %v11620_v39  ;;  %v3994_v47 = vshrl.u32 %v9165_v23, %v3993_v57  ;;  %v4021_v15 = vsel %vm4011_vm2, %v4018_v16, %v4020_v52  ;;  %v4022_v14 = vsel %vm4010_vm12, %v4000_v1, %v4003_v41 }
 0x529   : > { %v4023_v5 = vsel %vm4013_vm10, %v4009_v26, 1326507024  ;;  %v8354_v59 = vadd.s32 4294967294, %v3734_v60  ;;  %v12024_v45 = vmul.u32.u64.low %v4026_v17, %v4021_v15  ;;  %v12025_v32 = vmul.u32.u64.high %v4026_v17, %v4021_v15, %v12024_v45 }
 0x52a   : > { %v4024_v9 = vsel %vm4012_vm14, %v4006_v43, %v4023_v5  ;;  %v4014_v57 = vsel %vm4010_vm12, %v3994_v47, %v3997_v19  ;;  %v4016_v42 = vsel %vm4012_vm14, %v4000_v1, %v4015_v2  ;;  %v3878_v30 = vshrl.u32 %v3877_v35, 23 }
 0x52b   : > { %v4025_v13 = vsel %vm4011_vm2, %v4022_v14, %v4024_v9  ;;  %v9092_v61 = vpop.eup %9091  ;;  %vm3866_vm4 = vcmp.eq.s32.totalorder %v11992_v37, 0  ;;  %vm8355_vm6 = vcmp.lt.s32.totalorder %v8354_v59, 0  ;;  %v3722_v43 = vadd.s32 %v11929_v58, %v11927_v62 }
 0x52c   : > { %v12035_v54 = vmul.u32.u64.low %v4026_v17, %v4025_v13  ;;  %v12036_v12 = vmul.u32.u64.high %v4026_v17, %v4025_v13, %v12035_v54  ;;  %v9094_v34 = vpop.eup %9093  ;;  %v3870_v18 = vxor.u32 2147483648, %v9092_v61  ;;  %v3737_v3 = vsel %vm8355_vm6, 0, %v8354_v59 }
 0x52d   : > { %v8360_v19 = vadd.s32 4294967169, %v3878_v30  ;;  %v3867_v20 = vxor.u32 2147483648, %v9094_v34  ;;  %v3738_v1 = vsub.s32 32, %v3737_v3  ;;  %v3742_v41 = vsub.s32 4294967266, %v3737_v3 }
 0x52e   : > { %v4017_v46 = vsel %vm4011_vm2, %v4014_v57, %v4016_v42  ;;  %vm3869_vm5 = vcmp.eq.s32.totalorder %v11992_v37, 2  ;;  %v7175_v36 = vsel %vm7173_vm0, %v3870_v18, %v9094_v34  ;;  %v4036_v51 = vadd.s32 1, %v12025_v32 }
 0x52f   : > { %v3884_v26 = vadd.s32 1, %v8360_v19  ;;  %v7172_v53 = vsel %vm7170_vm15, %v9092_v61, %v3867_v20  ;;  %v3739_v62 = vshll.u32 %v11982_v38, %v3737_v3  ;;  %v3740_v58 = vshrl.u32 %v3722_v43, %v3738_v1  ;;  %v12086_v3 = vpop.f32.mrb[47].mxu0 }
 0x530   : > { %v3743_v11 = vadd.s32 127, %v3742_v41  ;;  %v7176_v44 = vsel %vm7169_vm1, %v7172_v53, %v7175_v36  ;;  %v3752_v63 = vsub.s32 4, %v11963_v24  ;;  %v4033_v25 = vmul.u32 %v4026_v17, %v4017_v46 }
 0x531   : > { %vm4035_vm7 = vc.u32 %v12036_v12, %v12024_v45  ;;  %v3871_v16 = vsel %vm3869_vm5, %v3870_v18, %v9094_v34  ;;  %v7177_v55 = vsel %vm3862_vm3, nan, %v7176_v44  ;;  %v3741_v52 = vor.u32 %v3740_v58, %v3739_v62 }
 0x532   : > { %v3744_v35 = vshll.u32 %v3743_v11, 23  ;;  %v3868_v38 = vsel %vm3866_vm4, %v9092_v61, %v3867_v20  ;;  %9095 = vrcp.f32 %v7177_v55  ;;  %v4037_v60 = vsel %vm4035_vm7, %v4036_v51, %v12025_v32 }
 0x533   : > { %vm3885_vm8 = vcmp.gt.s32.totalorder %v3884_v26, 0  ;;  %vm3668_vm9 = vcmp.lt.s32.totalorder %v11792_v0, 0  ;;  %v4038_v2 = vadd.s32 %v4037_v60, %v4033_v25  ;;  %vm3865_vm11 = vcmp.lt.s32.totalorder %v11992_v37, 2 }
 0x534   : > { %v3745_v8 = vor.u32 4788187, %v3744_v35  ;;  %v3886_v17 = vsel %vm3885_vm8, %v3884_v26, 0  ;;  %v3753_v47 = vsel %vm3668_vm9, %v3752_v63, %v11963_v24  ;;  %v3881_v15 = vand.u32 8388607, %v3874_v7 }
 0x535   : > { %v3888_v14 = vand.u32 31, %v3886_v17  ;;  %v3872_v5 = vsel %vm3865_vm11, %v3868_v38, %v3871_v16  ;;  %v3748_v9 = vcvt.s32.f32 %v3741_v52  ;;  %v4039_v32 = vadd.s32 536870912, %v4038_v2 }
 0x536   : > { %v3746_v59 = vand.u32 2147483647, %v3745_v8  ;;  %vm12068_vm10 = vcmp.le.f32.partialorder %v3666_v49, 0.7853982  ;;  %v3873_v24 = vsel %vm3862_vm3, nan, %v3872_v5  ;;  %v3882_v61 = vor.u32 8388608, %v3881_v15 }
 0x537   : > { %v3889_v57 = vsub.s32 32, %v3888_v14  ;;  %v12072_v13 = vshrl.u32 %v4039_v32, 30  ;;  %v3755_v30 = vsel %vm12068_vm10, 0, %v3753_v47  ;;  %v12080_v54 = vadd.f32 %v11788_v4, %v11572_v48 }
 0x538   : > { %v3749_v37 = vmul.f32 %v3748_v9, %v3746_v59  ;;  %v12083_v18 = vshrl.u32 %v3886_v17, 5  ;;  %v3891_v39 = vshll.u32 %v9165_v23, %v3888_v14  ;;  %v3897_v46 = vshll.u32 %v9167_v29, %v3888_v14 }
 0x539   : > { %v4041_v49 = vshll.u32 %v12072_v13, 30  ;;  %v3898_v43 = vshrl.u32 %v9168_v31, %v3889_v57  ;;  %v3892_v19 = vshrl.u32 %v9166_v27, %v3889_v57  ;;  %v3895_v20 = vshrl.u32 %v9167_v29, %v3889_v57 }
 0x53a   : > { %v3750_v34 = vxor.u32 2147483648, %v3749_v37  ;;  %v3901_v1 = vshrl.u32 %v9169_v33, %v3889_v57  ;;  %v3904_v36 = vshrl.u32 %v9170_v40, %v3889_v57  ;;  %v3894_v53 = vshll.u32 %v9166_v27, %v3888_v14 }
 0x53b   : > { %v12094_v41 = vsub.s32 %v4038_v2, %v4041_v49  ;;  %v3900_v62 = vshll.u32 %v9168_v31, %v3888_v14  ;;  %v3903_v58 = vshll.u32 %v9169_v33, %v3888_v14  ;;  %v3899_v63 = vor.u32 %v3898_v43, %v3897_v46 }
 0x53c   : > { %v3751_v48 = vsel %vm3668_vm9, %v3750_v34, %v3749_v37  ;;  %v9096_v51 = vpop.eup %9095  ;;  %v3893_v25 = vor.u32 %v3892_v19, %v3891_v39  ;;  %v3896_v16 = vor.u32 %v3895_v20, %v3894_v53  ;;  %v7065_v38 = vand.u32 3, %v3755_v30 }
 0x53d   : > { %v3754_v26 = vsel %vm12068_vm10, %v11792_v0, %v3751_v48  ;;  %v8057_v11 = vmul.f32 %v9096_v51, %v3873_v24  ;;  %v4044_v44 = vsub.s32 0, %v12094_v41  ;;  %v3902_v55 = vor.u32 %v3901_v1, %v3900_v62 }
 0x53e   : > { %9097 = vcosq.f32 %v3754_v26  ;;  %v3905_v35 = vor.u32 %v3904_v36, %v3903_v58  ;;  %vm3909_vm12 = vcmp.lt.s32.totalorder %v12083_v18, 4  ;;  %v3922_v60 = vshll.u32 %v3882_v61, 8 }
 0x53f   : > { %9099 = vsinq.f32 %v3754_v26  ;;  %8090 = vst.msk [vmem:[%s9829_s16 + $0xb8] sm:$0xff] %vm8066_vm13, %v8057_v11  ;;  %v8365_v52 = vmin.u32 %v4044_v44, %v12094_v41  ;;  %v4189_v8 = vand.u32 2139095040, %v12080_v54  ;;  %v3890_v17 = vshrl.u32 %v9165_v23, %v3889_v57 }
 0x540   : > { %vm3906_vm14 = vcmp.lt.s32.totalorder %v12083_v18, 1  ;;  %v3911_v47 = vsel %vm3909_vm12, %v3899_v63, 2102212464  ;;  %vm3908_vm15 = vcmp.lt.s32.totalorder %v12083_v18, 3  ;;  %v3915_v14 = vsel %vm3909_vm12, %v3902_v55, 920167782 }
 0x541   : > { %v4046_v2 = vclz %v8365_v52  ;;  %v3914_v15 = vsel %vm3906_vm14, %v3893_v25, %v3896_v16  ;;  %v3918_v5 = vsel %vm3906_vm14, %v3896_v16, %v3899_v63  ;;  %vm3907_vm0 = vcmp.lt.s32.totalorder %v12083_v18, 2 }
 0x542   : > { %v3916_v9 = vsel %vm3908_vm15, %v3899_v63, %v3915_v14  ;;  %v3919_v32 = vsel %vm3909_vm12, %v3905_v35, 1326507024  ;;  %vm3758_vm1 = vweird.f32 %v11792_v0  ;;  %v3910_v42 = vsel %vm3906_vm14, %v3890_v17, %v3893_v25 }
 0x543   : > { %v8366_v59 = vadd.s32 4294967294, %v4046_v2  ;;  %v3912_v37 = vsel %vm3908_vm15, %v3896_v16, %v3911_v47  ;;  %v3917_v57 = vsel %vm3907_vm0, %v3914_v15, %v3916_v9  ;;  %v3920_v24 = vsel %vm3908_vm15, %v3902_v55, %v3919_v32 }
 0x544   : > { %v3921_v61 = vsel %vm3907_vm0, %v3918_v5, %v3920_v24  ;;  %v12119_v34 = vmul.u32.u64.low %v3922_v60, %v3917_v57  ;;  %v12120_v49 = vmul.u32.u64.high %v3922_v60, %v3917_v57, %v12119_v34  ;;  %v4190_v20 = vshrl.u32 %v4189_v8, 23 }
 0x545   : > { %vm8367_vm2 = vcmp.lt.s32.totalorder %v8366_v59, 0  ;;  %v12123_v39 = vmul.u32.u64.low %v3922_v60, %v3921_v61  ;;  %v12124_v19 = vmul.u32.u64.high %v3922_v60, %v3921_v61, %v12123_v39  ;;  %v3759_v48 = vadd.s32 3, %v3755_v30 }
 0x546   : > { %v4049_v43 = vsel %vm8367_vm2, 0, %v8366_v59  ;;  %v4034_v46 = vadd.s32 %v12024_v45, %v12036_v12  ;;  %vm7070_vm3 = vcmp.eq.s32.totalorder %v7065_v38, 2  ;;  %v3913_v58 = vsel %vm3907_vm0, %v3910_v42, %v3912_v37 }
 0x547   : > { %v4050_v36 = vsub.s32 32, %v4049_v43  ;;  %v4054_v51 = vsub.s32 4294967266, %v4049_v43  ;;  %v4051_v62 = vshll.u32 %v12094_v41, %v4049_v43  ;;  %v3932_v25 = vadd.s32 1, %v12120_v49 }
 0x548   : > { %v9098_v1 = vpop.eup %9097  ;;  %vm7067_vm4 = vcmp.eq.s32.totalorder %v7065_v38, 0  ;;  %vm3931_vm6 = vc.u32 %v12124_v19, %v12119_v34  ;;  %v8372_v45 = vadd.s32 4294967169, %v4190_v20  ;;  %vm7066_vm5 = vcmp.lt.s32.totalorder %v7065_v38, 2 }
 0x549   : > { %v9100_v26 = vpop.eup %9099  ;;  %v3766_v53 = vxor.u32 2147483648, %v9098_v1  ;;  %v4052_v44 = vshrl.u32 %v4034_v46, %v4050_v36  ;;  %v4055_v63 = vadd.s32 127, %v4054_v51  ;;  %v4064_v41 = vsub.s32 4, %v12072_v13 }
 0x54a   : > { %v3763_v11 = vxor.u32 2147483648, %v9100_v26  ;;  %v3929_v18 = vmul.u32 %v3922_v60, %v3913_v58  ;;  %v3933_v35 = vsel %vm3931_vm6, %v3932_v25, %v12120_v49  ;;  %v3760_v8 = vand.u32 3, %v3759_v48 }
 0x54b   : > { %v7072_v30 = vsel %vm7070_vm3, %v3766_v53, %v9100_v26  ;;  %v4053_v16 = vor.u32 %v4052_v44, %v4051_v62  ;;  %v4056_v55 = vshll.u32 %v4055_v63, 23  ;;  %vm3980_vm7 = vcmp.lt.s32.totalorder %v11846_v28, 0 }
 0x54c   : > { %v7069_v12 = vsel %vm7067_vm4, %v9098_v1, %v3763_v11  ;;  %v3934_v47 = vadd.s32 %v3933_v35, %v3929_v18  ;;  %v4196_v15 = vadd.s32 1, %v8372_v45  ;;  %vm12141_vm8 = vcmp.le.f32.partialorder %v3978_v21, 0.7853982 }
 0x54d   : > { %v7073_v52 = vsel %vm7066_vm5, %v7069_v12, %v7072_v30  ;;  %v4057_v17 = vor.u32 4788187, %v4056_v55  ;;  %v4060_v60 = vcvt.s32.f32 %v4053_v16  ;;  %v4186_v5 = vand.u32 2147483647, %v12080_v54 }
 0x54e   : > { %v7074_v2 = vsel %vm3758_vm1, nan, %v7073_v52  ;;  %v4065_v59 = vsel %vm3980_vm7, %v4064_v41, %v12072_v13  ;;  %v3935_v9 = vadd.s32 536870912, %v3934_v47  ;;  %vm4197_vm9 = vcmp.gt.s32.totalorder %v4196_v15, 0 }
 0x54f   : > { %9101 = vrcp.f32 %v7074_v2  ;;  %v4058_v14 = vand.u32 2147483647, %v4057_v17  ;;  %v12151_v32 = vadd.f32 %v11788_v4, %v11671_v56  ;;  %vm3762_vm11 = vcmp.eq.s32.totalorder %v3760_v8, 0 }
 0x550   : > { %vm3765_vm10 = vcmp.eq.s32.totalorder %v3760_v8, 2  ;;  %v4198_v42 = vsel %vm4197_vm9, %v4196_v15, 0  ;;  %v3764_v37 = vsel %vm3762_vm11, %v9098_v1, %v3763_v11  ;;  %v12153_v24 = vshrl.u32 %v3935_v9, 30 }
 0x551   : > { %v4061_v21 = vmul.f32 %v4060_v60, %v4058_v14  ;;  %v3767_v57 = vsel %vm3765_vm10, %v3766_v53, %v9100_v26  ;;  %v4200_v61 = vand.u32 31, %v4198_v42  ;;  %v4067_v43 = vsel %vm12141_vm8, 0, %v4065_v59 }
 0x552   : > { %v4193_v13 = vand.u32 8388607, %v4186_v5  ;;  %vm3761_vm12 = vcmp.lt.s32.totalorder %v3760_v8, 2  ;;  %v3937_v56 = vshll.u32 %v12153_v24, 30  ;;  %v4085_v39 = vand.u32 2139095040, %v12151_v32 }
 0x553   : > { %v4062_v49 = vxor.u32 2147483648, %v4061_v21  ;;  %v4201_v4 = vsub.s32 32, %v4200_v61  ;;  %v3768_v20 = vsel %vm3761_vm12, %v3764_v37, %v3767_v57  ;;  %v4071_v46 = vadd.s32 3, %v4067_v43 }
 0x554   : > { %v12166_v36 = vand.u32 3, %v4067_v43  ;;  %v12168_v51 = vsub.s32 %v3934_v47, %v3937_v56  ;;  %v4194_v26 = vor.u32 8388608, %v4193_v13  ;;  %v3769_v11 = vsel %vm3758_vm1, nan, %v3768_v20 }
 0x555   : > { %v4063_v1 = vsel %vm3980_vm7, %v4062_v49, %v4061_v21  ;;  %v4204_v53 = vshrl.u32 %v9166_v27, %v4201_v4  ;;  %v4207_v62 = vshrl.u32 %v9167_v29, %v4201_v4  ;;  %v4086_v63 = vshrl.u32 %v4085_v39, 23 }
 0x556   : > { %v4066_v48 = vsel %vm12141_vm8, %v11846_v28, %v4063_v1  ;;  %v3940_v44 = vsub.s32 0, %v12168_v51  ;;  %v4203_v30 = vshll.u32 %v9165_v23, %v4200_v61  ;;  %v4206_v45 = vshll.u32 %v9166_v27, %v4200_v61 }
 0x557   : > { %9103 = vcosq.f32 %v4066_v48  ;;  %v4210_v12 = vshrl.u32 %v9168_v31, %v4201_v4  ;;  %v12178_v16 = vand.u32 3, %v4071_v46  ;;  %v12181_v52 = vshrl.u32 %v4198_v42, 5 }
 0x558   : > { %9105 = vsinq.f32 %v4066_v48  ;;  %v8361_v55 = vmin.u32 %v3940_v44, %v12168_v51  ;;  %v4209_v0 = vshll.u32 %v9167_v29, %v4200_v61  ;;  %vm7379_vm14 = vcmp.eq.s32.totalorder %v12166_v36, 2 }
 0x559   : > { %v9102_v58 = vpop.eup %9101  ;;  %v4205_v41 = vor.u32 %v4204_v53, %v4203_v30  ;;  %v4208_v18 = vor.u32 %v4207_v62, %v4206_v45  ;;  %v4212_v35 = vshll.u32 %v9168_v31, %v4200_v61  ;;  %v4213_v8 = vshrl.u32 %v9169_v33, %v4201_v4 }
 0x55a   : > { %v8056_v25 = vmul.f32 %v9102_v58, %v3769_v11  ;;  %vm7376_vm15 = vcmp.eq.s32.totalorder %v12166_v36, 0  ;;  %v3930_v2 = vadd.s32 %v12119_v34, %v12124_v19  ;;  %v3942_v17 = vclz %v8361_v55 }
 0x55b   : > { %v4211_v47 = vor.u32 %v4210_v12, %v4209_v0  ;;  %v12192_v15 = vshll.u32 %v4194_v26, 8  ;;  %vm7375_vm0 = vcmp.lt.s32.totalorder %v12166_v36, 2  ;;  %v4214_v38 = vor.u32 %v4213_v8, %v4212_v35 }
 0x55c   : > { %8089 = vst.msk [vmem:[%s9829_s16 + $0xb0] sm:$0xff] %vm8066_vm13, %v8056_v25  ;;  %v4215_v14 = vshll.u32 %v9169_v33, %v4200_v61  ;;  %v4216_v60 = vshrl.u32 %v9170_v40, %v4201_v4  ;;  %v8368_v59 = vadd.s32 4294967169, %v4086_v63  ;;  %vm4070_vm1 = vweird.f32 %v11846_v28 }
 0x55d   : > { %vm3876_vm2 = vcmp.lt.s32.totalorder %v11880_v6, 0  ;;  %v8362_v9 = vadd.s32 4294967294, %v3942_v17  ;;  %v3960_v21 = vsub.s32 4, %v12153_v24  ;;  %vm4218_vm3 = vcmp.lt.s32.totalorder %v12181_v52, 1 }
 0x55e   : > { %vm4221_vm4 = vcmp.lt.s32.totalorder %v12181_v52, 4  ;;  %v4217_v34 = vor.u32 %v4216_v60, %v4215_v14  ;;  %vm4220_vm6 = vcmp.lt.s32.totalorder %v12181_v52, 3  ;;  %v4226_v19 = vsel %vm4218_vm3, %v4205_v41, %v4208_v18 }
 0x55f   : > { %v4227_v42 = vsel %vm4221_vm4, %v4214_v38, 920167782  ;;  %vm4074_vm5 = vcmp.eq.s32.totalorder %v12178_v16, 0  ;;  %vm8363_vm7 = vcmp.lt.s32.totalorder %v8362_v9, 0  ;;  %v4202_v37 = vshrl.u32 %v9165_v23, %v4201_v4 }
 0x560   : > { %vm4219_vm8 = vcmp.lt.s32.totalorder %v12181_v52, 2  ;;  %v4228_v57 = vsel %vm4220_vm6, %v4211_v47, %v4227_v42  ;;  %v3945_v49 = vsel %vm8363_vm7, 0, %v8362_v9  ;;  %v4223_v43 = vsel %vm4221_vm4, %v4211_v47, 2102212464 }
 0x561   : > { %v9104_v61 = vpop.eup %9103  ;;  %v4229_v13 = vsel %vm4219_vm8, %v4226_v19, %v4228_v57  ;;  %v4231_v56 = vsel %vm4221_vm4, %v4217_v34, 1326507024  ;;  %vm12214_vm9 = vcmp.le.f32.partialorder %v3874_v7, 0.7853982  ;;  %v3946_v4 = vsub.s32 32, %v3945_v49 }
 0x562   : > { %v9106_v39 = vpop.eup %9105  ;;  %v4078_v20 = vxor.u32 2147483648, %v9104_v61  ;;  %v3950_v48 = vsub.s32 4294967266, %v3945_v49  ;;  %v4230_v46 = vsel %vm4218_vm3, %v4208_v18, %v4211_v47  ;;  %v4232_v53 = vsel %vm4220_vm6, %v4214_v38, %v4231_v56 }
 0x563   : > { %v4075_v26 = vxor.u32 2147483648, %v9106_v39  ;;  %v12223_v62 = vmul.u32.u64.low %v12192_v15, %v4229_v13  ;;  %v12224_v58 = vmul.u32.u64.high %v12192_v15, %v4229_v13, %v12223_v62  ;;  %v3947_v11 = vshll.u32 %v12168_v51, %v3945_v49 }
 0x564   : > { %v7381_v7 = vsel %vm7379_vm14, %v4078_v20, %v9106_v39  ;;  %v3948_v44 = vshrl.u32 %v3930_v2, %v3946_v4  ;;  %v3951_v63 = vadd.s32 127, %v3950_v48  ;;  %v4222_v30 = vsel %vm4218_vm3, %v4202_v37, %v4205_v41 }
 0x565   : > { %v7378_v25 = vsel %vm7376_vm15, %v9104_v61, %v4075_v26  ;;  %v4224_v45 = vsel %vm4220_vm6, %v4208_v18, %v4223_v43  ;;  %v4233_v12 = vsel %vm4219_vm8, %v4230_v46, %v4232_v53  ;;  %vm4077_vm11 = vcmp.eq.s32.totalorder %v12178_v16, 2 }
 0x566   : > { %v7382_v55 = vsel %vm7375_vm0, %v7378_v25, %v7381_v7  ;;  %v3949_v51 = vor.u32 %v3948_v44, %v3947_v11  ;;  %v3952_v0 = vshll.u32 %v3951_v63, 23  ;;  %v3961_v41 = vsel %vm3876_vm2, %v3960_v21, %v12153_v24  ;;  %v12260_v21 = vld [vmem:[%s12814_s6] ss:$0 sm:$0xff] }
 0x567   : > { %v7383_v35 = vsel %vm4070_vm1, nan, %v7382_v55  ;;  %v12247_v8 = vmul.u32.u64.low %v12192_v15, %v4233_v12  ;;  %v12248_v18 = vmul.u32.u64.high %v12192_v15, %v4233_v12, %v12247_v8  ;;  %v4225_v17 = vsel %vm4219_vm8, %v4222_v30, %v4224_v45 }
 0x568   : > { %9107 = vrcp.f32 %v7383_v35  ;;  %v3953_v2 = vor.u32 4788187, %v3952_v0  ;;  %v4244_v36 = vadd.s32 1, %v12224_v58  ;;  %vm4073_vm10 = vcmp.lt.s32.totalorder %v12178_v16, 2 }
 0x569   : > { %v4076_v47 = vsel %vm4074_vm5, %v9104_v61, %v4075_v26  ;;  %v4079_v38 = vsel %vm4077_vm11, %v4078_v20, %v9106_v39  ;;  %v4092_v14 = vadd.s32 1, %v8368_v59  ;;  %v3956_v24 = vcvt.s32.f32 %v3949_v51 }
 0x56a   : > { %v3954_v60 = vand.u32 2147483647, %v3953_v2  ;;  %v4082_v9 = vand.u32 2147483647, %v12151_v32  ;;  %v12264_v52 = vadd.f32 %v12260_v21, %v11798_v10  ;;  %v3963_v34 = vsel %vm12214_vm9, 0, %v3961_v41 }
 0x56b   : > { %v4241_v16 = vmul.u32 %v12192_v15, %v4225_v17  ;;  %vm4243_vm12 = vc.u32 %v12248_v18, %v12223_v62  ;;  %vm4093_vm14 = vcmp.gt.s32.totalorder %v4092_v14, 0  ;;  %v4080_v59 = vsel %vm4073_vm10, %v4076_v47, %v4079_v38 }
 0x56c   : > { %v3957_v19 = vmul.f32 %v3956_v24, %v3954_v60  ;;  %v4245_v42 = vsel %vm4243_vm12, %v4244_v36, %v12224_v58  ;;  %v4094_v37 = vsel %vm4093_vm14, %v4092_v14, 0  ;;  %v4089_v10 = vand.u32 8388607, %v4082_v9 }
 0x56d   : > { %v4246_v57 = vadd.s32 %v4245_v42, %v4241_v16  ;;  %v4096_v61 = vand.u32 31, %v4094_v37  ;;  %v4081_v43 = vsel %vm4070_vm1, nan, %v4080_v59  ;;  %v3967_v13 = vadd.s32 3, %v3963_v34 }
 0x56e   : > { %v3958_v49 = vxor.u32 2147483648, %v3957_v19  ;;  %v12278_v20 = vshrl.u32 %v4094_v37, 5  ;;  %v4397_v48 = vand.u32 2139095040, %v12264_v52  ;;  %v7271_v30 = vand.u32 3, %v3963_v34 }
 0x56f   : > { %v4247_v15 = vadd.s32 536870912, %v4246_v57  ;;  %v4097_v56 = vsub.s32 32, %v4096_v61  ;;  %v4099_v4 = vshll.u32 %v9165_v23, %v4096_v61  ;;  %v4108_v53 = vshll.u32 %v9168_v31, %v4096_v61 }
 0x570   : > { %v3959_v39 = vsel %vm3876_vm2, %v3958_v49, %v3957_v19  ;;  %v4102_v25 = vshll.u32 %v9166_v27, %v4096_v61  ;;  %v4105_v45 = vshll.u32 %v9167_v29, %v4096_v61  ;;  %v4398_v55 = vshrl.u32 %v4397_v48, 23 }
 0x571   : > { %v3962_v46 = vsel %vm12214_vm9, %v11880_v6, %v3959_v39  ;;  %v12285_v26 = vshrl.u32 %v4247_v15, 30  ;;  %v4100_v28 = vshrl.u32 %v9166_v27, %v4097_v56  ;;  %v4103_v7 = vshrl.u32 %v9167_v29, %v4097_v56 }
 0x572   : > { %v9108_v58 = vpop.eup %9107  ;;  %9109 = vcosq.f32 %v3962_v46  ;;  %v4106_v11 = vshrl.u32 %v9168_v31, %v4097_v56  ;;  %v4109_v44 = vshrl.u32 %v9169_v33, %v4097_v56  ;;  %v4112_v41 = vshrl.u32 %v9170_v40, %v4097_v56 }
 0x573   : > { %v8059_v63 = vmul.f32 %v9108_v58, %v4081_v43  ;;  %9111 = vsinq.f32 %v3962_v46  ;;  %v4249_v1 = vshll.u32 %v12285_v26, 30  ;;  %v4101_v0 = vor.u32 %v4100_v28, %v4099_v4 }
 0x574   : > { %v4110_v12 = vor.u32 %v4109_v44, %v4108_v53  ;;  %v4104_v35 = vor.u32 %v4103_v7, %v4102_v25  ;;  %v12300_v8 = vand.u32 3, %v3967_v13  ;;  %v4107_v2 = vor.u32 %v4106_v11, %v4105_v45 }
 0x575   : > { %8092 = vst.msk [vmem:[%s9829_s16 + $0xc8] sm:$0xff] %vm8066_vm13, %v8059_v63  ;;  %v12297_v51 = vsub.s32 %v4246_v57, %v4249_v1  ;;  %v4111_v17 = vshll.u32 %v9169_v33, %v4096_v61  ;;  %v4090_v47 = vor.u32 8388608, %v4089_v10  ;;  %vm4117_vm15 = vcmp.lt.s32.totalorder %v12278_v20, 4 }
 0x576   : > { %v4394_v38 = vand.u32 2147483647, %v12264_v52  ;;  %vm7272_vm0 = vcmp.lt.s32.totalorder %v7271_v30, 2  ;;  %vm4114_vm1 = vcmp.lt.s32.totalorder %v12278_v20, 1  ;;  %v4123_v60 = vsel %vm4117_vm15, %v4110_v12, 920167782 }
 0x577   : > { %v4252_v36 = vsub.s32 0, %v12297_v51  ;;  %v4113_v14 = vor.u32 %v4112_v41, %v4111_v17  ;;  %v8380_v24 = vadd.s32 4294967169, %v4398_v55  ;;  %vm3966_vm2 = vweird.f32 %v11880_v6 }
 0x578   : > { %vm7273_vm3 = vcmp.eq.s32.totalorder %v7271_v30, 0  ;;  %vm4116_vm4 = vcmp.lt.s32.totalorder %v12278_v20, 3  ;;  %v4122_v16 = vsel %vm4114_vm1, %v4101_v0, %v4104_v35  ;;  %vm3973_vm6 = vcmp.eq.s32.totalorder %v12300_v8, 2 }
 0x579   : > { %v8373_v34 = vmin.u32 %v4252_v36, %v12297_v51  ;;  %vm7276_vm5 = vcmp.eq.s32.totalorder %v7271_v30, 2  ;;  %v4098_v59 = vshrl.u32 %v9165_v23, %v4097_v56  ;;  %v4124_v19 = vsel %vm4116_vm4, %v4107_v2, %v4123_v60 }
 0x57a   : > { %vm3970_vm7 = vcmp.eq.s32.totalorder %v12300_v8, 0  ;;  %vm4115_vm8 = vcmp.lt.s32.totalorder %v12278_v20, 2  ;;  %v4119_v37 = vsel %vm4117_vm15, %v4107_v2, 2102212464  ;;  %v4130_v57 = vshll.u32 %v4090_v47, 8 }
 0x57b   : > { %v4254_v42 = vclz %v8373_v34  ;;  %v4118_v49 = vsel %vm4114_vm1, %v4098_v59, %v4101_v0  ;;  %v4125_v10 = vsel %vm4115_vm8, %v4122_v16, %v4124_v19  ;;  %v4127_v43 = vsel %vm4117_vm15, %v4113_v14, 1326507024 }
 0x57c   : > { %v9110_v61 = vpop.eup %9109  ;;  %v4404_v13 = vadd.s32 1, %v8380_v24  ;;  %v4126_v4 = vsel %vm4114_vm1, %v4104_v35, %v4107_v2  ;;  %v4128_v48 = vsel %vm4116_vm4, %v4110_v12, %v4127_v43  ;;  %v4120_v28 = vsel %vm4116_vm4, %v4104_v35, %v4119_v37 }
 0x57d   : > { %v9112_v15 = vpop.eup %9111  ;;  %v3974_v56 = vxor.u32 2147483648, %v9110_v61  ;;  %v8374_v39 = vadd.s32 4294967294, %v4254_v42  ;;  %v12334_v53 = vmul.u32.u64.low %v4130_v57, %v4125_v10  ;;  %v12335_v58 = vmul.u32.u64.high %v4130_v57, %v4125_v10, %v12334_v53 }
 0x57e   : > { %v3971_v46 = vxor.u32 2147483648, %v9112_v15  ;;  %v12341_v11 = vand.u32 8388607, %v4394_v38  ;;  %vm4405_vm11 = vcmp.gt.s32.totalorder %v4404_v13, 0  ;;  %v4242_v63 = vadd.s32 %v12223_v62, %v12248_v18 }
 0x57f   : > { %v7278_v7 = vsel %vm7276_vm5, %v3974_v56, %v9112_v15  ;;  %vm8375_vm9 = vcmp.lt.s32.totalorder %v8374_v39, 0  ;;  %v4129_v25 = vsel %vm4115_vm8, %v4126_v4, %v4128_v48  ;;  %v4121_v55 = vsel %vm4115_vm8, %v4118_v49, %v4120_v28 }
 0x580   : > { %v7275_v44 = vsel %vm7273_vm3, %v9110_v61, %v3971_v46  ;;  %v4257_v1 = vsel %vm8375_vm9, 0, %v8374_v39  ;;  %v4406_v0 = vsel %vm4405_vm11, %v4404_v13, 0  ;;  %v3975_v35 = vsel %vm3973_vm6, %v3974_v56, %v9112_v15 }
 0x581   : > { %v7279_v45 = vsel %vm7272_vm0, %v7275_v44, %v7278_v7  ;;  %v4258_v12 = vsub.s32 32, %v4257_v1  ;;  %v4259_v2 = vshll.u32 %v12297_v51, %v4257_v1  ;;  %v4262_v62 = vsub.s32 4294967266, %v4257_v1 }
 0x582   : > { %v7280_v41 = vsel %vm3966_vm2, nan, %v7279_v45  ;;  %v12356_v17 = vmul.u32.u64.low %v4130_v57, %v4129_v25  ;;  %v12357_v36 = vmul.u32.u64.high %v4130_v57, %v4129_v25, %v12356_v17  ;;  %v3972_v30 = vsel %vm3970_vm7, %v9110_v61, %v3971_v46 }
 0x583   : > { %9113 = vrcp.f32 %v7280_v41  ;;  %v4260_v18 = vshrl.u32 %v4242_v63, %v4258_v12  ;;  %v4263_v20 = vadd.s32 127, %v4262_v62  ;;  %v4140_v47 = vadd.s32 1, %v12335_v58 }
 0x584   : > { %v4408_v14 = vand.u32 31, %v4406_v0  ;;  %vm3969_vm10 = vcmp.lt.s32.totalorder %v12300_v8, 2  ;;  %vm4188_vm12 = vcmp.lt.s32.totalorder %v12080_v54, 0  ;;  %v4402_v51 = vor.u32 8388608, %v12341_v11 }
 0x585   : > { %v4261_v60 = vor.u32 %v4260_v18, %v4259_v2  ;;  %vm12367_vm14 = vcmp.le.f32.partialorder %v4186_v5, 0.7853982  ;;  %v4264_v34 = vshll.u32 %v4263_v20, 23  ;;  %v4272_v16 = vsub.s32 4, %v12285_v26 }
 0x586   : > { %v4137_v59 = vmul.u32 %v4130_v57, %v4121_v55  ;;  %v4409_v19 = vsub.s32 32, %v4408_v14  ;;  %v3976_v42 = vsel %vm3969_vm10, %v3972_v30, %v3975_v35  ;;  %vm4139_vm15 = vc.u32 %v12357_v36, %v12334_v53 }
 0x587   : > { %v12374_v8 = vshrl.u32 %v4406_v0, 5  ;;  %v4411_v37 = vshll.u32 %v9165_v23, %v4408_v14  ;;  %v4265_v61 = vor.u32 4788187, %v4264_v34  ;;  %v4141_v49 = vsel %vm4139_vm15, %v4140_v47, %v12335_v58 }
 0x588   : > { %v4412_v5 = vshrl.u32 %v9166_v27, %v4409_v19  ;;  %v4414_v10 = vshll.u32 %v9166_v27, %v4408_v14  ;;  %v4268_v43 = vcvt.s32.f32 %v4261_v60  ;;  %v4142_v13 = vadd.s32 %v4141_v49, %v4137_v59 }
 0x589   : > { %v4415_v57 = vshrl.u32 %v9167_v29, %v4409_v19  ;;  %v4418_v15 = vshrl.u32 %v9168_v31, %v4409_v19  ;;  %v4266_v56 = vand.u32 2147483647, %v4265_v61  ;;  %v4417_v39 = vshll.u32 %v9167_v29, %v4408_v14 }
 0x58a   : > { %v4420_v4 = vshll.u32 %v9168_v31, %v4408_v14  ;;  %v4421_v48 = vshrl.u32 %v9169_v33, %v4409_v19  ;;  %v4143_v46 = vadd.s32 536870912, %v4142_v13  ;;  %v4413_v28 = vor.u32 %v4412_v5, %v4411_v37 }
 0x58b   : > { %v4416_v58 = vor.u32 %v4415_v57, %v4414_v10  ;;  %v4424_v7 = vshrl.u32 %v9170_v40, %v4409_v19  ;;  %v4269_v11 = vmul.f32 %v4268_v43, %v4266_v56  ;;  %v4273_v44 = vsel %vm4188_vm12, %v4272_v16, %v12285_v26 }
 0x58c   : > { %v4422_v63 = vor.u32 %v4421_v48, %v4420_v4  ;;  %v4423_v1 = vshll.u32 %v9169_v33, %v4408_v14  ;;  %v3977_v45 = vsel %vm3966_vm2, nan, %v3976_v42  ;;  %v4144_v12 = vshrl.u32 %v4143_v46, 30 }
 0x58d   : > { %v9114_v25 = vpop.eup %9113  ;;  %v4419_v55 = vor.u32 %v4418_v15, %v4417_v39  ;;  %v12394_v0 = vadd.f32 %v12260_v21, %v11882_v22  ;;  %v4270_v41 = vxor.u32 2147483648, %v4269_v11  ;;  %vm4426_vm0 = vcmp.lt.s32.totalorder %v12374_v8, 1 }
 0x58e   : > { %v8058_v35 = vmul.f32 %v9114_v25, %v3977_v45  ;;  %v4425_v2 = vor.u32 %v4424_v7, %v4423_v1  ;;  %v4275_v26 = vsel %vm12367_vm14, 0, %v4273_v44  ;;  %v4145_v62 = vshll.u32 %v4144_v12, 30 }
 0x58f   : > { %vm4429_vm1 = vcmp.lt.s32.totalorder %v12374_v8, 4  ;;  %v4434_v6 = vsel %vm4426_vm0, %v4413_v28, %v4416_v58  ;;  %v4271_v22 = vsel %vm4188_vm12, %v4270_v41, %v4269_v11  ;;  %vm4428_vm2 = vcmp.lt.s32.totalorder %v12374_v8, 3 }
 0x590   : > { %8091 = vst.msk [vmem:[%s9829_s16 + $0xc0] sm:$0xff] %vm8066_vm13, %v8058_v35  ;;  %v4435_v18 = vsel %vm4429_vm1, %v4422_v63, 920167782  ;;  %v12409_v17 = vshll.u32 %v4402_v51, 8  ;;  %v4274_v30 = vsel %vm12367_vm14, %v12080_v54, %v4271_v22  ;;  %v12414_v20 = vsub.s32 %v4142_v13, %v4145_v62 }
 0x591   : > { %vm4427_vm3 = vcmp.lt.s32.totalorder %v12374_v8, 2  ;;  %v4436_v47 = vsel %vm4428_vm2, %v4419_v55, %v4435_v18  ;;  %9115 = vcosq.f32 %v4274_v30  ;;  %v4439_v60 = vsel %vm4429_vm1, %v4425_v2, 1326507024 }
 0x592   : > { %v4437_v14 = vsel %vm4427_vm3, %v4434_v6, %v4436_v47  ;;  %v4293_v51 = vand.u32 2139095040, %v12394_v0  ;;  %9117 = vsinq.f32 %v4274_v30  ;;  %v4148_v24 = vsub.s32 0, %v12414_v20 }
 0x593   : > { %v4438_v34 = vsel %vm4426_vm0, %v4416_v58, %v4419_v55  ;;  %v4440_v16 = vsel %vm4428_vm2, %v4422_v63, %v4439_v60  ;;  %v12430_v59 = vmul.u32.u64.low %v12409_v17, %v4437_v14  ;;  %v12431_v42 = vmul.u32.u64.high %v12409_v17, %v4437_v14, %v12430_v59 }
 0x594   : > { %v4279_v37 = vadd.s32 3, %v4275_v26  ;;  %v8369_v61 = vmin.u32 %v4148_v24, %v12414_v20  ;;  %v4410_v49 = vshrl.u32 %v9165_v23, %v4409_v19  ;;  %v4431_v5 = vsel %vm4429_vm1, %v4419_v55, 2102212464 }
 0x595   : > { %v7580_v10 = vand.u32 3, %v4275_v26  ;;  %v4168_v43 = vsub.s32 4, %v4144_v12  ;;  %v4441_v13 = vsel %vm4427_vm3, %v4438_v34, %v4440_v16  ;;  %v4294_v57 = vshrl.u32 %v4293_v51, 23 }
 0x596   : > { %vm4084_vm4 = vcmp.lt.s32.totalorder %v12151_v32, 0  ;;  %v4150_v15 = vclz %v8369_v61  ;;  %v4430_v56 = vsel %vm4426_vm0, %v4410_v49, %v4413_v28  ;;  %v4290_v39 = vand.u32 2147483647, %v12394_v0 }
 0x597   : > { %v4432_v19 = vsel %vm4428_vm2, %v4416_v58, %v4431_v5  ;;  %v12447_v4 = vmul.u32.u64.low %v12409_v17, %v4441_v13  ;;  %v12448_v48 = vmul.u32.u64.high %v12409_v17, %v4441_v13, %v12447_v4  ;;  %v8376_v46 = vadd.s32 4294967169, %v4294_v57 }
 0x598   : > { %vm4278_vm6 = vweird.f32 %v12080_v54  ;;  %v12451_v7 = vand.u32 3, %v4279_v37  ;;  %vm12455_vm5 = vcmp.le.f32.partialorder %v4082_v9, 0.7853982  ;;  %v8370_v28 = vadd.s32 4294967294, %v4150_v15 }
 0x599   : > { %v12461_v44 = vadd.f32 %v12260_v21, %v11984_v50  ;;  %vm7582_vm7 = vcmp.eq.s32.totalorder %v7580_v10, 0  ;;  %v4169_v58 = vsel %vm4084_vm4, %v4168_v43, %v4144_v12  ;;  %v4452_v63 = vadd.s32 1, %v12431_v42 }
 0x59a   : > { %v4300_v1 = vadd.s32 1, %v8376_v46  ;;  %vm7585_vm8 = vcmp.eq.s32.totalorder %v7580_v10, 2  ;;  %vm8371_vm9 = vcmp.lt.s32.totalorder %v8370_v28, 0  ;;  %v4433_v9 = vsel %vm4427_vm3, %v4430_v56, %v4432_v19 }
 0x59b   : > { %v4297_v25 = vand.u32 8388607, %v4290_v39  ;;  %v9116_v45 = vpop.eup %9115  ;;  %v4138_v50 = vadd.s32 %v12334_v53, %v12357_v36  ;;  %v4153_v55 = vsel %vm8371_vm9, 0, %v8370_v28  ;;  %vm4451_vm11 = vc.u32 %v12448_v48, %v12430_v59 }
 0x59c   : > { %vm4301_vm10 = vcmp.gt.s32.totalorder %v4300_v1, 0  ;;  %v9118_v12 = vpop.eup %9117  ;;  %v4286_v35 = vxor.u32 2147483648, %v9116_v45  ;;  %v4154_v41 = vsub.s32 32, %v4153_v55  ;;  %v4158_v2 = vsub.s32 4294967266, %v4153_v55 }
 0x59d   : > { %v4171_v8 = vsel %vm12455_vm5, 0, %v4169_v58  ;;  %v4283_v26 = vxor.u32 2147483648, %v9118_v12  ;;  %v4155_v62 = vshll.u32 %v12414_v20, %v4153_v55  ;;  %v4449_v6 = vmul.u32 %v12409_v17, %v4433_v9 }
 0x59e   : > { %v4453_v22 = vsel %vm4451_vm11, %v4452_v63, %v12431_v42  ;;  %v7587_v53 = vsel %vm7585_vm8, %v4286_v35, %v9118_v12  ;;  %v4156_v36 = vshrl.u32 %v4138_v50, %v4154_v41  ;;  %v4159_v18 = vadd.s32 127, %v4158_v2 }
 0x59f   : > { %v4302_v30 = vsel %vm4301_vm10, %v4300_v1, 0  ;;  %vm7581_vm12 = vcmp.lt.s32.totalorder %v7580_v10, 2  ;;  %v7584_v47 = vsel %vm7582_vm7, %v9116_v45, %v4283_v26  ;;  %v4175_v14 = vadd.s32 3, %v4171_v8 }
 0x5a0   : > { %v4454_v60 = vadd.s32 %v4453_v22, %v4449_v6  ;;  %v7588_v51 = vsel %vm7581_vm12, %v7584_v47, %v7587_v53  ;;  %v4157_v24 = vor.u32 %v4156_v36, %v4155_v62  ;;  %v4160_v34 = vshll.u32 %v4159_v18, 23 }
 0x5a1   : > { %v4298_v16 = vor.u32 8388608, %v4297_v25  ;;  %v7589_v20 = vsel %vm4278_vm6, nan, %v7588_v51  ;;  %v4304_v37 = vand.u32 31, %v4302_v30  ;;  %v4605_v42 = vand.u32 2139095040, %v12461_v44 }
 0x5a2   : > { %v4455_v17 = vadd.s32 536870912, %v4454_v60  ;;  %vm4281_vm14 = vcmp.lt.s32.totalorder %v12451_v7, 2  ;;  %9119 = vrcp.f32 %v7589_v20  ;;  %v4161_v61 = vor.u32 4788187, %v4160_v34 }
 0x5a3   : > { %vm4282_vm15 = vcmp.eq.s32.totalorder %v12451_v7, 0  ;;  %vm4285_vm0 = vcmp.eq.s32.totalorder %v12451_v7, 2  ;;  %v4305_v5 = vsub.s32 32, %v4304_v37  ;;  %v4164_v43 = vcvt.s32.f32 %v4157_v24 }
 0x5a4   : > { %v12487_v49 = vshrl.u32 %v4455_v17, 30  ;;  %v4162_v10 = vand.u32 2147483647, %v4161_v61  ;;  %v12489_v13 = vand.u32 3, %v4175_v14  ;;  %v12491_v57 = vand.u32 3, %v4171_v8 }
 0x5a5   : > { %v12495_v15 = vadd.s32 %v12430_v59, %v12448_v48  ;;  %v12498_v19 = vshll.u32 %v4298_v16, 8  ;;  %v4606_v4 = vshrl.u32 %v4605_v42, 23  ;;  %v4284_v46 = vsel %vm4282_vm15, %v9116_v45, %v4283_v26 }
 0x5a6   : > { %v4457_v56 = vshll.u32 %v12487_v49, 30  ;;  %v4287_v28 = vsel %vm4285_vm0, %v4286_v35, %v9118_v12  ;;  %v4165_v58 = vmul.f32 %v4164_v43, %v4162_v10  ;;  %v4308_v63 = vshrl.u32 %v9166_v27, %v4305_v5 }
 0x5a7   : > { %v12503_v9 = vshrl.u32 %v4302_v30, 5  ;;  %v4311_v25 = vshrl.u32 %v9167_v29, %v4305_v5  ;;  %v4317_v50 = vshrl.u32 %v9169_v33, %v4305_v5  ;;  %v4307_v48 = vshll.u32 %v9165_v23, %v4304_v37 }
 0x5a8   : > { %v12501_v1 = vsub.s32 %v4454_v60, %v4457_v56  ;;  %v4166_v59 = vxor.u32 2147483648, %v4165_v58  ;;  %v4314_v55 = vshrl.u32 %v9168_v31, %v4305_v5  ;;  %v4320_v41 = vshrl.u32 %v9170_v40, %v4305_v5 }
 0x5a9   : > { %v4288_v45 = vsel %vm4281_vm14, %v4284_v46, %v4287_v28  ;;  %v4310_v35 = vshll.u32 %v9166_v27, %v4304_v37  ;;  %v4316_v2 = vshll.u32 %v9168_v31, %v4304_v37  ;;  %v4309_v26 = vor.u32 %v4308_v63, %v4307_v48 }
 0x5aa   : > { %v4460_v12 = vsub.s32 0, %v12501_v1  ;;  %v4167_v8 = vsel %vm4084_vm4, %v4166_v59, %v4165_v58  ;;  %v4313_v62 = vshll.u32 %v9167_v29, %v4304_v37  ;;  %v4319_v6 = vshll.u32 %v9169_v33, %v4304_v37 }
 0x5ab   : > { %v4170_v22 = vsel %vm12455_vm5, %v12151_v32, %v4167_v8  ;;  %v4312_v53 = vor.u32 %v4311_v25, %v4310_v35  ;;  %v4318_v36 = vor.u32 %v4317_v50, %v4316_v2  ;;  %v4289_v30 = vsel %vm4278_vm6, nan, %v4288_v45 }
 0x5ac   : > { %v8381_v7 = vmin.u32 %v4460_v12, %v12501_v1  ;;  %v9120_v18 = vpop.eup %9119  ;;  %9121 = vcosq.f32 %v4170_v22  ;;  %v4315_v47 = vor.u32 %v4314_v55, %v4313_v62  ;;  %v4321_v14 = vor.u32 %v4320_v41, %v4319_v6 }
 0x5ad   : > { %v8061_v60 = vmul.f32 %v9120_v18, %v4289_v30  ;;  %9123 = vsinq.f32 %v4170_v22  ;;  %vm4396_vm1 = vcmp.lt.s32.totalorder %v12264_v52, 0  ;;  %vm4322_vm2 = vcmp.lt.s32.totalorder %v12503_v9, 1 }
 0x5ae   : > { %v4462_v51 = vclz %v8381_v7  ;;  %v4480_v11 = vsub.s32 4, %v12487_v49  ;;  %v4306_v24 = vshrl.u32 %v9165_v23, %v4305_v5  ;;  %vm4323_vm3 = vcmp.lt.s32.totalorder %v12503_v9, 2 }
 0x5af   : > { %vm4325_vm4 = vcmp.lt.s32.totalorder %v12503_v9, 4  ;;  %8094 = vst.msk [vmem:[%s9829_s16 + $0xd8] sm:$0xff] %vm8066_vm13, %v8061_v60  ;;  %vm4324_vm6 = vcmp.lt.s32.totalorder %v12503_v9, 3  ;;  %v4330_v34 = vsel %vm4322_vm2, %v4309_v26, %v4312_v53  ;;  %v4334_v37 = vsel %vm4322_vm2, %v4312_v53, %v4315_v47 }
 0x5b0   : > { %v8382_v54 = vadd.s32 4294967294, %v4462_v51  ;;  %v4331_v16 = vsel %vm4325_vm4, %v4318_v36, 920167782  ;;  %v4327_v20 = vsel %vm4325_vm4, %v4315_v47, 2102212464  ;;  %v4326_v5 = vsel %vm4322_vm2, %v4306_v24, %v4309_v26 }
 0x5b1   : > { %v4332_v17 = vsel %vm4324_vm6, %v4315_v47, %v4331_v16  ;;  %v4335_v42 = vsel %vm4325_vm4, %v4321_v14, 1326507024  ;;  %vm12542_vm5 = vcmp.le.f32.partialorder %v4394_v38, 0.7853982  ;;  %vm4174_vm8 = vweird.f32 %v12151_v32 }
 0x5b2   : > { %vm8383_vm7 = vcmp.lt.s32.totalorder %v8382_v54, 0  ;;  %v4333_v10 = vsel %vm4323_vm3, %v4330_v34, %v4332_v17  ;;  %v4336_v43 = vsel %vm4324_vm6, %v4318_v36, %v4335_v42  ;;  %v4328_v25 = vsel %vm4324_vm6, %v4312_v53, %v4327_v20 }
 0x5b3   : > { %v4465_v56 = vsel %vm8383_vm7, 0, %v8382_v54  ;;  %v4337_v46 = vsel %vm4323_vm3, %v4334_v37, %v4336_v43  ;;  %v12555_v28 = vmul.u32.u64.low %v12498_v19, %v4333_v10  ;;  %v12556_v38 = vmul.u32.u64.high %v12498_v19, %v4333_v10, %v12555_v28 }
 0x5b4   : > { %v4466_v58 = vsub.s32 32, %v4465_v56  ;;  %v4470_v63 = vsub.s32 4294967266, %v4465_v56  ;;  %v8388_v50 = vadd.s32 4294967169, %v4606_v4  ;;  %vm7478_vm9 = vcmp.lt.s32.totalorder %v12491_v57, 2 }
 0x5b5   : > { %vm7479_vm11 = vcmp.eq.s32.totalorder %v12491_v57, 0  ;;  %v12565_v59 = vmul.u32.u64.low %v12498_v19, %v4337_v46  ;;  %v12566_v48 = vmul.u32.u64.high %v12498_v19, %v4337_v46, %v12565_v59  ;;  %v4467_v55 = vshll.u32 %v12501_v1, %v4465_v56 }
 0x5b6   : > { %v4468_v41 = vshrl.u32 %v12495_v15, %v4466_v58  ;;  %v4471_v45 = vadd.s32 127, %v4470_v63  ;;  %v4612_v12 = vadd.s32 1, %v8388_v50  ;;  %v9122_v35 = vpop.eup %9121  ;;  %v4481_v2 = vsel %vm4396_vm1, %v4480_v11, %v12487_v49 }
 0x5b7   : > { %v4329_v4 = vsel %vm4323_vm3, %v4326_v5, %v4328_v25  ;;  %v4348_v8 = vadd.s32 1, %v12556_v38  ;;  %v4602_v26 = vand.u32 2147483647, %v12461_v44  ;;  %v9124_v62 = vpop.eup %9123  ;;  %v4182_v6 = vxor.u32 2147483648, %v9122_v35 }
 0x5b8   : > { %v4469_v22 = vor.u32 %v4468_v41, %v4467_v55  ;;  %v4472_v1 = vshll.u32 %v4471_v45, 23  ;;  %vm4613_vm10 = vcmp.gt.s32.totalorder %v4612_v12, 0  ;;  %v4179_v15 = vxor.u32 2147483648, %v9124_v62 }
 0x5b9   : > { %vm4181_vm12 = vcmp.eq.s32.totalorder %v12489_v13, 2  ;;  %vm7482_vm14 = vcmp.eq.s32.totalorder %v12491_v57, 2  ;;  %vm4347_vm15 = vc.u32 %v12566_v48, %v12555_v28  ;;  %v4345_v7 = vmul.u32 %v12498_v19, %v4329_v4 }
 0x5ba   : > { %v7484_v49 = vsel %vm7482_vm14, %v4182_v6, %v9124_v62  ;;  %v4473_v9 = vor.u32 4788187, %v4472_v1  ;;  %v4614_v53 = vsel %vm4613_vm10, %v4612_v12, 0  ;;  %v7481_v36 = vsel %vm7479_vm11, %v9122_v35, %v4179_v15 }
 0x5bb   : > { %v4483_v18 = vsel %vm12542_vm5, 0, %v4481_v2  ;;  %v4349_v30 = vsel %vm4347_vm15, %v4348_v8, %v12556_v38  ;;  %v4609_v47 = vand.u32 8388607, %v4602_v26  ;;  %v7485_v14 = vsel %vm7478_vm9, %v7481_v36, %v7484_v49 }
 0x5bc   : > { %v4474_v60 = vand.u32 2147483647, %v4473_v9  ;;  %v4476_v51 = vcvt.s32.f32 %v4469_v22  ;;  %v4350_v11 = vadd.s32 %v4349_v30, %v4345_v7  ;;  %vm4178_vm0 = vcmp.eq.s32.totalorder %v12489_v13, 0 }
 0x5bd   : > { %v4183_v19 = vsel %vm4181_vm12, %v4182_v6, %v9124_v62  ;;  %v7486_v24 = vsel %vm4174_vm8, nan, %v7485_v14  ;;  %v4616_v54 = vand.u32 31, %v4614_v53  ;;  %v4180_v34 = vsel %vm4178_vm0, %v9122_v35, %v4179_v15 }
 0x5be   : > { %9125 = vrcp.f32 %v7486_v24  ;;  %v4477_v16 = vmul.f32 %v4476_v51, %v4474_v60  ;;  %v4351_v20 = vadd.s32 536870912, %v4350_v11  ;;  %vm4177_vm2 = vcmp.lt.s32.totalorder %v12489_v13, 2 }
 0x5bf   : > { %v4487_v57 = vadd.s32 3, %v4483_v18  ;;  %v4617_v17 = vsub.s32 32, %v4616_v54  ;;  %v12599_v37 = vadd.f32 %v12260_v21, %v12086_v3  ;;  %v4610_v10 = vor.u32 8388608, %v4609_v47 }
 0x5c0   : > { %v4478_v42 = vxor.u32 2147483648, %v4477_v16  ;;  %v12601_v5 = vshrl.u32 %v4351_v20, 30  ;;  %v12603_v43 = vshrl.u32 %v4614_v53, 5  ;;  %v4184_v56 = vsel %vm4177_vm2, %v4180_v34, %v4183_v19 }
 0x5c1   : > { %v4619_v46 = vshll.u32 %v9165_v23, %v4616_v54  ;;  %v4620_v38 = vshrl.u32 %v9166_v27, %v4617_v17  ;;  %v4623_v58 = vshrl.u32 %v9167_v29, %v4617_v17  ;;  %v4622_v3 = vshll.u32 %v9166_v27, %v4616_v54 }
 0x5c2   : > { %v4479_v13 = vsel %vm4396_vm1, %v4478_v42, %v4477_v16  ;;  %v4353_v63 = vshll.u32 %v12601_v5, 30  ;;  %v4629_v21 = vshrl.u32 %v9169_v33, %v4617_v17  ;;  %v4625_v50 = vshll.u32 %v9167_v29, %v4616_v54 }
 0x5c3   : > { %v4482_v25 = vsel %vm12542_vm5, %v12264_v52, %v4479_v13  ;;  %v4626_v59 = vshrl.u32 %v9168_v31, %v4617_v17  ;;  %v4628_v55 = vshll.u32 %v9168_v31, %v4616_v54  ;;  %v4621_v45 = vor.u32 %v4620_v38, %v4619_v46 }
 0x5c4   : > { %9127 = vcosq.f32 %v4482_v25  ;;  %v12619_v41 = vsub.s32 %v4350_v11, %v4353_v63  ;;  %v4631_v12 = vshll.u32 %v9169_v33, %v4616_v54  ;;  %v4624_v35 = vor.u32 %v4623_v58, %v4622_v3 }
 0x5c5   : > { %9129 = vsinq.f32 %v4482_v25  ;;  %v4630_v2 = vor.u32 %v4629_v21, %v4628_v55  ;;  %v4632_v4 = vshrl.u32 %v9170_v40, %v4617_v17  ;;  %v7786_v8 = vand.u32 3, %v4483_v18 }
 0x5c6   : > { %v4356_v61 = vsub.s32 0, %v12619_v41  ;;  %v12624_v62 = vand.u32 3, %v4487_v57  ;;  %v4627_v6 = vor.u32 %v4626_v59, %v4625_v50  ;;  %v12626_v1 = vshll.u32 %v4610_v10, 8 }
 0x5c7   : > { %v4633_v22 = vor.u32 %v4632_v4, %v4631_v12  ;;  %v4185_v49 = vsel %vm4174_vm8, nan, %v4184_v56  ;;  %vm4634_vm1 = vcmp.lt.s32.totalorder %v12603_v43, 1  ;;  %vm4637_vm3 = vcmp.lt.s32.totalorder %v12603_v43, 4 }
 0x5c8   : > { %v9126_v15 = vpop.eup %9125  ;;  %v8377_v9 = vmin.u32 %v4356_v61, %v12619_v41  ;;  %v4642_v53 = vsel %vm4634_vm1, %v4621_v45, %v4624_v35  ;;  %v4643_v36 = vsel %vm4637_vm3, %v4630_v2, 920167782  ;;  %v4501_v18 = vand.u32 2139095040, %v12599_v37 }
 0x5c9   : > { %v8060_v7 = vmul.f32 %v9126_v15, %v4185_v49  ;;  %vm7787_vm4 = vcmp.lt.s32.totalorder %v7786_v8, 2  ;;  %v4618_v47 = vshrl.u32 %v9165_v23, %v4617_v17  ;;  %vm4635_vm6 = vcmp.lt.s32.totalorder %v12603_v43, 2 }
 0x5ca   : > { %v4358_v30 = vclz %v8377_v9  ;;  %vm4636_vm5 = vcmp.lt.s32.totalorder %v12603_v43, 3  ;;  %v4639_v32 = vsel %vm4637_vm3, %v4627_v6, 2102212464  ;;  %v4646_v60 = vsel %vm4634_vm1, %v4624_v35, %v4627_v6 }
 0x5cb   : > { %8093 = vst.msk [vmem:[%s9829_s16 + $0xd0] sm:$0xff] %vm8066_vm13, %v8060_v7  ;;  %v4644_v14 = vsel %vm4636_vm5, %v4627_v6, %v4643_v36  ;;  %v4647_v51 = vsel %vm4637_vm3, %v4633_v22, 1326507024  ;;  %v4638_v19 = vsel %vm4634_vm1, %v4618_v47, %v4621_v45  ;;  %v4502_v57 = vshrl.u32 %v4501_v18, 23 }
 0x5cc   : > { %v8378_v11 = vadd.s32 4294967294, %v4358_v30  ;;  %v4645_v24 = vsel %vm4635_vm6, %v4642_v53, %v4644_v14  ;;  %v4648_v54 = vsel %vm4636_vm5, %v4630_v2, %v4647_v51  ;;  %v4640_v42 = vsel %vm4636_vm5, %v4624_v35, %v4639_v32 }
 0x5cd   : > { %v4649_v34 = vsel %vm4635_vm6, %v4646_v60, %v4648_v54  ;;  %v12650_v16 = vmul.u32.u64.low %v12626_v1, %v4645_v24  ;;  %v12651_v20 = vmul.u32.u64.high %v12626_v1, %v4645_v24, %v12650_v16  ;;  %vm7788_vm8 = vcmp.eq.s32.totalorder %v7786_v8, 0 }
 0x5ce   : > { %v9128_v17 = vpop.eup %9127  ;;  %vm8379_vm7 = vcmp.lt.s32.totalorder %v8378_v11, 0  ;;  %v12655_v10 = vmul.u32.u64.low %v12626_v1, %v4649_v34  ;;  %v12656_v56 = vmul.u32.u64.high %v12626_v1, %v4649_v34, %v12655_v10  ;;  %vm7791_vm9 = vcmp.eq.s32.totalorder %v7786_v8, 2 }
 0x5cf   : > { %v9130_v46 = vpop.eup %9129  ;;  %v4494_v38 = vxor.u32 2147483648, %v9128_v17  ;;  %v4361_v58 = vsel %vm8379_vm7, 0, %v8378_v11  ;;  %v4346_v63 = vadd.s32 %v12555_v28, %v12566_v48  ;;  %v4641_v50 = vsel %vm4635_vm6, %v4638_v19, %v4640_v42 }
 0x5d0   : > { %v4491_v13 = vxor.u32 2147483648, %v9130_v46  ;;  %v4362_v3 = vsub.s32 32, %v4361_v58  ;;  %v4366_v21 = vsub.s32 4294967266, %v4361_v58  ;;  %v4660_v59 = vadd.s32 1, %v12651_v20 }
 0x5d1   : > { %v7793_v25 = vsel %vm7791_vm9, %v4494_v38, %v9130_v46  ;;  %v8384_v55 = vadd.s32 4294967169, %v4502_v57  ;;  %v4363_v12 = vshll.u32 %v12619_v41, %v4361_v58  ;;  %vm4486_vm11 = vweird.f32 %v12264_v52 }
 0x5d2   : > { %v7790_v45 = vsel %vm7788_vm8, %v9128_v17, %v4491_v13  ;;  %v4364_v35 = vshrl.u32 %v4346_v63, %v4362_v3  ;;  %v4367_v2 = vadd.s32 127, %v4366_v21  ;;  %v4376_v28 = vsub.s32 4, %v12601_v5 }
 0x5d3   : > { %v7794_v4 = vsel %vm7787_vm4, %v7790_v45, %v7793_v25  ;;  %vm4659_vm10 = vc.u32 %v12656_v56, %v12650_v16  ;;  %v4657_v6 = vmul.u32 %v12626_v1, %v4641_v50  ;;  %vm4292_vm12 = vcmp.lt.s32.totalorder %v12394_v0, 0 }
 0x5d4   : > { %v7795_v48 = vsel %vm4486_vm11, nan, %v7794_v4  ;;  %v4365_v43 = vor.u32 %v4364_v35, %v4363_v12  ;;  %v4368_v61 = vshll.u32 %v4367_v2, 23  ;;  %v4661_v41 = vsel %vm4659_vm10, %v4660_v59, %v12651_v20 }
 0x5d5   : > { %9131 = vrcp.f32 %v7795_v48  ;;  %v4508_v22 = vadd.s32 1, %v8384_v55  ;;  %vm4490_vm14 = vcmp.eq.s32.totalorder %v12624_v62, 0  ;;  %vm4493_vm15 = vcmp.eq.s32.totalorder %v12624_v62, 2 }
 0x5d6   : > { %v4369_v8 = vor.u32 4788187, %v4368_v61  ;;  %v4662_v15 = vadd.s32 %v4661_v41, %v4657_v6  ;;  %v4492_v49 = vsel %vm4490_vm14, %v9128_v17, %v4491_v13  ;;  %v4495_v9 = vsel %vm4493_vm15, %v4494_v38, %v9130_v46 }
 0x5d7   : > { %v4377_v7 = vsel %vm4292_vm12, %v4376_v28, %v12601_v5  ;;  %vm4509_vm0 = vcmp.gt.s32.totalorder %v4508_v22, 0  ;;  %v4372_v53 = vcvt.s32.f32 %v4365_v43  ;;  %vm4489_vm2 = vcmp.lt.s32.totalorder %v12624_v62, 2 }
 0x5d8   : > { %v4370_v1 = vand.u32 2147483647, %v4369_v8  ;;  %v4663_v36 = vadd.s32 536870912, %v4662_v15  ;;  %v4510_v18 = vsel %vm4509_vm0, %v4508_v22, 0  ;;  %vm12682_vm1 = vcmp.le.f32.partialorder %v4290_v39, 0.7853982 }
 0x5d9   : > { %v4498_v47 = vand.u32 2147483647, %v12599_v37  ;;  %v4512_v32 = vand.u32 31, %v4510_v18  ;;  %v4496_v14 = vsel %vm4489_vm2, %v4492_v49, %v4495_v9  ;;  %v4379_v5 = vsel %vm12682_vm1, 0, %v4377_v7 }
 0x5da   : > { %v4373_v60 = vmul.f32 %v4372_v53, %v4370_v1  ;;  %v12689_v51 = vshrl.u32 %v4663_v36, 30  ;;  %v4497_v39 = vsel %vm4486_vm11, nan, %v4496_v14  ;;  %v12694_v24 = vand.u32 3, %v4379_v5 }
 0x5db   : > { %v4513_v11 = vsub.s32 32, %v4512_v32  ;;  %v4505_v54 = vand.u32 8388607, %v4498_v47  ;;  %v12702_v57 = vshrl.u32 %v4510_v18, 5  ;;  %v4515_v63 = vshll.u32 %v9165_v23, %v4512_v32 }
 0x5dc   : > { %v4374_v19 = vxor.u32 2147483648, %v4373_v60  ;;  %v4665_v62 = vshll.u32 %v12689_v51, 30  ;;  %v4518_v3 = vshll.u32 %v9166_v27, %v4512_v32  ;;  %v4521_v21 = vshll.u32 %v9167_v29, %v4512_v32 }
 0x5dd   : > { %v4516_v17 = vshrl.u32 %v9166_v27, %v4513_v11  ;;  %v4519_v10 = vshrl.u32 %v9167_v29, %v4513_v11  ;;  %v4522_v46 = vshrl.u32 %v9168_v31, %v4513_v11  ;;  %v4525_v38 = vshrl.u32 %v9169_v33, %v4513_v11 }
 0x5de   : > { %v4375_v34 = vsel %vm4292_vm12, %v4374_v19, %v4373_v60  ;;  %v12700_v20 = vsub.s32 %v4662_v15, %v4665_v62  ;;  %v4524_v25 = vshll.u32 %v9168_v31, %v4512_v32  ;;  %v4528_v55 = vshrl.u32 %v9170_v40, %v4513_v11 }
 0x5df   : > { %v9132_v42 = vpop.eup %9131  ;;  %v4378_v52 = vsel %vm12682_vm1, %v12394_v0, %v4375_v34  ;;  %v4517_v59 = vor.u32 %v4516_v17, %v4515_v63  ;;  %v4520_v45 = vor.u32 %v4519_v10, %v4518_v3  ;;  %v4523_v12 = vor.u32 %v4522_v46, %v4521_v21 }
 0x5e0   : > { %v8063_v58 = vmul.f32 %v9132_v42, %v4497_v39  ;;  %9133 = vcosq.f32 %v4378_v52  ;;  %v4668_v13 = vsub.s32 0, %v12700_v20  ;;  %v4526_v35 = vor.u32 %v4525_v38, %v4524_v25 }
 0x5e1   : > { %9135 = vsinq.f32 %v4378_v52  ;;  %v4527_v2 = vshll.u32 %v9169_v33, %v4512_v32  ;;  %v4383_v4 = vadd.s32 3, %v4379_v5  ;;  %vm7688_vm3 = vcmp.eq.s32.totalorder %v12694_v24, 2 }
 0x5e2   : > { %8096 = vst.msk [vmem:[%s9829_s16 + $0xe8] sm:$0xff] %vm8066_vm13, %v8063_v58  ;;  %v8389_v50 = vmin.u32 %v4668_v13, %v12700_v20  ;;  %v4506_v28 = vor.u32 8388608, %v4505_v54  ;;  %v4514_v29 = vshrl.u32 %v9165_v23, %v4513_v11  ;;  %vm4530_vm4 = vcmp.lt.s32.totalorder %v12702_v57, 1 }
 0x5e3   : > { %v4529_v31 = vor.u32 %v4528_v55, %v4527_v2  ;;  %vm4531_vm6 = vcmp.lt.s32.totalorder %v12702_v57, 2  ;;  %vm4532_vm5 = vcmp.lt.s32.totalorder %v12702_v57, 3  ;;  %vm4533_vm7 = vcmp.lt.s32.totalorder %v12702_v57, 4 }
 0x5e4   : > { %v4670_v27 = vclz %v8389_v50  ;;  %v4538_v33 = vsel %vm4530_vm4, %v4517_v59, %v4520_v45  ;;  %v4539_v40 = vsel %vm4533_vm7, %v4526_v35, 920167782  ;;  %v4542_v43 = vsel %vm4530_vm4, %v4520_v45, %v4523_v12 }
 0x5e5   : > { %v4543_v61 = vsel %vm4533_vm7, %v4529_v31, 1326507024  ;;  %v4535_v23 = vsel %vm4533_vm7, %v4523_v12, 2102212464  ;;  %v4540_v6 = vsel %vm4532_vm5, %v4523_v12, %v4539_v40  ;;  %v4658_v22 = vadd.s32 %v12650_v16, %v12656_v56 }
 0x5e6   : > { %v8390_v48 = vadd.s32 4294967294, %v4670_v27  ;;  %v4544_v41 = vsel %vm4532_vm5, %v4526_v35, %v4543_v61  ;;  %v4546_v49 = vshll.u32 %v4506_v28, 8  ;;  %v4534_v53 = vsel %vm4530_vm4, %v4514_v29, %v4517_v59 }
 0x5e7   : > { %v4545_v15 = vsel %vm4531_vm6, %v4542_v43, %v4544_v41  ;;  %v4541_v36 = vsel %vm4531_vm6, %v4538_v33, %v4540_v6  ;;  %v4536_v32 = vsel %vm4532_vm5, %v4520_v45, %v4535_v23  ;;  %vm7685_vm9 = vcmp.eq.s32.totalorder %v12694_v24, 0 }
 0x5e8   : > { %vm8391_vm8 = vcmp.lt.s32.totalorder %v8390_v48, 0  ;;  %v12745_v16 = vmul.u32.u64.low %v4546_v49, %v4545_v15  ;;  %v12746_v56 = vmul.u32.u64.high %v4546_v49, %v4545_v15, %v12745_v16  ;;  %vm7684_vm11 = vcmp.lt.s32.totalorder %v12694_v24, 2 }
 0x5e9   : > { %v4673_v8 = vsel %vm8391_vm8, 0, %v8390_v48  ;;  %v12752_v62 = vmul.u32.u64.low %v4546_v49, %v4541_v36  ;;  %v12753_v39 = vmul.u32.u64.high %v4546_v49, %v4541_v36, %v12752_v62  ;;  %vm4382_vm10 = vweird.f32 %v12394_v0 }
 0x5ea   : > { %v9134_v9 = vpop.eup %9133  ;;  %v4674_v7 = vsub.s32 32, %v4673_v8  ;;  %v4678_v1 = vsub.s32 4294967266, %v4673_v8  ;;  %v4675_v60 = vshll.u32 %v12700_v20, %v4673_v8  ;;  %v4537_v20 = vsel %vm4531_vm6, %v4534_v53, %v4536_v32 }
 0x5eb   : > { %v9136_v18 = vpop.eup %9135  ;;  %v4390_v30 = vxor.u32 2147483648, %v9134_v9  ;;  %v4384_v52 = vand.u32 3, %v4383_v4  ;;  %vm4555_vm12 = vc.u32 %v12746_v56, %v12752_v62  ;;  %v4556_v24 = vadd.s32 1, %v12753_v39 }
 0x5ec   : > { %v4387_v14 = vxor.u32 2147483648, %v9136_v18  ;;  %v4676_v5 = vshrl.u32 %v4658_v22, %v4674_v7  ;;  %v4679_v11 = vadd.s32 127, %v4678_v1  ;;  %v4553_v13 = vmul.u32 %v4546_v49, %v4537_v20 }
 0x5ed   : > { %v7690_v19 = vsel %vm7688_vm3, %v4390_v30, %v9136_v18  ;;  %v4557_v63 = vsel %vm4555_vm12, %v4556_v24, %v12753_v39  ;;  %vm4386_vm14 = vcmp.eq.s32.totalorder %v4384_v52, 0  ;;  %vm4389_vm15 = vcmp.eq.s32.totalorder %v4384_v52, 2 }
 0x5ee   : > { %v7687_v54 = vsel %vm7685_vm9, %v9134_v9, %v4387_v14  ;;  %v4677_v34 = vor.u32 %v4676_v5, %v4675_v60  ;;  %v4680_v17 = vshll.u32 %v4679_v11, 23  ;;  %v4558_v3 = vadd.s32 %v4557_v63, %v4553_v13 }
 0x5ef   : > { %v7691_v42 = vsel %vm7684_vm11, %v7687_v54, %v7690_v19  ;;  %v4388_v21 = vsel %vm4386_vm14, %v9134_v9, %v4387_v14  ;;  %v4391_v25 = vsel %vm4389_vm15, %v4390_v30, %v9136_v18  ;;  %vm4385_vm0 = vcmp.lt.s32.totalorder %v4384_v52, 2 }
 0x5f0   : > { %v7692_v10 = vsel %vm4382_vm10, nan, %v7691_v42  ;;  %v4681_v46 = vor.u32 4788187, %v4680_v17  ;;  %v4684_v58 = vcvt.s32.f32 %v4677_v34  ;;  %v4559_v59 = vadd.s32 536870912, %v4558_v3 }
 0x5f1   : > { %9137 = vrcp.f32 %v7692_v10  ;;  %vm12768_vm2 = vcmp.le.f32.partialorder %v4602_v26, 0.7853982  ;;  %vm4604_vm1 = vcmp.lt.s32.totalorder %v12461_v44, 0  ;;  %v4392_v45 = vsel %vm4385_vm0, %v4388_v21, %v4391_v25 }
 0x5f2   : > { %v4682_v38 = vand.u32 2147483647, %v4681_v46  ;;  %v4688_v35 = vsub.s32 4, %v12689_v51  ;;  %v12774_v2 = vshrl.u32 %v4559_v59, 30  ;;  %v4393_v26 = vsel %vm4382_vm10, nan, %v4392_v45 }
 0x5f3   : > { %v4554_v7 = vadd.s32 %v12752_v62, %v12746_v56  ;;  %vm4694_vm7 = vweird.f32 %v12461_v44  ;;  %vm4500_vm10 = vcmp.lt.s32.totalorder %v12599_v37, 0  ;;  %vm4499_vm12 = vcmp.le.f32.partialorder %v4498_v47, 0.7853982 }
 0x5f4   : > { %v4685_v57 = vmul.f32 %v4684_v58, %v4682_v38  ;;  %v4561_v27 = vshll.u32 %v12774_v2, 30  ;;  %v4689_v31 = vsel %vm4604_vm1, %v4688_v35, %v12689_v51  ;;  %v4584_v46 = vsub.s32 4, %v12774_v2 }
 0x5f5   : > { %v4691_v40 = vsel %vm12768_vm2, 0, %v4689_v31 }
 0x5f6   : > { %v4686_v50 = vxor.u32 2147483648, %v4685_v57  ;;  %v4562_v48 = vsub.s32 %v4558_v3, %v4561_v27  ;;  %v7992_v61 = vand.u32 3, %v4691_v40  ;;  %v4695_v0 = vadd.s32 3, %v4691_v40 }
 0x5f7   : > { %v4585_v38 = vsel %vm4500_vm10, %v4584_v46, %v12774_v2 }
 0x5f8   : > { %v4687_v12 = vsel %vm4604_vm1, %v4686_v50, %v4685_v57  ;;  %v4564_v33 = vsub.s32 0, %v4562_v48  ;;  %vm7997_vm3 = vcmp.eq.s32.totalorder %v7992_v61, 2  ;;  %vm7994_vm6 = vcmp.eq.s32.totalorder %v7992_v61, 0 }
 0x5f9   : > { %v4690_v4 = vsel %vm12768_vm2, %v12461_v44, %v4687_v12  ;;  %vm7993_vm5 = vcmp.lt.s32.totalorder %v7992_v61, 2  ;;  %v4696_v18 = vand.u32 3, %v4695_v0  ;;  %v4587_v44 = vsel %vm4499_vm12, 0, %v4585_v38 }
 0x5fa   : > { %9139 = vcosq.f32 %v4690_v4  ;;  %v8385_v43 = vmin.u32 %v4564_v33, %v4562_v48  ;;  %v7889_v58 = vand.u32 3, %v4587_v44  ;;  %v4591_v3 = vadd.s32 3, %v4587_v44 }
 0x5fb   : > { %v9138_v28 = vpop.eup %9137  ;;  %9141 = vsinq.f32 %v4690_v4  ;;  %vm4698_vm8 = vcmp.eq.s32.totalorder %v4696_v18, 0  ;;  %vm4701_vm9 = vcmp.eq.s32.totalorder %v4696_v18, 2  ;;  %vm4697_vm11 = vcmp.lt.s32.totalorder %v4696_v18, 2 }
 0x5fc   : > { %v8062_v29 = vmul.f32 %v9138_v28, %v4393_v26  ;;  %v4566_v23 = vclz %v8385_v43  ;;  %vm7894_vm14 = vcmp.eq.s32.totalorder %v7889_v58, 2  ;;  %vm7891_vm15 = vcmp.eq.s32.totalorder %v7889_v58, 0 }
 0x5fd   : > { %vm7890_vm0 = vcmp.lt.s32.totalorder %v7889_v58, 2  ;;  %vm4590_vm2 = vweird.f32 %v12599_v37  ;;  %v4592_v59 = vand.u32 3, %v4591_v3 }
 0x5fe   : > { %8095 = vst.msk [vmem:[%s9829_s16 + $0xe0] sm:$0xff] %vm8066_vm13, %v8062_v29  ;;  %v8386_v41 = vadd.s32 4294967294, %v4566_v23 }
 0x5ff   : > { %vm4594_vm1 = vcmp.eq.s32.totalorder %v4592_v59, 0 }
 0x600   : > { %vm8387_vm4 = vcmp.lt.s32.totalorder %v8386_v41, 0 }
 0x601   : > { %v4569_v49 = vsel %vm8387_vm4, 0, %v8386_v41  ;;  %vm4593_vm4 = vcmp.lt.s32.totalorder %v4592_v59, 2 }
 0x602   : > { %v4570_v1 = vsub.s32 32, %v4569_v49  ;;  %v4574_v36 = vsub.s32 4294967266, %v4569_v49  ;;  %v4571_v16 = vshll.u32 %v4562_v48, %v4569_v49 }
 0x604   : > { %v9140_v6 = vpop.eup %9139  ;;  %v4572_v32 = vshrl.u32 %v4554_v7, %v4570_v1  ;;  %v4575_v14 = vadd.s32 127, %v4574_v36 }
 0x605   : > { %v9142_v22 = vpop.eup %9141  ;;  %v4702_v8 = vxor.u32 2147483648, %v9140_v6 }
 0x606   : > { %v4699_v15 = vxor.u32 2147483648, %v9142_v22  ;;  %v4573_v60 = vor.u32 %v4572_v32, %v4571_v16  ;;  %v4576_v5 = vshll.u32 %v4575_v14, 23 }
 0x607   : > { %v7999_v51 = vsel %vm7997_vm3, %v4702_v8, %v9142_v22  ;;  %v4703_v56 = vsel %vm4701_vm9, %v4702_v8, %v9142_v22  ;;  %vm4597_vm3 = vcmp.eq.s32.totalorder %v4592_v59, 2 }
 0x608   : > { %v7996_v9 = vsel %vm7994_vm6, %v9140_v6, %v4699_v15  ;;  %v4700_v11 = vsel %vm4698_vm8, %v9140_v6, %v4699_v15  ;;  %v4577_v19 = vor.u32 4788187, %v4576_v5  ;;  %v4580_v39 = vcvt.s32.f32 %v4573_v60 }
 0x609   : > { %v8000_v53 = vsel %vm7993_vm5, %v7996_v9, %v7999_v51  ;;  %v4704_v54 = vsel %vm4697_vm11, %v4700_v11, %v4703_v56 }
 0x60a   : > { %v8001_v30 = vsel %vm4694_vm7, nan, %v8000_v53  ;;  %v4578_v62 = vand.u32 2147483647, %v4577_v19  ;;  %v4705_v42 = vsel %vm4694_vm7, nan, %v4704_v54 }
 0x60b   : > { %9143 = vrcp.f32 %v8001_v30 }
 0x60c   : > { %v4581_v34 = vmul.f32 %v4580_v39, %v4578_v62 }
 0x60e   : > { %v4582_v20 = vxor.u32 2147483648, %v4581_v34 }
 0x610   : > { %v4583_v10 = vsel %vm4500_vm10, %v4582_v20, %v4581_v34 }
 0x611   : > { %v4586_v24 = vsel %vm4499_vm12, %v12599_v37, %v4583_v10 }
 0x612   : > { %9145 = vcosq.f32 %v4586_v24 }
 0x613   : > { %9147 = vsinq.f32 %v4586_v24 }
 0x615   : > { %v9144_v17 = vpop.eup %9143 }
 0x616   : > { %v8065_v52 = vmul.f32 %v9144_v17, %v4705_v42 }
 0x618   : > { %8098 = vst.msk [vmem:[%s9829_s16 + $0xf8] sm:$0xff] %vm8066_vm13, %v8065_v52 }
 0x61c   : > { %v9146_v13 = vpop.eup %9145 }
 0x61d   : > { %v9148_v63 = vpop.eup %9147  ;;  %v4598_v57 = vxor.u32 2147483648, %v9146_v13 }
 0x61e   : > { %v4595_v21 = vxor.u32 2147483648, %v9148_v63 }
 0x61f   : > { %v7896_v47 = vsel %vm7894_vm14, %v4598_v57, %v9148_v63  ;;  %v4599_v12 = vsel %vm4597_vm3, %v4598_v57, %v9148_v63 }
 0x620   : > { %v7893_v25 = vsel %vm7891_vm15, %v9146_v13, %v4595_v21  ;;  %v4596_v45 = vsel %vm4594_vm1, %v9146_v13, %v4595_v21 }
 0x621   : > { %v7897_v50 = vsel %vm7890_vm0, %v7893_v25, %v7896_v47  ;;  %v4600_v35 = vsel %vm4593_vm4, %v4596_v45, %v4599_v12 }
 0x622   : > { %v7898_v55 = vsel %vm4590_vm2, nan, %v7897_v50  ;;  %v4601_v4 = vsel %vm4590_vm2, nan, %v4600_v35 }
 0x623   : > { %9149 = vrcp.f32 %v7898_v55 }
 0x62d   : > { %v9150_v2 = vpop.eup %9149 }
 0x62e   : > { %v8064_v27 = vmul.f32 %v9150_v2, %v4601_v4 }
 0x630   : > { %8097 = vst.msk [vmem:[%s9829_s16 + $0xf0] sm:$0xff] %vm8066_vm13, %v8064_v27 }
 0x631 PF: > { %s17_s24 = sadd.s32 1, %s9162_s24  }
 0x632   : > { %p14_p4 = scmp.ge.s32.totalorder %s17_s24, 4  }
 0x634   :  { %16 = sbr.rel (!%p14_p4) target bundleno = 1 (0x1), region = 78 }

</bundles_post_ra>
